<compile_context>
chip_gen: v6e
topology: v6e:2x2x1
jax: 0.10.0
libtpu: 0.0.40
codegen_flags: <defaults>
</compile_context>

<pallas_src>
import functools
import math

import jax
import jax.numpy as jnp
import numpy as np
from jax.experimental import pallas as pl
from jax.experimental.pallas import tpu as pltpu

EPS = 1e-8
LANE = 128
SUBLANE = 8


def _round_up(x, m):
    return ((x + m - 1) // m) * m


def _pad2(a, rows, cols):
    return jnp.pad(a, ((0, rows - a.shape[0]), (0, cols - a.shape[1])))


# ----------------------------------------------------------------------------
# Kernel A: recurrent loop.  grid = (S // T,), T timesteps per grid step,
# hidden state resident in hid_ref across grid iterations.  num_layers == 2.
# ----------------------------------------------------------------------------
def rnn_kernel(x_ref,
               w0_ref, b0_ref, p0_ref, q0_ref, g0_ref,
               w1_ref, b1_ref, p1_ref, q1_ref, g1_ref,
               out_ref, hid_ref, *, chunk, d_half):
    c = pl.program_id(0)

    @pl.when(c == 0)
    def _():
        hid_ref[...] = jnp.zeros_like(hid_ref)

    # Weights/biases are grid-resident (constant index maps); load once.
    W0 = w0_ref[...]; B0 = b0_ref[...]; P0 = p0_ref[...]; Q0 = q0_ref[...]
    W1 = w1_ref[...]; B1 = b1_ref[...]; P1 = p1_ref[...]; Q1 = q1_ref[...]
    g0 = g0_ref[0, 0]          # SMEM scalar: 1 + stan_scale
    g1 = g1_ref[0, 0]

    def cell(inp, h_prev, W, Bv, P, Q, gain):
        # fused i2h + h2h:  [x | h_prev] @ [Wi ; Wh] + (bi + bh)
        xh = jnp.concatenate([inp, h_prev], axis=-1)
        hc = jnp.dot(xh, W, preferred_element_type=jnp.float32) + Bv
        # SelfScalableTanh: tanh(x) + scale*tanh(x) == (1 + scale) * tanh(x)
        hn = jnp.tanh(hc) * gain
        # DifferentiableXOR residual; one sigmoid pass over the full width.
        sg = jax.nn.sigmoid(hn)
        a = sg[:, :d_half]
        b = sg[:, d_half:2 * d_half]
        xor = 0.5 * (a + b - 2.0 * a * b)
        return hn + jnp.dot(xor, P, preferred_element_type=jnp.float32) + Q

    h0 = hid_ref[0]
    h1 = hid_ref[1]
    xc = x_ref[...]                              # (Bp, T, Ep)
    for t in range(chunk):                       # static unroll over the chunk
        xt = xc[:, t, :]                         # (Bp, Ep)
        h0 = cell(xt, h0, W0, B0, P0, Q0, g0)
        h1 = cell(h0, h1, W1, B1, P1, Q1, g1)
        out_ref[:, t:t + 1, :] = h1[:, None, :]
    hid_ref[0] = h0
    hid_ref[1] = h1


def run_rnn(x_bse, fused_layers, chunk, d_half):
    Bp, S, Ep = x_bse.shape
    Hp = fused_layers[0]['w'].shape[1]
    L = len(fused_layers)
    assert L == 2, "rnn_kernel is written for num_layers == 2"
    assert S % chunk == 0

    def const_spec(shape):
        nd = len(shape)
        return pl.BlockSpec(shape, lambda c, _nd=nd: (0,) * _nd)

    in_specs = [pl.BlockSpec((Bp, chunk, Ep), lambda c: (0, c, 0))]
    args = [x_bse]
    for lp in fused_layers:
        for name in ('w', 'b', 'p', 'q'):
            a = lp[name]
            args.append(a)
            in_specs.append(const_spec(a.shape))
        args.append(lp['gain'])
        in_specs.append(pl.BlockSpec(memory_space=pltpu.MemorySpace.SMEM))

    out_shapes = (jax.ShapeDtypeStruct((Bp, S, Hp), jnp.float32),
                  jax.ShapeDtypeStruct((L, Bp, Hp), jnp.float32))
    out_specs = (pl.BlockSpec((Bp, chunk, Hp), lambda c: (0, c, 0)),
                 pl.BlockSpec((L, Bp, Hp), lambda c: (0, 0, 0)))

    return pl.pallas_call(
        functools.partial(rnn_kernel, chunk=chunk, d_half=d_half),
        out_shape=out_shapes,
        grid=(S // chunk,),
        in_specs=in_specs,
        out_specs=out_specs,
        compiler_params=pltpu.CompilerParams(
            dimension_semantics=("arbitrary",)),
    )(*args)


# ----------------------------------------------------------------------------
# Kernel B: row-tiled Mahalanobis distances via the matmul decomposition
#   d^2 = sum o^2*iv - 2 * o @ (w*iv) + iv @ w^2   (last two terms hoisted)
# plus per-row sums over the real vocab columns (for the global mean).
# ----------------------------------------------------------------------------
def dist_kernel(o_ref, wiv_ref, wsq_ref, iv_ref, d_ref, rs_ref, *, v_real):
    o = o_ref[...]                                           # (TN, Hp)
    iv = iv_ref[...]                                         # (1, Hp)
    osq = jnp.sum(o * o * iv, axis=-1, keepdims=True)        # (TN, 1)
    cross = jnp.dot(o, wiv_ref[...],
                    preferred_element_type=jnp.float32)      # (TN, Vp)
    dsq = jnp.maximum(osq - 2.0 * cross + wsq_ref[...], 0.0)
    d = jnp.sqrt(dsq)
    d_ref[...] = d
    col = jax.lax.broadcasted_iota(jnp.int32, d.shape, 1)
    rs_ref[...] = jnp.sum(jnp.where(col < v_real, d, 0.0),
                          axis=-1, keepdims=True)


def run_dist(outs_flat, w_iv, w_sq, inv_var, v_real, tn):
    N, Hp = outs_flat.shape
    Vp = w_iv.shape[1]
    assert N % tn == 0
    return pl.pallas_call(
        functools.partial(dist_kernel, v_real=v_real),
        out_shape=(jax.ShapeDtypeStruct((N, Vp), jnp.float32),
                   jax.ShapeDtypeStruct((N, 1), jnp.float32)),
        grid=(N // tn,),
        in_specs=[pl.BlockSpec((tn, Hp), lambda i: (i, 0)),
                  pl.BlockSpec((Hp, Vp), lambda i: (0, 0)),
                  pl.BlockSpec((1, Vp), lambda i: (0, 0)),
                  pl.BlockSpec((1, Hp), lambda i: (0, 0))],
        out_specs=(pl.BlockSpec((tn, Vp), lambda i: (i, 0)),
                   pl.BlockSpec((tn, 1), lambda i: (i, 0))),
        compiler_params=pltpu.CompilerParams(
            dimension_semantics=("parallel",)),
    )(outs_flat, w_iv, w_sq, inv_var)


# ----------------------------------------------------------------------------
# Kernel C: harmonic "softmax": -n*log(d*inv_scale), masked logsumexp over the
# real vocab columns.  Row-tiled, inv_scale as an SMEM scalar (multiply, not
# divide).
# ----------------------------------------------------------------------------
def prob_kernel(d_ref, inv_s_ref, p_ref, *, n_exp, v_real):
    d = d_ref[...]                                           # (TN, Vp)
    dc = jnp.maximum(d * inv_s_ref[0, 0], 1e-6)
    log_inv = (-float(n_exp)) * jnp.log(dc + EPS)
    col = jax.lax.broadcasted_iota(jnp.int32, d.shape, 1)
    valid = col < v_real
    log_inv = jnp.where(valid, log_inv, -1e30)               # mask padded vocab
    m = jnp.max(log_inv, axis=-1, keepdims=True)
    lse = m + jnp.log(jnp.sum(jnp.exp(log_inv - m), axis=-1, keepdims=True))
    p_ref[...] = jnp.where(valid, jnp.exp(log_inv - lse), 0.0)


def run_prob(dist, inv_scale, n_exp, v_real, tn):
    N, Vp = dist.shape
    assert N % tn == 0
    return pl.pallas_call(
        functools.partial(prob_kernel, n_exp=n_exp, v_real=v_real),
        out_shape=jax.ShapeDtypeStruct((N, Vp), jnp.float32),
        grid=(N // tn,),
        in_specs=[pl.BlockSpec((tn, Vp), lambda i: (i, 0)),
                  pl.BlockSpec(memory_space=pltpu.MemorySpace.SMEM)],
        out_specs=pl.BlockSpec((tn, Vp), lambda i: (i, 0)),
        compiler_params=pltpu.CompilerParams(
            dimension_semantics=("parallel",)),
    )(dist, inv_scale)


# ----------------------------------------------------------------------------
# Full forward (glue: embedding gather, padding, variance, scale reduction)
# ----------------------------------------------------------------------------
def char_rnn_forward(x, params, chunk_t=8, row_tile=16):
    B, S = x.shape
    emb = params['embedding']           # (V, E)
    unemb = params['unembedding']       # (H, V)
    layers = params['layers']
    V, E = emb.shape
    H = layers[0]['wh'].shape[0]
    L = len(layers)

    Bp = _round_up(B, SUBLANE)
    Ep = _round_up(E, LANE)
    Hp = _round_up(H, LANE)
    Vp = _round_up(V, LANE)

    # Embedding gather (JAX glue).  Lane dims zero-padded to 128, batch padded
    # to 8 sublanes.  Kernel reads the (B, S, E) layout directly -> no HBM
    # transpose; padded batch rows are discarded after the RNN.
    emb_p = _pad2(emb, V, Ep)
    x_embed = jnp.take(emb_p, x, axis=0)                          # (B, S, Ep)
    x_embed = jnp.pad(x_embed, ((0, Bp - B), (0, 0), (0, 0)))     # (Bp, S, Ep)

    # Fused / padded per-layer parameters.  Padded rows/columns are zero so
    # padded hidden lanes stay exactly zero through the recurrence.
    fused = []
    for l, lp in enumerate(layers):
        in_size = E if l == 0 else H
        in_p = Ep if l == 0 else Hp
        w = jnp.zeros((in_p + Hp, Hp), jnp.float32)
        w = w.at[:in_size, :H].set(lp['wi'])
        w = w.at[in_p:in_p + H, :H].set(lp['wh'])
        fused.append(dict(
            w=w,
            b=_pad2(lp['bi'] + lp['bh'], 1, Hp),
            p=_pad2(lp['wp'], lp['wp'].shape[0], Hp),     # (H//2, Hp)
            q=_pad2(lp['bp'], 1, Hp),
            gain=(1.0 + lp['scale']).reshape(1, 1).astype(jnp.float32),
        ))

    chunk = chunk_t if (S % chunk_t == 0 and chunk_t % SUBLANE == 0) else S
    outs_full, hid_full = run_rnn(x_embed, fused, chunk, H // 2)

    outs = outs_full[:B]                          # drop padded-batch rows
    outs_flat = outs.reshape(B * S, Hp)

    # torch.var(dim=[0,1]) is unbiased (ddof=1); padded lanes are exactly 0.
    var_x = jnp.var(outs, axis=(0, 1), ddof=1) + EPS              # (Hp,)
    iv = (1.0 / var_x).astype(jnp.float32)
    unemb_p = _pad2(unemb, Hp, Vp)
    w_iv = (unemb_p * iv[:, None]).astype(jnp.float32)            # (Hp, Vp)
    w_sq = (iv[None, :] @ (unemb_p * unemb_p)).astype(jnp.float32)  # (1, Vp)
    iv2 = iv.reshape(1, Hp)

    N = B * S
    tn = row_tile if N % row_tile == 0 else N
    dist, row_sums = run_dist(outs_flat, w_iv, w_sq, iv2, V, tn)

    # scale_factor = max(mean(mahalanobis_d), EPS) from the per-row sums
    # (no re-read of the full (N, V) distance matrix).
    scale = jnp.maximum(jnp.sum(row_sums) / (N * V), EPS)
    inv_scale = (1.0 / scale).reshape(1, 1).astype(jnp.float32)

    n_exp = int(math.sqrt(H))                     # harmonic exponent (real H)
    p_flat = run_prob(dist, inv_scale, n_exp, V, tn)              # (N, Vp)
    p = p_flat.reshape(B, S, Vp)[:, :, :V]

    hidden = [hid_full[l, :B, :H] for l in range(L)]
    return p, hidden


# ----------------------------------------------------------------------------
# Pure-JAX reference (mirrors the PyTorch forward) for validation.
# ----------------------------------------------------------------------------
def reference_forward(x, params):
    B, S = x.shape
    emb = params['embedding']
    H = params['layers'][0]['wh'].shape[0]
    x_embed = jnp.take(emb, x, axis=0)             # (B, S, E)
    hidden = [jnp.zeros((B, H), jnp.float32) for _ in params['layers']]
    outs = []
    for t in range(S):
        inp = x_embed[:, t, :]
        new_hidden = []
        for lp, h_prev in zip(params['layers'], hidden):
            hc = inp @ lp['wi'] + lp['bi'] + h_prev @ lp['wh'] + lp['bh']
            th = jnp.tanh(hc)
            h_new = th + lp['scale'][0, 0] * th
            d = H // 2
            a = jax.nn.sigmoid(h_new[:, :d])
            b = jax.nn.sigmoid(h_new[:, d:])
            xor = 0.5 * (a + b - 2.0 * a * b)
            h_new = h_new + xor @ lp['wp'] + lp['bp']
            new_hidden.append(h_new)
            inp = h_new
        hidden = new_hidden
        outs.append(inp)
    outputs = jnp.stack(outs, axis=1)              # (B, S, H)
    var_x = jnp.var(outputs, axis=(0, 1), keepdims=True, ddof=1) + EPS
    delta = outputs[:, :, None, :] - params['unembedding'].T[None, None]
    md = jnp.sqrt(jnp.sum(delta ** 2 / var_x[:, :, None, :], axis=-1))
    sf = jnp.maximum(jnp.mean(md), EPS)
    mds = jnp.maximum(md / sf, 1e-6)
    n = int(math.sqrt(H))
    log_inv = -n * jnp.log(mds + EPS)
    log_sum = jax.nn.logsumexp(log_inv, axis=-1, keepdims=True)
    return jnp.exp(log_inv - log_sum), hidden


# ----------------------------------------------------------------------------
# Deterministic synthetic parameters (shapes follow the module __init__).
# ----------------------------------------------------------------------------
def init_params(key, V, E, H, L):
    ks = jax.random.split(key, 2 + L)
    emb = jax.random.normal(ks[0], (V, E), jnp.float32) * 0.5
    unemb = jax.random.normal(ks[1], (H, V), jnp.float32) / math.sqrt(H)
    layers = []
    for l in range(L):
        in_size = E if l == 0 else H
        lk = jax.random.split(ks[2 + l], 6)
        layers.append(dict(
            wi=jax.random.normal(lk[0], (in_size, H), jnp.float32) / math.sqrt(in_size),
            bi=jax.random.normal(lk[1], (1, H), jnp.float32) * 0.01,
            wh=jax.random.normal(lk[2], (H, H), jnp.float32) / math.sqrt(H),
            bh=jax.random.normal(lk[3], (1, H), jnp.float32) * 0.01,
            wp=jax.random.normal(lk[4], (H // 2, H), jnp.float32) / math.sqrt(H // 2),
            bp=jax.random.normal(lk[5], (1, H), jnp.float32) * 0.01,
            scale=jnp.full((1, 1), 0.1, jnp.float32),   # SelfScalableTanh init_scale
        ))
    return dict(embedding=emb, unembedding=unemb, layers=layers)


if __name__ == "__main__":
    B, S = 2, 16                # batch, seq_len (small; S exercises 2 chunks)
    V, E, H, L = 32, 16, 32, 2  # vocab, embed_dim, hidden_size, num_layers

    key = jax.random.PRNGKey(0)
    pkey, xkey = jax.random.split(key)
    params = init_params(pkey, V, E, H, L)
    x = jax.random.randint(xkey, (B, S), 0, V, dtype=jnp.int32)

    p, hidden = char_rnn_forward(x, params)
    jax.block_until_ready(p)

    assert p.shape == (B, S, V)
    assert len(hidden) == L and hidden[0].shape == (B, H)

    p_ref, hid_list_ref = reference_forward(x, params)
    np.testing.assert_allclose(np.asarray(p), np.asarray(p_ref),
                               rtol=1e-3, atol=1e-3)
    np.testing.assert_allclose(np.asarray(jnp.stack(hidden)),
                               np.asarray(jnp.stack(hid_list_ref)),
                               rtol=1e-3, atol=1e-3)

    print("KERNEL_OK")
</pallas_src>

<mosaic_0001>
module attributes {stable_mosaic.version = 11 : i64} {
  func.func @rnn_kernel(%arg0: i32, %arg1: memref<8x8x128xf32, #tpu.memory_space<vmem>>, %arg2: memref<256x128xf32, #tpu.memory_space<vmem>>, %arg3: memref<1x128xf32, #tpu.memory_space<vmem>>, %arg4: memref<16x128xf32, #tpu.memory_space<vmem>>, %arg5: memref<1x128xf32, #tpu.memory_space<vmem>>, %arg6: memref<1x1xf32, #tpu.memory_space<smem>>, %arg7: memref<256x128xf32, #tpu.memory_space<vmem>>, %arg8: memref<1x128xf32, #tpu.memory_space<vmem>>, %arg9: memref<16x128xf32, #tpu.memory_space<vmem>>, %arg10: memref<1x128xf32, #tpu.memory_space<vmem>>, %arg11: memref<1x1xf32, #tpu.memory_space<smem>>, %arg12: memref<8x8x128xf32, #tpu.memory_space<vmem>>, %arg13: memref<2x8x128xf32, #tpu.memory_space<vmem>>) attributes {dimension_semantics = [#tpu.dimension_semantics<arbitrary>], iteration_bounds = array<i64: 2>, scalar_prefetch = 0 : i64, scratch_operands = 0 : i64, tpu.core_type = #tpu.core_type<tc>, window_params = [{transform_indices = @transform_0, window_bounds = array<i64: 8, 8, 128>}, {pipeline_mode = #tpu.pipeline_mode<synchronous>, transform_indices = @transform_1, window_bounds = array<i64: 256, 128>}, {pipeline_mode = #tpu.pipeline_mode<synchronous>, transform_indices = @transform_2, window_bounds = array<i64: 1, 128>}, {pipeline_mode = #tpu.pipeline_mode<synchronous>, transform_indices = @transform_3, window_bounds = array<i64: 16, 128>}, {pipeline_mode = #tpu.pipeline_mode<synchronous>, transform_indices = @transform_4, window_bounds = array<i64: 1, 128>}, {transform_indices = @transform_5, window_bounds = array<i64: 1, 1>}, {pipeline_mode = #tpu.pipeline_mode<synchronous>, transform_indices = @transform_6, window_bounds = array<i64: 256, 128>}, {pipeline_mode = #tpu.pipeline_mode<synchronous>, transform_indices = @transform_7, window_bounds = array<i64: 1, 128>}, {pipeline_mode = #tpu.pipeline_mode<synchronous>, transform_indices = @transform_8, window_bounds = array<i64: 16, 128>}, {pipeline_mode = #tpu.pipeline_mode<synchronous>, transform_indices = @transform_9, window_bounds = array<i64: 1, 128>}, {transform_indices = @transform_10, window_bounds = array<i64: 1, 1>}, {transform_indices = @transform_11, window_bounds = array<i64: 8, 8, 128>}, {pipeline_mode = #tpu.pipeline_mode<synchronous>, transform_indices = @transform_12, window_bounds = array<i64: 2, 8, 128>}]} {
    %c0_i32 = arith.constant 0 : i32
    %0 = arith.cmpi eq, %arg0, %c0_i32 : i32
    %1 = arith.extui %0 : i1 to i32
    %c0_i32_0 = arith.constant 0 : i32
    %2 = arith.cmpi ne, %1, %c0_i32_0 : i32
    scf.if %2 {
      %cst_131 = arith.constant 0.000000e+00 : f32
      %456 = vector.broadcast %cst_131 : f32 to vector<2x8x128xf32>
      %c0_132 = arith.constant 0 : index
      %c0_133 = arith.constant 0 : index
      %c0_134 = arith.constant 0 : index
      %457 = vector.load %arg13[%c0_132, %c0_133, %c0_134] : memref<2x8x128xf32, #tpu.memory_space<vmem>>, vector<2x8x128xf32>
      tpu.vector_store %arg13[%c0_132, %c0_133, %c0_134], %456 {strides = array<i32>} : memref<2x8x128xf32, #tpu.memory_space<vmem>>, vector<2x8x128xf32>,
    } else {
    }
    %c0 = arith.constant 0 : index
    %c0_1 = arith.constant 0 : index
    %3 = vector.load %arg2[%c0, %c0_1] : memref<256x128xf32, #tpu.memory_space<vmem>>, vector<256x128xf32>
    %c0_2 = arith.constant 0 : index
    %c0_3 = arith.constant 0 : index
    %4 = vector.load %arg3[%c0_2, %c0_3] : memref<1x128xf32, #tpu.memory_space<vmem>>, vector<1x128xf32>
    %c0_4 = arith.constant 0 : index
    %c0_5 = arith.constant 0 : index
    %5 = vector.load %arg4[%c0_4, %c0_5] : memref<16x128xf32, #tpu.memory_space<vmem>>, vector<16x128xf32>
    %c0_6 = arith.constant 0 : index
    %c0_7 = arith.constant 0 : index
    %6 = vector.load %arg5[%c0_6, %c0_7] : memref<1x128xf32, #tpu.memory_space<vmem>>, vector<1x128xf32>
    %c0_8 = arith.constant 0 : index
    %c0_9 = arith.constant 0 : index
    %7 = vector.load %arg7[%c0_8, %c0_9] : memref<256x128xf32, #tpu.memory_space<vmem>>, vector<256x128xf32>
    %c0_10 = arith.constant 0 : index
    %c0_11 = arith.constant 0 : index
    %8 = vector.load %arg8[%c0_10, %c0_11] : memref<1x128xf32, #tpu.memory_space<vmem>>, vector<1x128xf32>
    %c0_12 = arith.constant 0 : index
    %c0_13 = arith.constant 0 : index
    %9 = vector.load %arg9[%c0_12, %c0_13] : memref<16x128xf32, #tpu.memory_space<vmem>>, vector<16x128xf32>
    %c0_14 = arith.constant 0 : index
    %c0_15 = arith.constant 0 : index
    %10 = vector.load %arg10[%c0_14, %c0_15] : memref<1x128xf32, #tpu.memory_space<vmem>>, vector<1x128xf32>
    %c0_16 = arith.constant 0 : index
    %c0_17 = arith.constant 0 : index
    %11 = memref.load %arg6[%c0_16, %c0_17] : memref<1x1xf32, #tpu.memory_space<smem>>
    %c0_18 = arith.constant 0 : index
    %c0_19 = arith.constant 0 : index
    %12 = memref.load %arg11[%c0_18, %c0_19] : memref<1x1xf32, #tpu.memory_space<smem>>
    %c0_20 = arith.constant 0 : index
    %c0_21 = arith.constant 0 : index
    %c0_22 = arith.constant 0 : index
    %13 = vector.load %arg13[%c0_20, %c0_21, %c0_22] : memref<2x8x128xf32, #tpu.memory_space<vmem>>, vector<1x8x128xf32>
    %14 = vector.shape_cast %13 : vector<1x8x128xf32> to vector<8x128xf32>
    %c1 = arith.constant 1 : index
    %c0_23 = arith.constant 0 : index
    %c0_24 = arith.constant 0 : index
    %15 = vector.load %arg13[%c1, %c0_23, %c0_24] : memref<2x8x128xf32, #tpu.memory_space<vmem>>, vector<1x8x128xf32>
    %16 = vector.shape_cast %15 : vector<1x8x128xf32> to vector<8x128xf32>
    %c0_25 = arith.constant 0 : index
    %c0_26 = arith.constant 0 : index
    %c0_27 = arith.constant 0 : index
    %17 = vector.load %arg1[%c0_25, %c0_26, %c0_27] : memref<8x8x128xf32, #tpu.memory_space<vmem>>, vector<8x8x128xf32>
    %18 = vector.extract_strided_slice %17 {offsets = [0, 0, 0], sizes = [8, 1, 128], strides = [1, 1, 1]} : vector<8x8x128xf32> to vector<8x1x128xf32>
    %19 = vector.shape_cast %18 : vector<8x1x128xf32> to vector<8x128xf32>
    %20 = tpu.concatenate %19, %14 in 1 : vector<8x128xf32>, vector<8x128xf32> -> vector<8x256xf32>
    %cst = arith.constant dense<0.000000e+00> : vector<8x128xf32>
    %21 = tpu.matmul %20, %3, %cst {dimension_numbers = #tpu.dot_dimension_numbers<[1], [0], [0], [1], [0, 0, 1, 1], [], []>} : vector<8x256xf32>, vector<256x128xf32>, vector<8x128xf32> -> vector<8x128xf32>
    %22 = vector.broadcast %4 : vector<1x128xf32> to vector<8x128xf32>
    %23 = arith.addf %21, %22 : vector<8x128xf32>
    %24 = math.tanh %23 : vector<8x128xf32>
    %25 = vector.broadcast %11 : f32 to vector<8x128xf32>
    %26 = arith.mulf %24, %25 : vector<8x128xf32>
    %27 = arith.negf %26 : vector<8x128xf32>
    %28 = math.exp %27 : vector<8x128xf32>
    %cst_28 = arith.constant 1.000000e+00 : f32
    %29 = vector.broadcast %cst_28 : f32 to vector<8x128xf32>
    %30 = arith.addf %29, %28 : vector<8x128xf32>
    %31 = arith.divf %29, %30 : vector<8x128xf32>
    %32 = vector.extract_strided_slice %31 {offsets = [0, 0], sizes = [8, 16], strides = [1, 1]} : vector<8x128xf32> to vector<8x16xf32>
    %33 = vector.extract_strided_slice %31 {offsets = [0, 16], sizes = [8, 16], strides = [1, 1]} : vector<8x128xf32> to vector<8x16xf32>
    %34 = arith.addf %32, %33 : vector<8x16xf32>
    %cst_29 = arith.constant 2.000000e+00 : f32
    %35 = vector.broadcast %cst_29 : f32 to vector<8x16xf32>
    %36 = arith.mulf %35, %32 : vector<8x16xf32>
    %37 = arith.mulf %36, %33 : vector<8x16xf32>
    %38 = arith.subf %34, %37 : vector<8x16xf32>
    %cst_30 = arith.constant 5.000000e-01 : f32
    %39 = vector.broadcast %cst_30 : f32 to vector<8x16xf32>
    %40 = arith.mulf %39, %38 : vector<8x16xf32>
    %cst_31 = arith.constant dense<0.000000e+00> : vector<8x128xf32>
    %41 = tpu.matmul %40, %5, %cst_31 {dimension_numbers = #tpu.dot_dimension_numbers<[1], [0], [0], [1], [0, 0, 1, 1], [], []>} : vector<8x16xf32>, vector<16x128xf32>, vector<8x128xf32> -> vector<8x128xf32>
    %42 = arith.addf %26, %41 : vector<8x128xf32>
    %43 = vector.broadcast %6 : vector<1x128xf32> to vector<8x128xf32>
    %44 = arith.addf %42, %43 : vector<8x128xf32>
    %45 = tpu.concatenate %44, %16 in 1 : vector<8x128xf32>, vector<8x128xf32> -> vector<8x256xf32>
    %cst_32 = arith.constant dense<0.000000e+00> : vector<8x128xf32>
    %46 = tpu.matmul %45, %7, %cst_32 {dimension_numbers = #tpu.dot_dimension_numbers<[1], [0], [0], [1], [0, 0, 1, 1], [], []>} : vector<8x256xf32>, vector<256x128xf32>, vector<8x128xf32> -> vector<8x128xf32>
    %47 = vector.broadcast %8 : vector<1x128xf32> to vector<8x128xf32>
    %48 = arith.addf %46, %47 : vector<8x128xf32>
    %49 = math.tanh %48 : vector<8x128xf32>
    %50 = vector.broadcast %12 : f32 to vector<8x128xf32>
    %51 = arith.mulf %49, %50 : vector<8x128xf32>
    %52 = arith.negf %51 : vector<8x128xf32>
    %53 = math.exp %52 : vector<8x128xf32>
    %cst_33 = arith.constant 1.000000e+00 : f32
    %54 = vector.broadcast %cst_33 : f32 to vector<8x128xf32>
    %55 = arith.addf %54, %53 : vector<8x128xf32>
    %56 = arith.divf %54, %55 : vector<8x128xf32>
    %57 = vector.extract_strided_slice %56 {offsets = [0, 0], sizes = [8, 16], strides = [1, 1]} : vector<8x128xf32> to vector<8x16xf32>
    %58 = vector.extract_strided_slice %56 {offsets = [0, 16], sizes = [8, 16], strides = [1, 1]} : vector<8x128xf32> to vector<8x16xf32>
    %59 = arith.addf %57, %58 : vector<8x16xf32>
    %cst_34 = arith.constant 2.000000e+00 : f32
    %60 = vector.broadcast %cst_34 : f32 to vector<8x16xf32>
    %61 = arith.mulf %60, %57 : vector<8x16xf32>
    %62 = arith.mulf %61, %58 : vector<8x16xf32>
    %63 = arith.subf %59, %62 : vector<8x16xf32>
    %cst_35 = arith.constant 5.000000e-01 : f32
    %64 = vector.broadcast %cst_35 : f32 to vector<8x16xf32>
    %65 = arith.mulf %64, %63 : vector<8x16xf32>
    %cst_36 = arith.constant dense<0.000000e+00> : vector<8x128xf32>
    %66 = tpu.matmul %65, %9, %cst_36 {dimension_numbers = #tpu.dot_dimension_numbers<[1], [0], [0], [1], [0, 0, 1, 1], [], []>} : vector<8x16xf32>, vector<16x128xf32>, vector<8x128xf32> -> vector<8x128xf32>
    %67 = arith.addf %51, %66 : vector<8x128xf32>
    %68 = vector.broadcast %10 : vector<1x128xf32> to vector<8x128xf32>
    %69 = arith.addf %67, %68 : vector<8x128xf32>
    %70 = vector.shape_cast %69 : vector<8x128xf32> to vector<8x1x128xf32>
    %c0_37 = arith.constant 0 : index
    %c0_38 = arith.constant 0 : index
    %c0_39 = arith.constant 0 : index
    %71 = vector.load %arg12[%c0_37, %c0_38, %c0_39] : memref<8x8x128xf32, #tpu.memory_space<vmem>>, vector<8x1x128xf32>
    tpu.vector_store %arg12[%c0_37, %c0_38, %c0_39], %70 {strides = array<i32>} : memref<8x8x128xf32, #tpu.memory_space<vmem>>, vector<8x1x128xf32>,
    %72 = vector.extract_strided_slice %17 {offsets = [0, 1, 0], sizes = [8, 1, 128], strides = [1, 1, 1]} : vector<8x8x128xf32> to vector<8x1x128xf32>
    %73 = vector.shape_cast %72 : vector<8x1x128xf32> to vector<8x128xf32>
    %74 = tpu.concatenate %73, %44 in 1 : vector<8x128xf32>, vector<8x128xf32> -> vector<8x256xf32>
    %cst_40 = arith.constant dense<0.000000e+00> : vector<8x128xf32>
    %75 = tpu.matmul %74, %3, %cst_40 {dimension_numbers = #tpu.dot_dimension_numbers<[1], [0], [0], [1], [0, 0, 1, 1], [], []>} : vector<8x256xf32>, vector<256x128xf32>, vector<8x128xf32> -> vector<8x128xf32>
    %76 = vector.broadcast %4 : vector<1x128xf32> to vector<8x128xf32>
    %77 = arith.addf %75, %76 : vector<8x128xf32>
    %78 = math.tanh %77 : vector<8x128xf32>
    %79 = vector.broadcast %11 : f32 to vector<8x128xf32>
    %80 = arith.mulf %78, %79 : vector<8x128xf32>
    %81 = arith.negf %80 : vector<8x128xf32>
    %82 = math.exp %81 : vector<8x128xf32>
    %cst_41 = arith.constant 1.000000e+00 : f32
    %83 = vector.broadcast %cst_41 : f32 to vector<8x128xf32>
    %84 = arith.addf %83, %82 : vector<8x128xf32>
    %85 = arith.divf %83, %84 : vector<8x128xf32>
    %86 = vector.extract_strided_slice %85 {offsets = [0, 0], sizes = [8, 16], strides = [1, 1]} : vector<8x128xf32> to vector<8x16xf32>
    %87 = vector.extract_strided_slice %85 {offsets = [0, 16], sizes = [8, 16], strides = [1, 1]} : vector<8x128xf32> to vector<8x16xf32>
    %88 = arith.addf %86, %87 : vector<8x16xf32>
    %cst_42 = arith.constant 2.000000e+00 : f32
    %89 = vector.broadcast %cst_42 : f32 to vector<8x16xf32>
    %90 = arith.mulf %89, %86 : vector<8x16xf32>
    %91 = arith.mulf %90, %87 : vector<8x16xf32>
    %92 = arith.subf %88, %91 : vector<8x16xf32>
    %cst_43 = arith.constant 5.000000e-01 : f32
    %93 = vector.broadcast %cst_43 : f32 to vector<8x16xf32>
    %94 = arith.mulf %93, %92 : vector<8x16xf32>
    %cst_44 = arith.constant dense<0.000000e+00> : vector<8x128xf32>
    %95 = tpu.matmul %94, %5, %cst_44 {dimension_numbers = #tpu.dot_dimension_numbers<[1], [0], [0], [1], [0, 0, 1, 1], [], []>} : vector<8x16xf32>, vector<16x128xf32>, vector<8x128xf32> -> vector<8x128xf32>
    %96 = arith.addf %80, %95 : vector<8x128xf32>
    %97 = vector.broadcast %6 : vector<1x128xf32> to vector<8x128xf32>
    %98 = arith.addf %96, %97 : vector<8x128xf32>
    %99 = tpu.concatenate %98, %69 in 1 : vector<8x128xf32>, vector<8x128xf32> -> vector<8x256xf32>
    %cst_45 = arith.constant dense<0.000000e+00> : vector<8x128xf32>
    %100 = tpu.matmul %99, %7, %cst_45 {dimension_numbers = #tpu.dot_dimension_numbers<[1], [0], [0], [1], [0, 0, 1, 1], [], []>} : vector<8x256xf32>, vector<256x128xf32>, vector<8x128xf32> -> vector<8x128xf32>
    %101 = vector.broadcast %8 : vector<1x128xf32> to vector<8x128xf32>
    %102 = arith.addf %100, %101 : vector<8x128xf32>
    %103 = math.tanh %102 : vector<8x128xf32>
    %104 = vector.broadcast %12 : f32 to vector<8x128xf32>
    %105 = arith.mulf %103, %104 : vector<8x128xf32>
    %106 = arith.negf %105 : vector<8x128xf32>
    %107 = math.exp %106 : vector<8x128xf32>
    %cst_46 = arith.constant 1.000000e+00 : f32
    %108 = vector.broadcast %cst_46 : f32 to vector<8x128xf32>
    %109 = arith.addf %108, %107 : vector<8x128xf32>
    %110 = arith.divf %108, %109 : vector<8x128xf32>
    %111 = vector.extract_strided_slice %110 {offsets = [0, 0], sizes = [8, 16], strides = [1, 1]} : vector<8x128xf32> to vector<8x16xf32>
    %112 = vector.extract_strided_slice %110 {offsets = [0, 16], sizes = [8, 16], strides = [1, 1]} : vector<8x128xf32> to vector<8x16xf32>
    %113 = arith.addf %111, %112 : vector<8x16xf32>
    %cst_47 = arith.constant 2.000000e+00 : f32
    %114 = vector.broadcast %cst_47 : f32 to vector<8x16xf32>
    %115 = arith.mulf %114, %111 : vector<8x16xf32>
    %116 = arith.mulf %115, %112 : vector<8x16xf32>
    %117 = arith.subf %113, %116 : vector<8x16xf32>
    %cst_48 = arith.constant 5.000000e-01 : f32
    %118 = vector.broadcast %cst_48 : f32 to vector<8x16xf32>
    %119 = arith.mulf %118, %117 : vector<8x16xf32>
    %cst_49 = arith.constant dense<0.000000e+00> : vector<8x128xf32>
    %120 = tpu.matmul %119, %9, %cst_49 {dimension_numbers = #tpu.dot_dimension_numbers<[1], [0], [0], [1], [0, 0, 1, 1], [], []>} : vector<8x16xf32>, vector<16x128xf32>, vector<8x128xf32> -> vector<8x128xf32>
    %121 = arith.addf %105, %120 : vector<8x128xf32>
    %122 = vector.broadcast %10 : vector<1x128xf32> to vector<8x128xf32>
    %123 = arith.addf %121, %122 : vector<8x128xf32>
    %124 = vector.shape_cast %123 : vector<8x128xf32> to vector<8x1x128xf32>
    %c0_50 = arith.constant 0 : index
    %c1_51 = arith.constant 1 : index
    %c0_52 = arith.constant 0 : index
    %125 = vector.load %arg12[%c0_50, %c1_51, %c0_52] : memref<8x8x128xf32, #tpu.memory_space<vmem>>, vector<8x1x128xf32>
    tpu.vector_store %arg12[%c0_50, %c1_51, %c0_52], %124 {strides = array<i32>} : memref<8x8x128xf32, #tpu.memory_space<vmem>>, vector<8x1x128xf32>,
    %126 = vector.extract_strided_slice %17 {offsets = [0, 2, 0], sizes = [8, 1, 128], strides = [1, 1, 1]} : vector<8x8x128xf32> to vector<8x1x128xf32>
    %127 = vector.shape_cast %126 : vector<8x1x128xf32> to vector<8x128xf32>
    %128 = tpu.concatenate %127, %98 in 1 : vector<8x128xf32>, vector<8x128xf32> -> vector<8x256xf32>
    %cst_53 = arith.constant dense<0.000000e+00> : vector<8x128xf32>
    %129 = tpu.matmul %128, %3, %cst_53 {dimension_numbers = #tpu.dot_dimension_numbers<[1], [0], [0], [1], [0, 0, 1, 1], [], []>} : vector<8x256xf32>, vector<256x128xf32>, vector<8x128xf32> -> vector<8x128xf32>
    %130 = vector.broadcast %4 : vector<1x128xf32> to vector<8x128xf32>
    %131 = arith.addf %129, %130 : vector<8x128xf32>
    %132 = math.tanh %131 : vector<8x128xf32>
    %133 = vector.broadcast %11 : f32 to vector<8x128xf32>
    %134 = arith.mulf %132, %133 : vector<8x128xf32>
    %135 = arith.negf %134 : vector<8x128xf32>
    %136 = math.exp %135 : vector<8x128xf32>
    %cst_54 = arith.constant 1.000000e+00 : f32
    %137 = vector.broadcast %cst_54 : f32 to vector<8x128xf32>
    %138 = arith.addf %137, %136 : vector<8x128xf32>
    %139 = arith.divf %137, %138 : vector<8x128xf32>
    %140 = vector.extract_strided_slice %139 {offsets = [0, 0], sizes = [8, 16], strides = [1, 1]} : vector<8x128xf32> to vector<8x16xf32>
    %141 = vector.extract_strided_slice %139 {offsets = [0, 16], sizes = [8, 16], strides = [1, 1]} : vector<8x128xf32> to vector<8x16xf32>
    %142 = arith.addf %140, %141 : vector<8x16xf32>
    %cst_55 = arith.constant 2.000000e+00 : f32
    %143 = vector.broadcast %cst_55 : f32 to vector<8x16xf32>
    %144 = arith.mulf %143, %140 : vector<8x16xf32>
    %145 = arith.mulf %144, %141 : vector<8x16xf32>
    %146 = arith.subf %142, %145 : vector<8x16xf32>
    %cst_56 = arith.constant 5.000000e-01 : f32
    %147 = vector.broadcast %cst_56 : f32 to vector<8x16xf32>
    %148 = arith.mulf %147, %146 : vector<8x16xf32>
    %cst_57 = arith.constant dense<0.000000e+00> : vector<8x128xf32>
    %149 = tpu.matmul %148, %5, %cst_57 {dimension_numbers = #tpu.dot_dimension_numbers<[1], [0], [0], [1], [0, 0, 1, 1], [], []>} : vector<8x16xf32>, vector<16x128xf32>, vector<8x128xf32> -> vector<8x128xf32>
    %150 = arith.addf %134, %149 : vector<8x128xf32>
    %151 = vector.broadcast %6 : vector<1x128xf32> to vector<8x128xf32>
    %152 = arith.addf %150, %151 : vector<8x128xf32>
    %153 = tpu.concatenate %152, %123 in 1 : vector<8x128xf32>, vector<8x128xf32> -> vector<8x256xf32>
    %cst_58 = arith.constant dense<0.000000e+00> : vector<8x128xf32>
    %154 = tpu.matmul %153, %7, %cst_58 {dimension_numbers = #tpu.dot_dimension_numbers<[1], [0], [0], [1], [0, 0, 1, 1], [], []>} : vector<8x256xf32>, vector<256x128xf32>, vector<8x128xf32> -> vector<8x128xf32>
    %155 = vector.broadcast %8 : vector<1x128xf32> to vector<8x128xf32>
    %156 = arith.addf %154, %155 : vector<8x128xf32>
    %157 = math.tanh %156 : vector<8x128xf32>
    %158 = vector.broadcast %12 : f32 to vector<8x128xf32>
    %159 = arith.mulf %157, %158 : vector<8x128xf32>
    %160 = arith.negf %159 : vector<8x128xf32>
    %161 = math.exp %160 : vector<8x128xf32>
    %cst_59 = arith.constant 1.000000e+00 : f32
    %162 = vector.broadcast %cst_59 : f32 to vector<8x128xf32>
    %163 = arith.addf %162, %161 : vector<8x128xf32>
    %164 = arith.divf %162, %163 : vector<8x128xf32>
    %165 = vector.extract_strided_slice %164 {offsets = [0, 0], sizes = [8, 16], strides = [1, 1]} : vector<8x128xf32> to vector<8x16xf32>
    %166 = vector.extract_strided_slice %164 {offsets = [0, 16], sizes = [8, 16], strides = [1, 1]} : vector<8x128xf32> to vector<8x16xf32>
    %167 = arith.addf %165, %166 : vector<8x16xf32>
    %cst_60 = arith.constant 2.000000e+00 : f32
    %168 = vector.broadcast %cst_60 : f32 to vector<8x16xf32>
    %169 = arith.mulf %168, %165 : vector<8x16xf32>
    %170 = arith.mulf %169, %166 : vector<8x16xf32>
    %171 = arith.subf %167, %170 : vector<8x16xf32>
    %cst_61 = arith.constant 5.000000e-01 : f32
    %172 = vector.broadcast %cst_61 : f32 to vector<8x16xf32>
    %173 = arith.mulf %172, %171 : vector<8x16xf32>
    %cst_62 = arith.constant dense<0.000000e+00> : vector<8x128xf32>
    %174 = tpu.matmul %173, %9, %cst_62 {dimension_numbers = #tpu.dot_dimension_numbers<[1], [0], [0], [1], [0, 0, 1, 1], [], []>} : vector<8x16xf32>, vector<16x128xf32>, vector<8x128xf32> -> vector<8x128xf32>
    %175 = arith.addf %159, %174 : vector<8x128xf32>
    %176 = vector.broadcast %10 : vector<1x128xf32> to vector<8x128xf32>
    %177 = arith.addf %175, %176 : vector<8x128xf32>
    %178 = vector.shape_cast %177 : vector<8x128xf32> to vector<8x1x128xf32>
    %c0_63 = arith.constant 0 : index
    %c2 = arith.constant 2 : index
    %c0_64 = arith.constant 0 : index
    %179 = vector.load %arg12[%c0_63, %c2, %c0_64] : memref<8x8x128xf32, #tpu.memory_space<vmem>>, vector<8x1x128xf32>
    tpu.vector_store %arg12[%c0_63, %c2, %c0_64], %178 {strides = array<i32>} : memref<8x8x128xf32, #tpu.memory_space<vmem>>, vector<8x1x128xf32>,
    %180 = vector.extract_strided_slice %17 {offsets = [0, 3, 0], sizes = [8, 1, 128], strides = [1, 1, 1]} : vector<8x8x128xf32> to vector<8x1x128xf32>
    %181 = vector.shape_cast %180 : vector<8x1x128xf32> to vector<8x128xf32>
    %182 = tpu.concatenate %181, %152 in 1 : vector<8x128xf32>, vector<8x128xf32> -> vector<8x256xf32>
    %cst_65 = arith.constant dense<0.000000e+00> : vector<8x128xf32>
    %183 = tpu.matmul %182, %3, %cst_65 {dimension_numbers = #tpu.dot_dimension_numbers<[1], [0], [0], [1], [0, 0, 1, 1], [], []>} : vector<8x256xf32>, vector<256x128xf32>, vector<8x128xf32> -> vector<8x128xf32>
    %184 = vector.broadcast %4 : vector<1x128xf32> to vector<8x128xf32>
    %185 = arith.addf %183, %184 : vector<8x128xf32>
    %186 = math.tanh %185 : vector<8x128xf32>
    %187 = vector.broadcast %11 : f32 to vector<8x128xf32>
    %188 = arith.mulf %186, %187 : vector<8x128xf32>
    %189 = arith.negf %188 : vector<8x128xf32>
    %190 = math.exp %189 : vector<8x128xf32>
    %cst_66 = arith.constant 1.000000e+00 : f32
    %191 = vector.broadcast %cst_66 : f32 to vector<8x128xf32>
    %192 = arith.addf %191, %190 : vector<8x128xf32>
    %193 = arith.divf %191, %192 : vector<8x128xf32>
    %194 = vector.extract_strided_slice %193 {offsets = [0, 0], sizes = [8, 16], strides = [1, 1]} : vector<8x128xf32> to vector<8x16xf32>
    %195 = vector.extract_strided_slice %193 {offsets = [0, 16], sizes = [8, 16], strides = [1, 1]} : vector<8x128xf32> to vector<8x16xf32>
    %196 = arith.addf %194, %195 : vector<8x16xf32>
    %cst_67 = arith.constant 2.000000e+00 : f32
    %197 = vector.broadcast %cst_67 : f32 to vector<8x16xf32>
    %198 = arith.mulf %197, %194 : vector<8x16xf32>
    %199 = arith.mulf %198, %195 : vector<8x16xf32>
    %200 = arith.subf %196, %199 : vector<8x16xf32>
    %cst_68 = arith.constant 5.000000e-01 : f32
    %201 = vector.broadcast %cst_68 : f32 to vector<8x16xf32>
    %202 = arith.mulf %201, %200 : vector<8x16xf32>
    %cst_69 = arith.constant dense<0.000000e+00> : vector<8x128xf32>
    %203 = tpu.matmul %202, %5, %cst_69 {dimension_numbers = #tpu.dot_dimension_numbers<[1], [0], [0], [1], [0, 0, 1, 1], [], []>} : vector<8x16xf32>, vector<16x128xf32>, vector<8x128xf32> -> vector<8x128xf32>
    %204 = arith.addf %188, %203 : vector<8x128xf32>
    %205 = vector.broadcast %6 : vector<1x128xf32> to vector<8x128xf32>
    %206 = arith.addf %204, %205 : vector<8x128xf32>
    %207 = tpu.concatenate %206, %177 in 1 : vector<8x128xf32>, vector<8x128xf32> -> vector<8x256xf32>
    %cst_70 = arith.constant dense<0.000000e+00> : vector<8x128xf32>
    %208 = tpu.matmul %207, %7, %cst_70 {dimension_numbers = #tpu.dot_dimension_numbers<[1], [0], [0], [1], [0, 0, 1, 1], [], []>} : vector<8x256xf32>, vector<256x128xf32>, vector<8x128xf32> -> vector<8x128xf32>
    %209 = vector.broadcast %8 : vector<1x128xf32> to vector<8x128xf32>
    %210 = arith.addf %208, %209 : vector<8x128xf32>
    %211 = math.tanh %210 : vector<8x128xf32>
    %212 = vector.broadcast %12 : f32 to vector<8x128xf32>
    %213 = arith.mulf %211, %212 : vector<8x128xf32>
    %214 = arith.negf %213 : vector<8x128xf32>
    %215 = math.exp %214 : vector<8x128xf32>
    %cst_71 = arith.constant 1.000000e+00 : f32
    %216 = vector.broadcast %cst_71 : f32 to vector<8x128xf32>
    %217 = arith.addf %216, %215 : vector<8x128xf32>
    %218 = arith.divf %216, %217 : vector<8x128xf32>
    %219 = vector.extract_strided_slice %218 {offsets = [0, 0], sizes = [8, 16], strides = [1, 1]} : vector<8x128xf32> to vector<8x16xf32>
    %220 = vector.extract_strided_slice %218 {offsets = [0, 16], sizes = [8, 16], strides = [1, 1]} : vector<8x128xf32> to vector<8x16xf32>
    %221 = arith.addf %219, %220 : vector<8x16xf32>
    %cst_72 = arith.constant 2.000000e+00 : f32
    %222 = vector.broadcast %cst_72 : f32 to vector<8x16xf32>
    %223 = arith.mulf %222, %219 : vector<8x16xf32>
    %224 = arith.mulf %223, %220 : vector<8x16xf32>
    %225 = arith.subf %221, %224 : vector<8x16xf32>
    %cst_73 = arith.constant 5.000000e-01 : f32
    %226 = vector.broadcast %cst_73 : f32 to vector<8x16xf32>
    %227 = arith.mulf %226, %225 : vector<8x16xf32>
    %cst_74 = arith.constant dense<0.000000e+00> : vector<8x128xf32>
    %228 = tpu.matmul %227, %9, %cst_74 {dimension_numbers = #tpu.dot_dimension_numbers<[1], [0], [0], [1], [0, 0, 1, 1], [], []>} : vector<8x16xf32>, vector<16x128xf32>, vector<8x128xf32> -> vector<8x128xf32>
    %229 = arith.addf %213, %228 : vector<8x128xf32>
    %230 = vector.broadcast %10 : vector<1x128xf32> to vector<8x128xf32>
    %231 = arith.addf %229, %230 : vector<8x128xf32>
    %232 = vector.shape_cast %231 : vector<8x128xf32> to vector<8x1x128xf32>
    %c0_75 = arith.constant 0 : index
    %c3 = arith.constant 3 : index
    %c0_76 = arith.constant 0 : index
    %233 = vector.load %arg12[%c0_75, %c3, %c0_76] : memref<8x8x128xf32, #tpu.memory_space<vmem>>, vector<8x1x128xf32>
    tpu.vector_store %arg12[%c0_75, %c3, %c0_76], %232 {strides = array<i32>} : memref<8x8x128xf32, #tpu.memory_space<vmem>>, vector<8x1x128xf32>,
    %234 = vector.extract_strided_slice %17 {offsets = [0, 4, 0], sizes = [8, 1, 128], strides = [1, 1, 1]} : vector<8x8x128xf32> to vector<8x1x128xf32>
    %235 = vector.shape_cast %234 : vector<8x1x128xf32> to vector<8x128xf32>
    %236 = tpu.concatenate %235, %206 in 1 : vector<8x128xf32>, vector<8x128xf32> -> vector<8x256xf32>
    %cst_77 = arith.constant dense<0.000000e+00> : vector<8x128xf32>
    %237 = tpu.matmul %236, %3, %cst_77 {dimension_numbers = #tpu.dot_dimension_numbers<[1], [0], [0], [1], [0, 0, 1, 1], [], []>} : vector<8x256xf32>, vector<256x128xf32>, vector<8x128xf32> -> vector<8x128xf32>
    %238 = vector.broadcast %4 : vector<1x128xf32> to vector<8x128xf32>
    %239 = arith.addf %237, %238 : vector<8x128xf32>
    %240 = math.tanh %239 : vector<8x128xf32>
    %241 = vector.broadcast %11 : f32 to vector<8x128xf32>
    %242 = arith.mulf %240, %241 : vector<8x128xf32>
    %243 = arith.negf %242 : vector<8x128xf32>
    %244 = math.exp %243 : vector<8x128xf32>
    %cst_78 = arith.constant 1.000000e+00 : f32
    %245 = vector.broadcast %cst_78 : f32 to vector<8x128xf32>
    %246 = arith.addf %245, %244 : vector<8x128xf32>
    %247 = arith.divf %245, %246 : vector<8x128xf32>
    %248 = vector.extract_strided_slice %247 {offsets = [0, 0], sizes = [8, 16], strides = [1, 1]} : vector<8x128xf32> to vector<8x16xf32>
    %249 = vector.extract_strided_slice %247 {offsets = [0, 16], sizes = [8, 16], strides = [1, 1]} : vector<8x128xf32> to vector<8x16xf32>
    %250 = arith.addf %248, %249 : vector<8x16xf32>
    %cst_79 = arith.constant 2.000000e+00 : f32
    %251 = vector.broadcast %cst_79 : f32 to vector<8x16xf32>
    %252 = arith.mulf %251, %248 : vector<8x16xf32>
    %253 = arith.mulf %252, %249 : vector<8x16xf32>
    %254 = arith.subf %250, %253 : vector<8x16xf32>
    %cst_80 = arith.constant 5.000000e-01 : f32
    %255 = vector.broadcast %cst_80 : f32 to vector<8x16xf32>
    %256 = arith.mulf %255, %254 : vector<8x16xf32>
    %cst_81 = arith.constant dense<0.000000e+00> : vector<8x128xf32>
    %257 = tpu.matmul %256, %5, %cst_81 {dimension_numbers = #tpu.dot_dimension_numbers<[1], [0], [0], [1], [0, 0, 1, 1], [], []>} : vector<8x16xf32>, vector<16x128xf32>, vector<8x128xf32> -> vector<8x128xf32>
    %258 = arith.addf %242, %257 : vector<8x128xf32>
    %259 = vector.broadcast %6 : vector<1x128xf32> to vector<8x128xf32>
    %260 = arith.addf %258, %259 : vector<8x128xf32>
    %261 = tpu.concatenate %260, %231 in 1 : vector<8x128xf32>, vector<8x128xf32> -> vector<8x256xf32>
    %cst_82 = arith.constant dense<0.000000e+00> : vector<8x128xf32>
    %262 = tpu.matmul %261, %7, %cst_82 {dimension_numbers = #tpu.dot_dimension_numbers<[1], [0], [0], [1], [0, 0, 1, 1], [], []>} : vector<8x256xf32>, vector<256x128xf32>, vector<8x128xf32> -> vector<8x128xf32>
    %263 = vector.broadcast %8 : vector<1x128xf32> to vector<8x128xf32>
    %264 = arith.addf %262, %263 : vector<8x128xf32>
    %265 = math.tanh %264 : vector<8x128xf32>
    %266 = vector.broadcast %12 : f32 to vector<8x128xf32>
    %267 = arith.mulf %265, %266 : vector<8x128xf32>
    %268 = arith.negf %267 : vector<8x128xf32>
    %269 = math.exp %268 : vector<8x128xf32>
    %cst_83 = arith.constant 1.000000e+00 : f32
    %270 = vector.broadcast %cst_83 : f32 to vector<8x128xf32>
    %271 = arith.addf %270, %269 : vector<8x128xf32>
    %272 = arith.divf %270, %271 : vector<8x128xf32>
    %273 = vector.extract_strided_slice %272 {offsets = [0, 0], sizes = [8, 16], strides = [1, 1]} : vector<8x128xf32> to vector<8x16xf32>
    %274 = vector.extract_strided_slice %272 {offsets = [0, 16], sizes = [8, 16], strides = [1, 1]} : vector<8x128xf32> to vector<8x16xf32>
    %275 = arith.addf %273, %274 : vector<8x16xf32>
    %cst_84 = arith.constant 2.000000e+00 : f32
    %276 = vector.broadcast %cst_84 : f32 to vector<8x16xf32>
    %277 = arith.mulf %276, %273 : vector<8x16xf32>
    %278 = arith.mulf %277, %274 : vector<8x16xf32>
    %279 = arith.subf %275, %278 : vector<8x16xf32>
    %cst_85 = arith.constant 5.000000e-01 : f32
    %280 = vector.broadcast %cst_85 : f32 to vector<8x16xf32>
    %281 = arith.mulf %280, %279 : vector<8x16xf32>
    %cst_86 = arith.constant dense<0.000000e+00> : vector<8x128xf32>
    %282 = tpu.matmul %281, %9, %cst_86 {dimension_numbers = #tpu.dot_dimension_numbers<[1], [0], [0], [1], [0, 0, 1, 1], [], []>} : vector<8x16xf32>, vector<16x128xf32>, vector<8x128xf32> -> vector<8x128xf32>
    %283 = arith.addf %267, %282 : vector<8x128xf32>
    %284 = vector.broadcast %10 : vector<1x128xf32> to vector<8x128xf32>
    %285 = arith.addf %283, %284 : vector<8x128xf32>
    %286 = vector.shape_cast %285 : vector<8x128xf32> to vector<8x1x128xf32>
    %c0_87 = arith.constant 0 : index
    %c4 = arith.constant 4 : index
    %c0_88 = arith.constant 0 : index
    %287 = vector.load %arg12[%c0_87, %c4, %c0_88] : memref<8x8x128xf32, #tpu.memory_space<vmem>>, vector<8x1x128xf32>
    tpu.vector_store %arg12[%c0_87, %c4, %c0_88], %286 {strides = array<i32>} : memref<8x8x128xf32, #tpu.memory_space<vmem>>, vector<8x1x128xf32>,
    %288 = vector.extract_strided_slice %17 {offsets = [0, 5, 0], sizes = [8, 1, 128], strides = [1, 1, 1]} : vector<8x8x128xf32> to vector<8x1x128xf32>
    %289 = vector.shape_cast %288 : vector<8x1x128xf32> to vector<8x128xf32>
    %290 = tpu.concatenate %289, %260 in 1 : vector<8x128xf32>, vector<8x128xf32> -> vector<8x256xf32>
    %cst_89 = arith.constant dense<0.000000e+00> : vector<8x128xf32>
    %291 = tpu.matmul %290, %3, %cst_89 {dimension_numbers = #tpu.dot_dimension_numbers<[1], [0], [0], [1], [0, 0, 1, 1], [], []>} : vector<8x256xf32>, vector<256x128xf32>, vector<8x128xf32> -> vector<8x128xf32>
    %292 = vector.broadcast %4 : vector<1x128xf32> to vector<8x128xf32>
    %293 = arith.addf %291, %292 : vector<8x128xf32>
    %294 = math.tanh %293 : vector<8x128xf32>
    %295 = vector.broadcast %11 : f32 to vector<8x128xf32>
    %296 = arith.mulf %294, %295 : vector<8x128xf32>
    %297 = arith.negf %296 : vector<8x128xf32>
    %298 = math.exp %297 : vector<8x128xf32>
    %cst_90 = arith.constant 1.000000e+00 : f32
    %299 = vector.broadcast %cst_90 : f32 to vector<8x128xf32>
    %300 = arith.addf %299, %298 : vector<8x128xf32>
    %301 = arith.divf %299, %300 : vector<8x128xf32>
    %302 = vector.extract_strided_slice %301 {offsets = [0, 0], sizes = [8, 16], strides = [1, 1]} : vector<8x128xf32> to vector<8x16xf32>
    %303 = vector.extract_strided_slice %301 {offsets = [0, 16], sizes = [8, 16], strides = [1, 1]} : vector<8x128xf32> to vector<8x16xf32>
    %304 = arith.addf %302, %303 : vector<8x16xf32>
    %cst_91 = arith.constant 2.000000e+00 : f32
    %305 = vector.broadcast %cst_91 : f32 to vector<8x16xf32>
    %306 = arith.mulf %305, %302 : vector<8x16xf32>
    %307 = arith.mulf %306, %303 : vector<8x16xf32>
    %308 = arith.subf %304, %307 : vector<8x16xf32>
    %cst_92 = arith.constant 5.000000e-01 : f32
    %309 = vector.broadcast %cst_92 : f32 to vector<8x16xf32>
    %310 = arith.mulf %309, %308 : vector<8x16xf32>
    %cst_93 = arith.constant dense<0.000000e+00> : vector<8x128xf32>
    %311 = tpu.matmul %310, %5, %cst_93 {dimension_numbers = #tpu.dot_dimension_numbers<[1], [0], [0], [1], [0, 0, 1, 1], [], []>} : vector<8x16xf32>, vector<16x128xf32>, vector<8x128xf32> -> vector<8x128xf32>
    %312 = arith.addf %296, %311 : vector<8x128xf32>
    %313 = vector.broadcast %6 : vector<1x128xf32> to vector<8x128xf32>
    %314 = arith.addf %312, %313 : vector<8x128xf32>
    %315 = tpu.concatenate %314, %285 in 1 : vector<8x128xf32>, vector<8x128xf32> -> vector<8x256xf32>
    %cst_94 = arith.constant dense<0.000000e+00> : vector<8x128xf32>
    %316 = tpu.matmul %315, %7, %cst_94 {dimension_numbers = #tpu.dot_dimension_numbers<[1], [0], [0], [1], [0, 0, 1, 1], [], []>} : vector<8x256xf32>, vector<256x128xf32>, vector<8x128xf32> -> vector<8x128xf32>
    %317 = vector.broadcast %8 : vector<1x128xf32> to vector<8x128xf32>
    %318 = arith.addf %316, %317 : vector<8x128xf32>
    %319 = math.tanh %318 : vector<8x128xf32>
    %320 = vector.broadcast %12 : f32 to vector<8x128xf32>
    %321 = arith.mulf %319, %320 : vector<8x128xf32>
    %322 = arith.negf %321 : vector<8x128xf32>
    %323 = math.exp %322 : vector<8x128xf32>
    %cst_95 = arith.constant 1.000000e+00 : f32
    %324 = vector.broadcast %cst_95 : f32 to vector<8x128xf32>
    %325 = arith.addf %324, %323 : vector<8x128xf32>
    %326 = arith.divf %324, %325 : vector<8x128xf32>
    %327 = vector.extract_strided_slice %326 {offsets = [0, 0], sizes = [8, 16], strides = [1, 1]} : vector<8x128xf32> to vector<8x16xf32>
    %328 = vector.extract_strided_slice %326 {offsets = [0, 16], sizes = [8, 16], strides = [1, 1]} : vector<8x128xf32> to vector<8x16xf32>
    %329 = arith.addf %327, %328 : vector<8x16xf32>
    %cst_96 = arith.constant 2.000000e+00 : f32
    %330 = vector.broadcast %cst_96 : f32 to vector<8x16xf32>
    %331 = arith.mulf %330, %327 : vector<8x16xf32>
    %332 = arith.mulf %331, %328 : vector<8x16xf32>
    %333 = arith.subf %329, %332 : vector<8x16xf32>
    %cst_97 = arith.constant 5.000000e-01 : f32
    %334 = vector.broadcast %cst_97 : f32 to vector<8x16xf32>
    %335 = arith.mulf %334, %333 : vector<8x16xf32>
    %cst_98 = arith.constant dense<0.000000e+00> : vector<8x128xf32>
    %336 = tpu.matmul %335, %9, %cst_98 {dimension_numbers = #tpu.dot_dimension_numbers<[1], [0], [0], [1], [0, 0, 1, 1], [], []>} : vector<8x16xf32>, vector<16x128xf32>, vector<8x128xf32> -> vector<8x128xf32>
    %337 = arith.addf %321, %336 : vector<8x128xf32>
    %338 = vector.broadcast %10 : vector<1x128xf32> to vector<8x128xf32>
    %339 = arith.addf %337, %338 : vector<8x128xf32>
    %340 = vector.shape_cast %339 : vector<8x128xf32> to vector<8x1x128xf32>
    %c0_99 = arith.constant 0 : index
    %c5 = arith.constant 5 : index
    %c0_100 = arith.constant 0 : index
    %341 = vector.load %arg12[%c0_99, %c5, %c0_100] : memref<8x8x128xf32, #tpu.memory_space<vmem>>, vector<8x1x128xf32>
    tpu.vector_store %arg12[%c0_99, %c5, %c0_100], %340 {strides = array<i32>} : memref<8x8x128xf32, #tpu.memory_space<vmem>>, vector<8x1x128xf32>,
    %342 = vector.extract_strided_slice %17 {offsets = [0, 6, 0], sizes = [8, 1, 128], strides = [1, 1, 1]} : vector<8x8x128xf32> to vector<8x1x128xf32>
    %343 = vector.shape_cast %342 : vector<8x1x128xf32> to vector<8x128xf32>
    %344 = tpu.concatenate %343, %314 in 1 : vector<8x128xf32>, vector<8x128xf32> -> vector<8x256xf32>
    %cst_101 = arith.constant dense<0.000000e+00> : vector<8x128xf32>
    %345 = tpu.matmul %344, %3, %cst_101 {dimension_numbers = #tpu.dot_dimension_numbers<[1], [0], [0], [1], [0, 0, 1, 1], [], []>} : vector<8x256xf32>, vector<256x128xf32>, vector<8x128xf32> -> vector<8x128xf32>
    %346 = vector.broadcast %4 : vector<1x128xf32> to vector<8x128xf32>
    %347 = arith.addf %345, %346 : vector<8x128xf32>
    %348 = math.tanh %347 : vector<8x128xf32>
    %349 = vector.broadcast %11 : f32 to vector<8x128xf32>
    %350 = arith.mulf %348, %349 : vector<8x128xf32>
    %351 = arith.negf %350 : vector<8x128xf32>
    %352 = math.exp %351 : vector<8x128xf32>
    %cst_102 = arith.constant 1.000000e+00 : f32
    %353 = vector.broadcast %cst_102 : f32 to vector<8x128xf32>
    %354 = arith.addf %353, %352 : vector<8x128xf32>
    %355 = arith.divf %353, %354 : vector<8x128xf32>
    %356 = vector.extract_strided_slice %355 {offsets = [0, 0], sizes = [8, 16], strides = [1, 1]} : vector<8x128xf32> to vector<8x16xf32>
    %357 = vector.extract_strided_slice %355 {offsets = [0, 16], sizes = [8, 16], strides = [1, 1]} : vector<8x128xf32> to vector<8x16xf32>
    %358 = arith.addf %356, %357 : vector<8x16xf32>
    %cst_103 = arith.constant 2.000000e+00 : f32
    %359 = vector.broadcast %cst_103 : f32 to vector<8x16xf32>
    %360 = arith.mulf %359, %356 : vector<8x16xf32>
    %361 = arith.mulf %360, %357 : vector<8x16xf32>
    %362 = arith.subf %358, %361 : vector<8x16xf32>
    %cst_104 = arith.constant 5.000000e-01 : f32
    %363 = vector.broadcast %cst_104 : f32 to vector<8x16xf32>
    %364 = arith.mulf %363, %362 : vector<8x16xf32>
    %cst_105 = arith.constant dense<0.000000e+00> : vector<8x128xf32>
    %365 = tpu.matmul %364, %5, %cst_105 {dimension_numbers = #tpu.dot_dimension_numbers<[1], [0], [0], [1], [0, 0, 1, 1], [], []>} : vector<8x16xf32>, vector<16x128xf32>, vector<8x128xf32> -> vector<8x128xf32>
    %366 = arith.addf %350, %365 : vector<8x128xf32>
    %367 = vector.broadcast %6 : vector<1x128xf32> to vector<8x128xf32>
    %368 = arith.addf %366, %367 : vector<8x128xf32>
    %369 = tpu.concatenate %368, %339 in 1 : vector<8x128xf32>, vector<8x128xf32> -> vector<8x256xf32>
    %cst_106 = arith.constant dense<0.000000e+00> : vector<8x128xf32>
    %370 = tpu.matmul %369, %7, %cst_106 {dimension_numbers = #tpu.dot_dimension_numbers<[1], [0], [0], [1], [0, 0, 1, 1], [], []>} : vector<8x256xf32>, vector<256x128xf32>, vector<8x128xf32> -> vector<8x128xf32>
    %371 = vector.broadcast %8 : vector<1x128xf32> to vector<8x128xf32>
    %372 = arith.addf %370, %371 : vector<8x128xf32>
    %373 = math.tanh %372 : vector<8x128xf32>
    %374 = vector.broadcast %12 : f32 to vector<8x128xf32>
    %375 = arith.mulf %373, %374 : vector<8x128xf32>
    %376 = arith.negf %375 : vector<8x128xf32>
    %377 = math.exp %376 : vector<8x128xf32>
    %cst_107 = arith.constant 1.000000e+00 : f32
    %378 = vector.broadcast %cst_107 : f32 to vector<8x128xf32>
    %379 = arith.addf %378, %377 : vector<8x128xf32>
    %380 = arith.divf %378, %379 : vector<8x128xf32>
    %381 = vector.extract_strided_slice %380 {offsets = [0, 0], sizes = [8, 16], strides = [1, 1]} : vector<8x128xf32> to vector<8x16xf32>
    %382 = vector.extract_strided_slice %380 {offsets = [0, 16], sizes = [8, 16], strides = [1, 1]} : vector<8x128xf32> to vector<8x16xf32>
    %383 = arith.addf %381, %382 : vector<8x16xf32>
    %cst_108 = arith.constant 2.000000e+00 : f32
    %384 = vector.broadcast %cst_108 : f32 to vector<8x16xf32>
    %385 = arith.mulf %384, %381 : vector<8x16xf32>
    %386 = arith.mulf %385, %382 : vector<8x16xf32>
    %387 = arith.subf %383, %386 : vector<8x16xf32>
    %cst_109 = arith.constant 5.000000e-01 : f32
    %388 = vector.broadcast %cst_109 : f32 to vector<8x16xf32>
    %389 = arith.mulf %388, %387 : vector<8x16xf32>
    %cst_110 = arith.constant dense<0.000000e+00> : vector<8x128xf32>
    %390 = tpu.matmul %389, %9, %cst_110 {dimension_numbers = #tpu.dot_dimension_numbers<[1], [0], [0], [1], [0, 0, 1, 1], [], []>} : vector<8x16xf32>, vector<16x128xf32>, vector<8x128xf32> -> vector<8x128xf32>
    %391 = arith.addf %375, %390 : vector<8x128xf32>
    %392 = vector.broadcast %10 : vector<1x128xf32> to vector<8x128xf32>
    %393 = arith.addf %391, %392 : vector<8x128xf32>
    %394 = vector.shape_cast %393 : vector<8x128xf32> to vector<8x1x128xf32>
    %c0_111 = arith.constant 0 : index
    %c6 = arith.constant 6 : index
    %c0_112 = arith.constant 0 : index
    %395 = vector.load %arg12[%c0_111, %c6, %c0_112] : memref<8x8x128xf32, #tpu.memory_space<vmem>>, vector<8x1x128xf32>
    tpu.vector_store %arg12[%c0_111, %c6, %c0_112], %394 {strides = array<i32>} : memref<8x8x128xf32, #tpu.memory_space<vmem>>, vector<8x1x128xf32>,
    %396 = vector.extract_strided_slice %17 {offsets = [0, 7, 0], sizes = [8, 1, 128], strides = [1, 1, 1]} : vector<8x8x128xf32> to vector<8x1x128xf32>
    %397 = vector.shape_cast %396 : vector<8x1x128xf32> to vector<8x128xf32>
    %398 = tpu.concatenate %397, %368 in 1 : vector<8x128xf32>, vector<8x128xf32> -> vector<8x256xf32>
    %cst_113 = arith.constant dense<0.000000e+00> : vector<8x128xf32>
    %399 = tpu.matmul %398, %3, %cst_113 {dimension_numbers = #tpu.dot_dimension_numbers<[1], [0], [0], [1], [0, 0, 1, 1], [], []>} : vector<8x256xf32>, vector<256x128xf32>, vector<8x128xf32> -> vector<8x128xf32>
    %400 = vector.broadcast %4 : vector<1x128xf32> to vector<8x128xf32>
    %401 = arith.addf %399, %400 : vector<8x128xf32>
    %402 = math.tanh %401 : vector<8x128xf32>
    %403 = vector.broadcast %11 : f32 to vector<8x128xf32>
    %404 = arith.mulf %402, %403 : vector<8x128xf32>
    %405 = arith.negf %404 : vector<8x128xf32>
    %406 = math.exp %405 : vector<8x128xf32>
    %cst_114 = arith.constant 1.000000e+00 : f32
    %407 = vector.broadcast %cst_114 : f32 to vector<8x128xf32>
    %408 = arith.addf %407, %406 : vector<8x128xf32>
    %409 = arith.divf %407, %408 : vector<8x128xf32>
    %410 = vector.extract_strided_slice %409 {offsets = [0, 0], sizes = [8, 16], strides = [1, 1]} : vector<8x128xf32> to vector<8x16xf32>
    %411 = vector.extract_strided_slice %409 {offsets = [0, 16], sizes = [8, 16], strides = [1, 1]} : vector<8x128xf32> to vector<8x16xf32>
    %412 = arith.addf %410, %411 : vector<8x16xf32>
    %cst_115 = arith.constant 2.000000e+00 : f32
    %413 = vector.broadcast %cst_115 : f32 to vector<8x16xf32>
    %414 = arith.mulf %413, %410 : vector<8x16xf32>
    %415 = arith.mulf %414, %411 : vector<8x16xf32>
    %416 = arith.subf %412, %415 : vector<8x16xf32>
    %cst_116 = arith.constant 5.000000e-01 : f32
    %417 = vector.broadcast %cst_116 : f32 to vector<8x16xf32>
    %418 = arith.mulf %417, %416 : vector<8x16xf32>
    %cst_117 = arith.constant dense<0.000000e+00> : vector<8x128xf32>
    %419 = tpu.matmul %418, %5, %cst_117 {dimension_numbers = #tpu.dot_dimension_numbers<[1], [0], [0], [1], [0, 0, 1, 1], [], []>} : vector<8x16xf32>, vector<16x128xf32>, vector<8x128xf32> -> vector<8x128xf32>
    %420 = arith.addf %404, %419 : vector<8x128xf32>
    %421 = vector.broadcast %6 : vector<1x128xf32> to vector<8x128xf32>
    %422 = arith.addf %420, %421 : vector<8x128xf32>
    %423 = tpu.concatenate %422, %393 in 1 : vector<8x128xf32>, vector<8x128xf32> -> vector<8x256xf32>
    %cst_118 = arith.constant dense<0.000000e+00> : vector<8x128xf32>
    %424 = tpu.matmul %423, %7, %cst_118 {dimension_numbers = #tpu.dot_dimension_numbers<[1], [0], [0], [1], [0, 0, 1, 1], [], []>} : vector<8x256xf32>, vector<256x128xf32>, vector<8x128xf32> -> vector<8x128xf32>
    %425 = vector.broadcast %8 : vector<1x128xf32> to vector<8x128xf32>
    %426 = arith.addf %424, %425 : vector<8x128xf32>
    %427 = math.tanh %426 : vector<8x128xf32>
    %428 = vector.broadcast %12 : f32 to vector<8x128xf32>
    %429 = arith.mulf %427, %428 : vector<8x128xf32>
    %430 = arith.negf %429 : vector<8x128xf32>
    %431 = math.exp %430 : vector<8x128xf32>
    %cst_119 = arith.constant 1.000000e+00 : f32
    %432 = vector.broadcast %cst_119 : f32 to vector<8x128xf32>
    %433 = arith.addf %432, %431 : vector<8x128xf32>
    %434 = arith.divf %432, %433 : vector<8x128xf32>
    %435 = vector.extract_strided_slice %434 {offsets = [0, 0], sizes = [8, 16], strides = [1, 1]} : vector<8x128xf32> to vector<8x16xf32>
    %436 = vector.extract_strided_slice %434 {offsets = [0, 16], sizes = [8, 16], strides = [1, 1]} : vector<8x128xf32> to vector<8x16xf32>
    %437 = arith.addf %435, %436 : vector<8x16xf32>
    %cst_120 = arith.constant 2.000000e+00 : f32
    %438 = vector.broadcast %cst_120 : f32 to vector<8x16xf32>
    %439 = arith.mulf %438, %435 : vector<8x16xf32>
    %440 = arith.mulf %439, %436 : vector<8x16xf32>
    %441 = arith.subf %437, %440 : vector<8x16xf32>
    %cst_121 = arith.constant 5.000000e-01 : f32
    %442 = vector.broadcast %cst_121 : f32 to vector<8x16xf32>
    %443 = arith.mulf %442, %441 : vector<8x16xf32>
    %cst_122 = arith.constant dense<0.000000e+00> : vector<8x128xf32>
    %444 = tpu.matmul %443, %9, %cst_122 {dimension_numbers = #tpu.dot_dimension_numbers<[1], [0], [0], [1], [0, 0, 1, 1], [], []>} : vector<8x16xf32>, vector<16x128xf32>, vector<8x128xf32> -> vector<8x128xf32>
    %445 = arith.addf %429, %444 : vector<8x128xf32>
    %446 = vector.broadcast %10 : vector<1x128xf32> to vector<8x128xf32>
    %447 = arith.addf %445, %446 : vector<8x128xf32>
    %448 = vector.shape_cast %447 : vector<8x128xf32> to vector<8x1x128xf32>
    %c0_123 = arith.constant 0 : index
    %c7 = arith.constant 7 : index
    %c0_124 = arith.constant 0 : index
    %449 = vector.load %arg12[%c0_123, %c7, %c0_124] : memref<8x8x128xf32, #tpu.memory_space<vmem>>, vector<8x1x128xf32>
    tpu.vector_store %arg12[%c0_123, %c7, %c0_124], %448 {strides = array<i32>} : memref<8x8x128xf32, #tpu.memory_space<vmem>>, vector<8x1x128xf32>,
    %c0_125 = arith.constant 0 : index
    %c0_126 = arith.constant 0 : index
    %c0_127 = arith.constant 0 : index
    %450 = vector.load %arg13[%c0_125, %c0_126, %c0_127] : memref<2x8x128xf32, #tpu.memory_space<vmem>>, vector<1x8x128xf32>
    %451 = vector.shape_cast %450 : vector<1x8x128xf32> to vector<8x128xf32>
    %452 = vector.shape_cast %422 : vector<8x128xf32> to vector<1x8x128xf32>
    tpu.vector_store %arg13[%c0_125, %c0_126, %c0_127], %452 {strides = array<i32>} : memref<2x8x128xf32, #tpu.memory_space<vmem>>, vector<1x8x128xf32>,
    %c1_128 = arith.constant 1 : index
    %c0_129 = arith.constant 0 : index
    %c0_130 = arith.constant 0 : index
    %453 = vector.load %arg13[%c1_128, %c0_129, %c0_130] : memref<2x8x128xf32, #tpu.memory_space<vmem>>, vector<1x8x128xf32>
    %454 = vector.shape_cast %453 : vector<1x8x128xf32> to vector<8x128xf32>
    %455 = vector.shape_cast %447 : vector<8x128xf32> to vector<1x8x128xf32>
    tpu.vector_store %arg13[%c1_128, %c0_129, %c0_130], %455 {strides = array<i32>} : memref<2x8x128xf32, #tpu.memory_space<vmem>>, vector<1x8x128xf32>,
    return
  }
  func.func @transform_0(%arg0: i32) -> (i32, i32, i32) {
    %c0_i32 = arith.constant 0 : i32
    %c0_i32_0 = arith.constant 0 : i32
    %c0_i32_1 = arith.constant 0 : i32
    return %c0_i32, %arg0, %c0_i32_0 : i32, i32, i32
  }
  func.func @transform_1(%arg0: i32) -> (i32, i32) {
    %c0_i32 = arith.constant 0 : i32
    %c0_i32_0 = arith.constant 0 : i32
    %c0_i32_1 = arith.constant 0 : i32
    return %c0_i32, %c0_i32_0 : i32, i32
  }
  func.func @transform_2(%arg0: i32) -> (i32, i32) {
    %c0_i32 = arith.constant 0 : i32
    %c0_i32_0 = arith.constant 0 : i32
    %c0_i32_1 = arith.constant 0 : i32
    return %c0_i32, %c0_i32_0 : i32, i32
  }
  func.func @transform_3(%arg0: i32) -> (i32, i32) {
    %c0_i32 = arith.constant 0 : i32
    %c0_i32_0 = arith.constant 0 : i32
    %c0_i32_1 = arith.constant 0 : i32
    return %c0_i32, %c0_i32_0 : i32, i32
  }
  func.func @transform_4(%arg0: i32) -> (i32, i32) {
    %c0_i32 = arith.constant 0 : i32
    %c0_i32_0 = arith.constant 0 : i32
    %c0_i32_1 = arith.constant 0 : i32
    return %c0_i32, %c0_i32_0 : i32, i32
  }
  func.func @transform_5(%arg0: i32) -> (i32, i32) {
    %c0_i32 = arith.constant 0 : i32
    %c0_i32_0 = arith.constant 0 : i32
    %c0_i32_1 = arith.constant 0 : i32
    return %c0_i32, %c0_i32_0 : i32, i32
  }
  func.func @transform_6(%arg0: i32) -> (i32, i32) {
    %c0_i32 = arith.constant 0 : i32
    %c0_i32_0 = arith.constant 0 : i32
    %c0_i32_1 = arith.constant 0 : i32
    return %c0_i32, %c0_i32_0 : i32, i32
  }
  func.func @transform_7(%arg0: i32) -> (i32, i32) {
    %c0_i32 = arith.constant 0 : i32
    %c0_i32_0 = arith.constant 0 : i32
    %c0_i32_1 = arith.constant 0 : i32
    return %c0_i32, %c0_i32_0 : i32, i32
  }
  func.func @transform_8(%arg0: i32) -> (i32, i32) {
    %c0_i32 = arith.constant 0 : i32
    %c0_i32_0 = arith.constant 0 : i32
    %c0_i32_1 = arith.constant 0 : i32
    return %c0_i32, %c0_i32_0 : i32, i32
  }
  func.func @transform_9(%arg0: i32) -> (i32, i32) {
    %c0_i32 = arith.constant 0 : i32
    %c0_i32_0 = arith.constant 0 : i32
    %c0_i32_1 = arith.constant 0 : i32
    return %c0_i32, %c0_i32_0 : i32, i32
  }
  func.func @transform_10(%arg0: i32) -> (i32, i32) {
    %c0_i32 = arith.constant 0 : i32
    %c0_i32_0 = arith.constant 0 : i32
    %c0_i32_1 = arith.constant 0 : i32
    return %c0_i32, %c0_i32_0 : i32, i32
  }
  func.func @transform_11(%arg0: i32) -> (i32, i32, i32) {
    %c0_i32 = arith.constant 0 : i32
    %c0_i32_0 = arith.constant 0 : i32
    %c0_i32_1 = arith.constant 0 : i32
    return %c0_i32, %arg0, %c0_i32_0 : i32, i32, i32
  }
  func.func @transform_12(%arg0: i32) -> (i32, i32, i32) {
    %c0_i32 = arith.constant 0 : i32
    %c0_i32_0 = arith.constant 0 : i32
    %c0_i32_1 = arith.constant 0 : i32
    %c0_i32_2 = arith.constant 0 : i32
    return %c0_i32, %c0_i32_0, %c0_i32_1 : i32, i32, i32
  }
}

</mosaic_0001>

<bundles_post_ra>
// kernel: tpu_custom_call.1
= control target key start
LH: loop header
LB: loop body
LE: loop exit
PB: predicated region body
PF: predicated region fallthrough
CT: control target
= control target key end

     0   :  { %s7133_s0 = inlined_call_operand.hbm [shape: f32[8,16,128], index: 0, kind: input, shape index: {}]   ;;  %s7134_s1 = inlined_call_operand.hbm [shape: f32[256,128], index: 1, kind: input, shape index: {}]   ;;  %s7135_s2 = inlined_call_operand.hbm [shape: f32[1,128], index: 2, kind: input, shape index: {}]   ;;  %s7136_s3 = inlined_call_operand.hbm [shape: f32[16,128], index: 3, kind: input, shape index: {}]   ;;  %s7137_s4 = inlined_call_operand.hbm [shape: f32[1,128], index: 4, kind: input, shape index: {}]   ;;  %s7138_s5 = inlined_call_operand.<no memory space> [shape: f32[1,1], index: 5, kind: input, shape index: {}]   ;;  %s7139_s6 = inlined_call_operand.hbm [shape: f32[256,128], index: 6, kind: input, shape index: {}]   ;;  %s7140_s7 = inlined_call_operand.hbm [shape: f32[1,128], index: 7, kind: input, shape index: {}]   ;;  %s7141_s8 = inlined_call_operand.vmem [shape: f32[16,128], index: 8, kind: input, shape index: {}]   ;;  %s7142_s9 = inlined_call_operand.vmem [shape: f32[1,128], index: 9, kind: input, shape index: {}]   ;;  %s7143_s10 = inlined_call_operand.<no memory space> [shape: f32[1,1], index: 10, kind: input, shape index: {}]   ;;  %s7144_s11 = inlined_call_operand.hbm [shape: f32[8,16,128], index: 11, kind: output, shape index: {0}]   ;;  %s7145_s12 = inlined_call_operand.hbm [shape: f32[2,8,128], index: 12, kind: output, shape index: {1}]  }
   0x1   :  { %7305 = sst [smem:[#allocation67_spill]] %s7134_s1 }
   0x2   :  { %7306 = sst [smem:[#allocation68_spill]] %s7135_s2 }
   0x3   :  { %7307 = sst [smem:[#allocation69_spill]] %s7136_s3 }
   0x4   :  { %7308 = sst [smem:[#allocation70_spill]] %s7137_s4 }
   0x5   :  { %18 = sst [smem:[#allocation2]] %s7138_s5 }
   0x6   :  { %19 = sst [smem:[#allocation3]] %s7143_s10 }
   0x7   :  { %20 = vsyncpa [#allocation5], 0 }
   0x8   :  { %22 = vsyncpa [#allocation5 + $0x1], 0 }
   0x9   :  { %23 = vsyncpa [#allocation8], 0 }
   0xa   :  { %24 = vsyncpa [#allocation11], 0 }
   0xb   :  { %25 = vsyncpa [#allocation14], 0 }
   0xc   :  { %26 = vsyncpa [#allocation6], 0 }
   0xd   :  { %28 = vsyncpa [#allocation6 + $0x1], 0 }
   0xe   :  { %29 = vsyncpa [#allocation18], 0  ;;  %s5610_s25 = smov 0   ;;  %s5612_s26 = smov 0  }
   0xf   :  { %s5614_s27 = smov 0   ;;  %s5616_s28 = smov 0  }
  0x10 LB: > { %s5519_s5 = smov [#allocation7]   ;;  %s5631_s29 = sadd.s32 4294967295, %s5517_s28   ;;  %s5517_s28 = sphi %s5616_s28, %s7569_s28   ;;  %s5513_s27 = sphi %s5614_s27, %s7568_s27   ;;  %s5509_s26 = sphi %s5612_s26, %s7567_s26   ;;  %s5505_s25 = sphi %s5610_s25, %s7566_s25  }
  0x11   : > { %s335_s10 = sshll.u32 %s5519_s5, 4  ;;  %p4063_p0 = scmp.ge.s32.totalorder %s5517_s28, 1  ;;  %s336_s10 = int_to_ptr.vmem [resolvable:$true] %s335_s10 }
  0x12   : > { %p7146_p1 = scmp.eq.s32.totalorder %s5631_s29, 0  ;;  %p323_p2 = scmp.lt.s32.totalorder %s5517_s28, 3 }
  0x13   : > { %s5520_s13 = smov [#allocation10]   ;;  %s5521_s16 = smov [#allocation13]  }
  0x14   : > { %p5637_p4 = pnand %p4063_p0, %p323_p2  ;;  %s359_s14 = sshll.u32 %s5520_s13, 4  ;;  %s5650_s14 = int_to_ptr.vmem [resolvable:$true] %s359_s14 }
  0x15   : > { %s386_s17 = sshll.u32 %s5521_s16, 4  ;;  %s5240_s19 = scalar_lea.vmem %s336_s10, 4096  ;;  %s5652_s17 = int_to_ptr.vmem [resolvable:$true] %s386_s17 }
  0x16   : > { %s7309_s30 = scalar_select %p5637_p4, 1, 0 }
  0x17   : > { %p4916_p6 = pneg %p5637_p4  ;;  %p5241_p9 = scmp.ne.s32.totalorder %s336_s10, %s5240_s19 }
  0x18   : > { %p5248_p12 = scmp.lt.s32.totalorder %s336_s10, %s336_s10  ;;  %p5249_p13 = scmp.lt.s32.totalorder %s5240_s19, %s5240_s19 }
  0x19   : > { %p5646_p7 = pnand %p4916_p6, %p7146_p1 }
  0x1a   : > { %p5250_p0 = por %p5249_p13, %p5248_p12 }
  0x1b   : > { %p5656_p8 = pneg %p5646_p7 }
  0x1d   : > { %p5243_p10 = pnand %p5241_p9, %p5656_p8 }
  0x1f   : > { %p5244_p11 = pneg %p5243_p10 }
  0x21   : > { %p5251_p2 = pnand %p5250_p0, %p5244_p11 }
  0x23   : > { %5254 = shalt.err (!%p5251_p2)
}
  0x24   : > { %s7147_s20 = smov 128   ;;  %s7148_s21 = smov 8  }
  0x25   : > { %s7312_s1 = sld [smem:[#allocation67_spill]]  ;;  %s5266_s24 = scalar_lea.vmem %s5650_s14, 256 }
  0x26   : > { %p5267_p6 = scmp.ne.s32.totalorder %s5650_s14, %s5266_s24  ;;  %p5274_p11 = scmp.lt.s32.totalorder %s5650_s14, %s5650_s14 }
  0x27   : > { %p5275_p12 = scmp.lt.s32.totalorder %s5266_s24, %s5266_s24 }
  0x28   : > { %p5269_p9 = pnand %p5267_p6, %p5656_p8 }
  0x29   : > { %p5276_p13 = por %p5275_p12, %p5274_p11 }
  0x2a   : > { %p5270_p10 = pneg %p5269_p9 }
  0x2b   : > { %4919 = dma.hbm_to_vmem [thread:$0]  (!%p5646_p7), %s7312_s1, 4096, %s336_s10, [#allocation8], %s7147_s20, %s7147_s20, %s7148_s21  }
  0x2c   : > { %p5277_p0 = pnand %p5276_p13, %p5270_p10 }
  0x2e   : > { %5280 = shalt.err (!%p5277_p0)
}
  0x2f   : > { %s7313_s3 = sld [smem:[#allocation69_spill]]  ;;  %s5292_s10 = scalar_lea.vmem %s5652_s17, 4096 }
  0x30   : > { %p5293_p2 = scmp.ne.s32.totalorder %s5652_s17, %s5292_s10  ;;  %p5300_p10 = scmp.lt.s32.totalorder %s5652_s17, %s5652_s17 }
  0x31   : > { %p5301_p11 = scmp.lt.s32.totalorder %s5292_s10, %s5292_s10 }
  0x32   : > { %p5295_p6 = pnand %p5293_p2, %p5656_p8 }
  0x33   : > { %p5302_p12 = por %p5301_p11, %p5300_p10 }
  0x34   : > { %p5296_p9 = pneg %p5295_p6 }
  0x35   : > { %4925 = dma.hbm_to_vmem [thread:$0]  (!%p5646_p7), %s7313_s3, 256, %s5650_s14, [#allocation11], %s7147_s20, %s7147_s20, %s7148_s21  }
  0x36   : > { %p5303_p13 = pnand %p5302_p12, %p5296_p9 }
  0x38   : > { %5306 = shalt.err (!%p5303_p13)
}
  0x39   : > { %4931 = dma.hbm_to_vmem [thread:$0]  (!%p5646_p7), %s7139_s6, 4096, %s5652_s17, [#allocation14], %s7147_s20, %s7147_s20, %s7148_s21  }
  0x3a   : > { %s5524_s14 = smov [#allocation9]   ;;  %s5525_s23 = smov [#allocation12]  }
  0x3b   : > { %s349_s22 = sshll.u32 %s5524_s14, 4  ;;  %s373_s24 = sshll.u32 %s5525_s23, 4  ;;  %s350_s22 = int_to_ptr.vmem [resolvable:$true] %s349_s22  ;;  %s374_s24 = int_to_ptr.vmem [resolvable:$true] %s373_s24 }
  0x3c   : > { %s5318_s5 = scalar_lea.vmem %s350_s22, 16  ;;  %s5325_s13 = scalar_lea.vmem %s350_s22, 32 }
  0x3d   : > { %p5319_p0 = scmp.ne.s32.totalorder %s350_s22, %s5318_s5  ;;  %p5326_p9 = scmp.lt.s32.totalorder %s350_s22, %s350_s22 }
  0x3e   : > { %p5327_p10 = scmp.lt.s32.totalorder %s5325_s13, %s5318_s5 }
  0x3f   : > { %p5321_p2 = pnand %p5319_p0, %p5656_p8 }
  0x40   : > { %p5328_p11 = por %p5327_p10, %p5326_p9 }
  0x41   : > { %p5322_p6 = pneg %p5321_p2 }
  0x43   : > { %p5329_p12 = pnand %p5328_p11, %p5322_p6 }
  0x45   : > { %5332 = shalt.err (!%p5329_p12)
}
  0x46   : > { %s7314_s2 = sld [smem:[#allocation68_spill]]  ;;  %s5344_s16 = scalar_lea.vmem %s374_s24, 16 }
  0x47   : > { %p5345_p13 = scmp.ne.s32.totalorder %s374_s24, %s5344_s16  ;;  %s5351_s19 = scalar_lea.vmem %s374_s24, 32 }
  0x48   : > { %p5352_p2 = scmp.lt.s32.totalorder %s374_s24, %s374_s24  ;;  %p5353_p3 = scmp.lt.s32.totalorder %s5351_s19, %s5344_s16 }
  0x49   : > { %p5347_p5 = pnand %p5345_p13, %p5656_p8 }
  0x4a   : > { %p5354_p1 = por %p5353_p3, %p5352_p2 }
  0x4b   : > { %p5348_p0 = pneg %p5347_p5 }
  0x4c   : > { %4922 = dma.hbm_to_vmem [thread:$0]  (!%p5646_p7), %s7314_s2, 16, %s350_s22, [#allocation8]  }
  0x4d   : > { %p5355_p9 = pnand %p5354_p1, %p5348_p0 }
  0x4f   : > { %5358 = shalt.err (!%p5355_p9)
}
  0x50   : > { %s7315_s4 = sld [smem:[#allocation70_spill]]  ;;  %s5526_s22 = smov [#allocation15]  }
  0x51   : > { %s400_s5 = sshll.u32 %s5526_s22, 4  ;;  %s401_s5 = int_to_ptr.vmem [resolvable:$true] %s400_s5 }
  0x52   : > { %s5370_s13 = scalar_lea.vmem %s401_s5, 16  ;;  %s5377_s10 = scalar_lea.vmem %s401_s5, 32 }
  0x53   : > { %p5371_p6 = scmp.ne.s32.totalorder %s401_s5, %s5370_s13  ;;  %p5378_p11 = scmp.lt.s32.totalorder %s401_s5, %s401_s5 }
  0x54   : > { %p5379_p3 = scmp.lt.s32.totalorder %s5377_s10, %s5370_s13 }
  0x55   : > { %p5373_p5 = pnand %p5371_p6, %p5656_p8 }
  0x56   : > { %4928 = dma.hbm_to_vmem [thread:$0]  (!%p5646_p7), %s7315_s4, 16, %s374_s24, [#allocation11]  }
  0x57   : > { %p5374_p10 = pneg %p5373_p5  ;;  %p5380_p1 = por %p5379_p3, %p5378_p11 }
  0x59   : > { %p5381_p12 = pnand %p5380_p1, %p5374_p10 }
  0x5b   : > { %5384 = shalt.err (!%p5381_p12)
}
  0x5c   : > { %4934 = dma.hbm_to_vmem [thread:$0]  (!%p5646_p7), %s7140_s7, 16, %s401_s5, [#allocation14]  }
  0x5d   : > { %s4062_s15 = sadd.s32 4294967294, %s5517_s28   ;;  %s5723_s18 = sadd.s32 1, %s5517_s28  }
  0x5e   : > { %s39_s24 = ssub.s32 %s5517_s28, %s5723_s18  ;;  %s42_s19 = sadd.s32 1, %s5513_s27 }
  0x5f   : > { %p40_p8 = scmp.eq.s32.totalorder %s39_s24, 0  ;;  %p49_p13 = scmp.ne.s32.totalorder %s5513_s27, %s5509_s26 }
  0x60   : > { %p50_p0 = scmp.eq.s32.totalorder %s5517_s28, 0  ;;  %p55_p2 = scmp.ne.s32.totalorder %s5509_s26, %s5505_s25 }
  0x61   : > { %s5734_s14 = scalar_select %p40_p8, %s5513_s27, %s42_s19  }
  0x62   : > { %p5736_p9 = por %p50_p0, %p49_p13  ;;  %p7317_p6 = scmp.eq.s32.totalorder %s5631_s29, 0 }
  0x63   : > { %p7149_p5 = scmp.eq.s32.totalorder %s5631_s29, 1  ;;  %p295_p10 = scmp.eq.s32.totalorder %s4062_s15, 1 }
  0x64   : > { %p5742_p7 = por %p7317_p6, %p55_p2  ;;  %p4949_p11 = scmp.lt.s32.totalorder %s5517_s28, 2 }
  0x65   : > { %s420_s5 = sand.u32 1, %s5513_s27   ;;  %p5751_p3 = por %p7149_p5, %p49_p13 }
  0x66   : > { %s7318_s22 = scalar_select %p5742_p7, 1, 0 }
  0x67   : > { %s7319_s13 = scalar_select %p5751_p3, 1, 0 }
  0x68   : > { %p5755_p1 = por %p295_p10, %p55_p2  ;;  %s4071_s17 = sshll.u32 %s420_s5, 6 }
  0x69   : > { %s4072_s16 = sshll.u32 %s5517_s28, 7  ;;  %s424_s15 = scalar_lea.vmem [#allocation4], %s4071_s17 }
  0x6a   : > { %s7320_s10 = scalar_select %p5755_p1, 1, 0 }
  0x6b   : > { %s5763_s20 = scalar_lea.hbm %s7133_s0, %s4072_s16  ;;  %s430_s21 = sshll.u32 %s424_s15, 4  ;;  %s5765_s21 = int_to_ptr.vmem [resolvable:$true] %s430_s21 }
  0x6c   : > { %p5769_p12 = pnand %p4949_p11, %p5736_p9  ;;  %s5773_s2 = scalar_lea.sflag [#allocation5], %s420_s5 }
  0x6d   : > { %s5385_s3 = scalar_lea.hbm %s5763_s20, 1024  ;;  %s5390_s17 = scalar_lea.hbm %s7133_s0, 2048 }
  0x6e   : > { %p5386_p8 = scmp.ne.s32.totalorder %s5763_s20, %s5385_s3  ;;  %p5387_p13 = pneg %p5769_p12 }
  0x6f   : > { %p5391_p9 = scmp.lt.s32.totalorder %s5763_s20, %s7133_s0  ;;  %p5392_p6 = scmp.lt.s32.totalorder %s5390_s17, %s5385_s3 }
  0x70   : > { %p5388_p0 = pnand %p5387_p13, %p5386_p8 }
  0x71   : > { %p5393_p10 = por %p5392_p6, %p5391_p9 }
  0x72   : > { %p5389_p2 = pneg %p5388_p0 }
  0x74   : > { %p5394_p11 = pnand %p5393_p10, %p5389_p2 }
  0x76   : > { %5397 = shalt.err (!%p5394_p11)
}
  0x77   : > { %s5398_s23 = scalar_lea.vmem %s5765_s21, 1024  ;;  %s5527_s5 = smov [#allocation4]  }
  0x78   : > { %p5399_p5 = scmp.ne.s32.totalorder %s5765_s21, %s5398_s23  ;;  %s5403_s4 = sshll.u32 %s5527_s5, 4  ;;  %s5404_s4 = int_to_ptr.vmem [resolvable:$false] %s5403_s4 }
  0x79   : > { %s5405_s16 = scalar_lea.vmem %s5404_s4, 2048  ;;  %p5406_p0 = scmp.lt.s32.totalorder %s5765_s21, %s5404_s4 }
  0x7a   : > { %p5401_p1 = pnand %p5399_p5, %p5387_p13  ;;  %p5407_p3 = scmp.lt.s32.totalorder %s5405_s16, %s5398_s23 }
  0x7c   : > { %p5402_p8 = pneg %p5401_p1  ;;  %p5408_p7 = por %p5407_p3, %p5406_p0 }
  0x7e   : > { %p5409_p4 = pnand %p5408_p7, %p5402_p8 }
  0x80   : > { %5412 = shalt.err (!%p5409_p4)
}
  0x81   : > { %s5528_s3 = smov 256   ;;  %s7322_s24 = smov 8  }
  0x82   : > { %s7323_s17 = smov 128   ;;  %p7324_p5 = scmp.ne.s32.totalorder %s7309_s30, 0 }
  0x83   : > { %4938 = dma.hbm_to_vmem [thread:$0]  (!%p5769_p12), %s5763_s20, 1024, %s5765_s21, %s5773_s2, %s5528_s3, %s7323_s17, %s7322_s24  }
  0x84   : > { %442 = sbr.rel (%p7324_p5) target bundleno = 8112 (0x1fb0), region = 64 }
  0x89   : > { %s5799_s19 = sand.u32 1, %s5509_s26   ;;  %p7325_p4 = scmp.ne.s32.totalorder %s7318_s22, 0 }
  0x8a   : > { %s4074_s4 = sshll.u32 %s5799_s19, 6  ;;  %s445_s15 = scalar_lea.sflag [#allocation5], %s5799_s19 }
  0x8b   : > { %s5803_s23 = scalar_lea.vmem [#allocation4], %s4074_s4 }
  0x8c   : > { %5480 = dma.done.wait (%p7325_p4), %s445_s15, 1024  }
  0x8d   : > { %5482 = vsyncadd (%p7325_p4), %s445_s15, 4294966272  ;;  %p7326_p7 = scmp.eq.s32.totalorder %s5631_s29, 0 }
  0x8f   : > { %5484 = dma.done.wait (%p7326_p7), [#allocation8], 4112   ;;  %p7327_p3 = pmov %p7326_p7 }
  0x91   : > { %5486 = vsyncadd (%p7327_p3), [#allocation8], 4294963184  ;;  %p7328_p1 = pmov %p7327_p3 }
  0x93   : > { %5488 = dma.done.wait (%p7328_p1), [#allocation11], 272   ;;  %p7329_p12 = pmov %p7328_p1 }
  0x94   : > { %p7330_p13 = pmov %p7328_p1 }
  0x95   : > { %5490 = vsyncadd (%p7329_p12), [#allocation11], 4294967024 }
  0x96   : > { %5492 = dma.done.wait (%p7330_p13), [#allocation14], 4112   ;;  %p7331_p2 = pmov %p7328_p1 }
  0x97   : > { %s5821_s1 = scalar_lea.vmem [#allocation16], %s4074_s4  ;;  %p7332_p9 = scmp.ne.s32.totalorder %s5631_s29, 0 }
  0x98   : > { %5494 = vsyncadd (%p7331_p2), [#allocation14], 4294963184 }
  0x99   : > { %516 = sbr.rel (%p7332_p9) target bundleno = 160 (0xa0), region = 96 }
  0x9e   : > { %v5529_v0 = vmov 0.0  }
  0x9f   : > { %517 = vst [vmem:[#allocation17] sm:$0xff] %v5529_v0  ;;  %518 = vst [vmem:[#allocation17 + $0x8] sm:$0xff] %v5529_v0 }
  0xa0 PF: > { %v5825_v1 = vld [vmem:[#allocation7 + $0xf8] sm:$0xff]  ;;  %v5829_v3 = vld [vmem:[#allocation7 + $0xf0] sm:$0xff]  ;;  %v5835_v5 = vld [vmem:[#allocation7 + $0xe8] sm:$0xff]  ;;  %vm613_vm0 = vcmask 1041409   ;;  %vm616_vm1 = vcmask 1042434   ;;  %vm619_vm2 = vcmask 1043459  }
  0xa1   : > { %7333 = vst [vmem:[#allocation25_spill] sm:$0xff] %v5825_v1  ;;  %v5827_v2 = vld [vmem:[#allocation7 + $0x78] sm:$0xff]  ;;  %4164 = vmatprep.subr.mxu0 %v5825_v1  ;;  %v5832_v4 = vld [vmem:[#allocation7 + $0x70] sm:$0xff]  ;;  %v5838_v6 = vld [vmem:[#allocation7 + $0x68] sm:$0xff]  ;;  %vm622_vm3 = vcmask 1044484   ;;  %vm625_vm4 = vcmask 1045509  }
  0xa2   : > { %4165 = vmatpush3.msra.mxu0 %v5827_v2  ;;  %v5841_v7 = vld [vmem:[#allocation7 + $0xe0] sm:$0xff]  ;;  %v5847_v9 = vld [vmem:[#allocation7 + $0xd8] sm:$0xff]  ;;  %v5853_v11 = vld [vmem:[#allocation7 + $0xd0] sm:$0xff]  ;;  %vm628_vm5 = vcmask 1046534   ;;  %vm631_vm6 = vcmask 1047559   ;;  %s591_s2 = sld [smem:[#allocation2]] }
  0xa3   : > { %4166 = vmatprep.subr.mxu0 %v5829_v3  ;;  %v5844_v8 = vld [vmem:[#allocation7 + $0x60] sm:$0xff]  ;;  %v5850_v10 = vld [vmem:[#allocation7 + $0x58] sm:$0xff]  ;;  %v5856_v12 = vld [vmem:[#allocation7 + $0x50] sm:$0xff]  ;;  %vm5531_vm7 = vmmov 0   ;;  %s5532_s30 = smov 112   ;;  %vm728_vm8 = vcmask 130048  }
  0xa4   : > { %4167 = vmatpush3.msra.mxu0 %v5832_v4  ;;  %v5859_v13 = vld [vmem:[#allocation7 + $0xc8] sm:$0xff]  ;;  %v5865_v16 = vld [vmem:[%s5803_s23] sm:$0xff]  ;;  %v598_v18 = vld [vmem:[%s5803_s23 + $0x10] sm:$0xff]  ;;  %s592_s20 = sld [smem:[#allocation3]]  ;;  %vm1059_vm9 = vcmask 1046528   ;;  %vm1465_vm10 = vcmask 1045504  }
  0xa5   : > { %4168 = vmatprep.subr.mxu0 %v5835_v5  ;;  %v5861_v14 = vld [vmem:[#allocation7 + $0x48] sm:$0xff]  ;;  %v5870_v19 = vld [vmem:[#allocation7 + $0xc0] sm:$0xff]  ;;  %v599_v20 = vld [vmem:[%s5803_s23 + $0x18] sm:$0xff]  ;;  %v5875_v22 = vrot.slane %v598_v18, 6  ;;  %v7153_v18 = vmov 0.0   ;;  %vm1871_vm11 = vcmask 1044480  }
  0xa6   : > { %4169 = vmatpush3.msra.mxu0 %v5838_v6  ;;  %v593_v15 = vld [vmem:[#allocation17] sm:$0xff]  ;;  %v597_v17 = vld [vmem:[%s5803_s23 + $0x8] sm:$0xff]  ;;  %v5878_v23 = vld [vmem:[#allocation7 + $0x40] sm:$0xff]  ;;  %v5887_v27 = vrot.slane %v599_v20, 5  ;;  %4772 = vmatprep.subr.mxu1 %v7153_v18  ;;  %vm2277_vm12 = vcmask 1043456   ;;  %vm2683_vm13 = vcmask 1042432  }
  0xa7   : > { %4170 = vmatprep.subr.mxu0 %v5841_v7  ;;  %704 = vmatprep.mubr.f32.mxu0 %v593_v15  ;;  %v5873_v21 = vrot.slane %v597_v17, 7  ;;  %7335 = vst [vmem:[#allocation27_spill] sm:$0xff] %v5875_v22  ;;  %v5881_v24 = vld [vmem:[#allocation7 + $0xb8] sm:$0xff]  ;;  %v600_v25 = vld [vmem:[%s5803_s23 + $0x20] sm:$0xff]  ;;  %v5895_v30 = vld [vmem:[#allocation7 + $0xb0] sm:$0xff]  ;;  %vm3089_vm14 = vcmask 1041408  }
  0xa8   : > { %4171 = vmatpush3.msra.mxu0 %v5844_v8  ;;  %7336 = vst [vmem:[#allocation28_spill] sm:$0xff] %v5887_v27  ;;  %v5890_v28 = vld [vmem:[#allocation7 + $0x38] sm:$0xff]  ;;  %v5898_v31 = vld [vmem:[#allocation7 + $0x30] sm:$0xff]  ;;  %v601_v32 = vld [vmem:[%s5803_s23 + $0x28] sm:$0xff]  ;;  %v5901_v33 = vrot.slane %v600_v25, 4  ;;  %v5963_v61 = vstv %s591_s2  ;;  %4776 = vmatprep.mubr.msk.f32.mxu1 %vm5531_vm7, %v7153_v18  ;;  %vm3495_vm15 = vcmask 1040384  }
  0xa9   : > { %4172 = vmatprep.subr.mxu0 %v5847_v9  ;;  %7334 = vst [vmem:[#allocation26_spill] sm:$0xff] %v5873_v21  ;;  %v614_v26 = vsel %vm613_vm0, %v5873_v21, %v5865_v16  ;;  %v5904_v34 = vld [vmem:[#allocation7 + $0xa8] sm:$0xff]  ;;  %v5912_v37 = vld [vmem:[#allocation7 + $0xa0] sm:$0xff]  ;;  %v602_v38 = vld [vmem:[%s5803_s23 + $0x30] sm:$0xff]  ;;  %v5915_v39 = vrot.slane %v601_v32, 3  ;;  %p7559_p10 = scmp.eq.s32.totalorder %s5631_s29, 1 }
  0xaa   : > { %4173 = vmatpush3.msra.mxu0 %v5850_v10  ;;  %v617_v29 = vsel %vm616_vm1, %v5875_v22, %v614_v26  ;;  %v5909_v36 = vld [vmem:[#allocation7 + $0x28] sm:$0xff]  ;;  %v5918_v40 = vld [vmem:[#allocation7 + $0x20] sm:$0xff]  ;;  %v5923_v42 = vld [vmem:[#allocation7 + $0x98] sm:$0xff]  ;;  %v5929_v45 = vrot.slane %v602_v38, 2 }
  0xab   : > { %4174 = vmatprep.subr.mxu0 %v5853_v11  ;;  %v620_v35 = vsel %vm619_vm2, %v5887_v27, %v617_v29  ;;  %v5926_v43 = vld [vmem:[#allocation7 + $0x18] sm:$0xff]  ;;  %v5932_v46 = vld [vmem:[#allocation7 + $0x90] sm:$0xff]  ;;  %v5940_v49 = vld [vmem:[#allocation7 + $0x88] sm:$0xff] }
  0xac   : > { %4175 = vmatpush3.msra.mxu0 %v5856_v12  ;;  %v623_v41 = vsel %vm622_vm3, %v5901_v33, %v620_v35  ;;  %v603_v44 = vld [vmem:[%s5803_s23 + $0x38] sm:$0xff]  ;;  %7337 = vst [vmem:[#allocation29_spill] sm:$0xff] %v5929_v45  ;;  %7338 = vst [vmem:[#allocation30_spill] sm:$0xff] %v5932_v46  ;;  %v5937_v48 = vld [vmem:[#allocation7 + $0x10] sm:$0xff] }
  0xad   : > { %4176 = vmatprep.subr.mxu0 %v5859_v13  ;;  %v626_v47 = vsel %vm625_vm4, %v5915_v39, %v623_v41  ;;  %7339 = vst [vmem:[#allocation31_spill] sm:$0xff] %v5937_v48  ;;  %7340 = vst [vmem:[#allocation32_spill] sm:$0xff] %v5940_v49  ;;  %v5942_v50 = vrot.slane %v603_v44, 1  ;;  %v5945_v51 = vld [vmem:[#allocation7 + $0x8] sm:$0xff]  ;;  %v5950_v53 = vld [vmem:[#allocation7 + $0x80] sm:$0xff] }
  0xae   : > { %4177 = vmatpush3.msra.mxu0 %v5861_v14  ;;  %7342 = vst [vmem:[#allocation34_spill] sm:$0xff] %v5945_v51  ;;  %v629_v52 = vsel %vm628_vm5, %v5929_v45, %v626_v47  ;;  %7343 = vst [vmem:[#allocation35_spill] sm:$0xff] %v5950_v53  ;;  %v5953_v54 = vld [vmem:[#allocation7] sm:$0xff]  ;;  %v5970_v20 = vld [vmem:[#allocation10 + $0x8] sm:$0xff] }
  0xaf   : > { %4178 = vmatprep.subr.mxu0 %v5870_v19  ;;  %7341 = vst [vmem:[#allocation33_spill] sm:$0xff] %v5942_v50  ;;  %7344 = vst [vmem:[#allocation36_spill] sm:$0xff] %v5953_v54  ;;  %v632_v55 = vsel %vm631_vm6, %v5942_v50, %v629_v52  ;;  %v5960_v57 = vld [vmem:[#allocation9] ss:$0 sm:$0xff]  ;;  %4773 = vmatpush3.msra.mxu1 %v5970_v20  ;;  %v5975_v25 = vld [vmem:[#allocation10] sm:$0xff] }
  0xb0   : > { %4179 = vmatpush3.msra.mxu0 %v5878_v23  ;;  %7345 = vst [vmem:[#allocation37_spill] sm:$0xff] %v5970_v20  ;;  %4774 = vmatprep.subr.mxu1 %v7153_v18  ;;  %7346 = vst [vmem:[#allocation38_spill] sm:$0xff] %v5975_v25  ;;  %v5980_v26 = vld [vmem:[#allocation13 + $0xf8] sm:$0xff] }
  0xb1   : > { %4180 = vmatprep.subr.mxu0 %v5881_v24  ;;  %4775 = vmatpush3.msra.mxu1 %v5975_v25  ;;  %7347 = vst [vmem:[#allocation39_spill] sm:$0xff] %v5980_v26  ;;  %v5986_v52 = vld [vmem:[#allocation13 + $0x78] sm:$0xff] }
  0xb2   : > { %4181 = vmatpush3.msra.mxu0 %v5890_v28  ;;  %4202 = vmatprep.subr.mxu1 %v5980_v26 }
  0xb3   : > { %4182 = vmatprep.subr.mxu0 %v5895_v30 }
  0xb4   : > { %4183 = vmatpush3.msra.mxu0 %v5898_v31 }
  0xb5   : > { %4184 = vmatprep.subr.mxu0 %v5904_v34 }
  0xb6   : > { %4185 = vmatpush3.msra.mxu0 %v5909_v36 }
  0xb7   : > { %4186 = vmatprep.subr.mxu0 %v5912_v37 }
  0xb8   : > { %4187 = vmatpush3.msra.mxu0 %v5918_v40 }
  0xb9   : > { %4188 = vmatprep.subr.mxu0 %v5923_v42 }
  0xba   : > { %4189 = vmatpush3.msra.mxu0 %v5926_v43 }
  0xbb   : > { %4190 = vmatprep.subr.mxu0 %v5932_v46 }
  0xbc   : > { %4191 = vmatpush3.msra.mxu0 %v5937_v48 }
  0xbd   : > { %4192 = vmatprep.subr.mxu0 %v5940_v49 }
  0xbe   : > { %4193 = vmatpush3.msra.mxu0 %v5945_v51 }
  0xbf   : > { %4194 = vmatprep.subr.mxu0 %v5950_v53 }
  0xc0   : > { %4195 = vmatpush3.msra.mxu0 %v5953_v54 }
  0xc1   : > { %705 = vmatmul.mubr.f32.vlgmr.msra.gmra.mxu0 %v632_v55  ;;  %4779 = vmatprep.subr.mxu0 %v7153_v18  ;;  %v5988_v55 = vld [vmem:[#allocation13 + $0xf0] sm:$0xff] }
  0xc2   : > { %4783 = vmatprep.mubr.msk.f32.mxu0 %vm5531_vm7, %v7153_v18  ;;  %v6036_v18 = vld [vmem:[#allocation13 + $0xb0] sm:$0xff] }
  0xc3   : > { %7356 = vst [vmem:[#allocation48_spill] sm:$0xff] %v6036_v18 }
 0x181   : > { %v4196_v56 = vpop.f32.mrf.mxu0 }
 0x183   : > { %v4197_v58 = vpop.f32.mrf.mxu0 }
 0x184   : > { %v4198_v59 = vadd.f32 %v4197_v58, %v4196_v56  ;;  %v5991_v56 = vld [vmem:[#allocation13 + $0x70] sm:$0xff]  ;;  %v5994_v58 = vld [vmem:[#allocation13 + $0xe8] sm:$0xff] }
 0x186   : > { %v707_v60 = vadd.f32 %v4198_v59, %v5960_v57  ;;  %v5997_v59 = vld [vmem:[#allocation13 + $0x68] sm:$0xff] }
 0x188   : > { %5009 = vtanh.f32 %v707_v60  ;;  %v6000_v60 = vld [vmem:[#allocation13 + $0xe0] sm:$0xff] }
 0x195   : > { %v5010_v62 = vpop.eup %5009 }
 0x196   : > { %v5966_v63 = vmul.f32 %v5010_v62, %v5963_v61  ;;  %v6003_v62 = vld [vmem:[#allocation13 + $0x60] sm:$0xff] }
 0x198   : > { %v4084_v0 = vmul.f32 -1.442695, %v5966_v63 }
 0x19a   : > { %5011 = vpow2.f32 %v4084_v0  ;;  %v6006_v0 = vld [vmem:[#allocation13 + $0xd8] sm:$0xff] }
 0x1a7   : > { %v5012_v15 = vpop.eup %5011 }
 0x1a8   : > { %v716_v17 = vadd.f32 1.0, %v5012_v15  ;;  %v6009_v15 = vld [vmem:[#allocation13 + $0x58] sm:$0xff] }
 0x1aa   : > { %5013 = vrcp.f32 %v716_v17  ;;  %v6012_v17 = vld [vmem:[#allocation13 + $0xd0] sm:$0xff] }
 0x1ab   : > { %7348 = vst [vmem:[#allocation40_spill] sm:$0xff] %v6012_v17 }
 0x1b7   : > { %v5014_v29 = vpop.eup %5013 }
 0x1b8   : > { %720 = vrot.lane.b32.xlu0 %v5014_v29, %s5532_s30  ;;  %v724_v32 = vmul.f32 2.0, %v5014_v29 }
 0x22a   : > { %v721_v35 = vpop.permute.xlu0 %720 }
 0x22b   : > { %v723_v38 = vadd.f32 %v5014_v29, %v721_v35  ;;  %v725_v41 = vmul.f32 %v724_v32, %v721_v35  ;;  %v6015_v29 = vld [vmem:[#allocation13 + $0x50] sm:$0xff]  ;;  %v6018_v32 = vld [vmem:[#allocation13 + $0xc8] sm:$0xff] }
 0x22c   : > { %7349 = vst [vmem:[#allocation41_spill] sm:$0xff] %v6015_v29  ;;  %7350 = vst [vmem:[#allocation42_spill] sm:$0xff] %v6018_v32  ;;  %v6021_v35 = vld [vmem:[#allocation13 + $0x48] sm:$0xff] }
 0x22d   : > { %v726_v44 = vsub.f32 %v723_v38, %v725_v41  ;;  %7351 = vst [vmem:[#allocation43_spill] sm:$0xff] %v6021_v35  ;;  %v6024_v38 = vld [vmem:[#allocation13 + $0xc0] sm:$0xff] }
 0x22e   : > { %7352 = vst [vmem:[#allocation44_spill] sm:$0xff] %v6024_v38  ;;  %v6027_v41 = vld [vmem:[#allocation13 + $0x40] sm:$0xff] }
 0x22f   : > { %v727_v47 = vmul.f32 0.5, %v726_v44  ;;  %7353 = vst [vmem:[#allocation45_spill] sm:$0xff] %v6027_v41  ;;  %v6030_v44 = vld [vmem:[#allocation13 + $0xb8] sm:$0xff] }
 0x230   : > { %7354 = vst [vmem:[#allocation46_spill] sm:$0xff] %v6030_v44 }
 0x231   : > { %4777 = vmatmul.mubr.msk.f32.vlgmr.msra.gmra.mxu1 %vm728_vm8, %v727_v47  ;;  %v6033_v47 = vld [vmem:[#allocation13 + $0x38] sm:$0xff] }
 0x232   : > { %4203 = vmatpush3.msra.mxu1 %v5986_v52  ;;  %7355 = vst [vmem:[#allocation47_spill] sm:$0xff] %v6033_v47 }
 0x233   : > { %4204 = vmatprep.subr.mxu1 %v5988_v55 }
 0x234   : > { %4205 = vmatpush3.msra.mxu1 %v5991_v56 }
 0x235   : > { %4206 = vmatprep.subr.mxu1 %v5994_v58 }
 0x236   : > { %4207 = vmatpush3.msra.mxu1 %v5997_v59 }
 0x237   : > { %4208 = vmatprep.subr.mxu1 %v6000_v60 }
 0x238   : > { %4209 = vmatpush3.msra.mxu1 %v6003_v62 }
 0x239   : > { %4210 = vmatprep.subr.mxu1 %v6006_v0 }
 0x23a   : > { %4211 = vmatpush3.msra.mxu1 %v6009_v15 }
 0x23b   : > { %4212 = vmatprep.subr.mxu1 %v6012_v17 }
 0x23c   : > { %4213 = vmatpush3.msra.mxu1 %v6015_v29  ;;  %v6039_v29 = vld [vmem:[#allocation13 + $0x30] sm:$0xff] }
 0x23d   : > { %4214 = vmatprep.subr.mxu1 %v6018_v32  ;;  %7357 = vst [vmem:[#allocation49_spill] sm:$0xff] %v6039_v29  ;;  %v6042_v32 = vld [vmem:[#allocation13 + $0xa8] sm:$0xff] }
 0x23e   : > { %4215 = vmatpush3.msra.mxu1 %v6021_v35  ;;  %7358 = vst [vmem:[#allocation50_spill] sm:$0xff] %v6042_v32  ;;  %v6045_v35 = vld [vmem:[#allocation13 + $0x28] sm:$0xff] }
 0x23f   : > { %4216 = vmatprep.subr.mxu1 %v6024_v38  ;;  %7359 = vst [vmem:[#allocation51_spill] sm:$0xff] %v6045_v35  ;;  %v6048_v38 = vld [vmem:[#allocation13 + $0xa0] sm:$0xff] }
 0x240   : > { %4217 = vmatpush3.msra.mxu1 %v6027_v41  ;;  %7360 = vst [vmem:[#allocation52_spill] sm:$0xff] %v6048_v38  ;;  %v6051_v41 = vld [vmem:[#allocation13 + $0x20] sm:$0xff] }
 0x241   : > { %4218 = vmatprep.subr.mxu1 %v6030_v44  ;;  %7361 = vst [vmem:[#allocation53_spill] sm:$0xff] %v6051_v41  ;;  %v6054_v44 = vld [vmem:[#allocation13 + $0x98] sm:$0xff] }
 0x242   : > { %4219 = vmatpush3.msra.mxu1 %v6033_v47  ;;  %7362 = vst [vmem:[#allocation54_spill] sm:$0xff] %v6054_v44  ;;  %v6057_v47 = vld [vmem:[#allocation13 + $0x18] sm:$0xff] }
 0x243   : > { %4220 = vmatprep.subr.mxu1 %v6036_v18  ;;  %7363 = vst [vmem:[#allocation55_spill] sm:$0xff] %v6057_v47  ;;  %v6060_v18 = vld [vmem:[#allocation13 + $0x90] sm:$0xff] }
 0x244   : > { %4221 = vmatpush3.msra.mxu1 %v6039_v29  ;;  %7364 = vst [vmem:[#allocation56_spill] sm:$0xff] %v6060_v18 }
 0x245   : > { %4222 = vmatprep.subr.mxu1 %v6042_v32  ;;  %v6065_v32 = vld [vmem:[#allocation13 + $0x10] sm:$0xff] }
 0x246   : > { %4223 = vmatpush3.msra.mxu1 %v6045_v35  ;;  %7365 = vst [vmem:[#allocation57_spill] sm:$0xff] %v6065_v32  ;;  %v6068_v35 = vld [vmem:[#allocation13 + $0x88] sm:$0xff] }
 0x247   : > { %4224 = vmatprep.subr.mxu1 %v6048_v38  ;;  %7366 = vst [vmem:[#allocation58_spill] sm:$0xff] %v6068_v35  ;;  %v6071_v38 = vld [vmem:[#allocation13 + $0x8] sm:$0xff] }
 0x248   : > { %4225 = vmatpush3.msra.mxu1 %v6051_v41  ;;  %7367 = vst [vmem:[#allocation59_spill] sm:$0xff] %v6071_v38  ;;  %v6074_v41 = vld [vmem:[#allocation13 + $0x80] sm:$0xff] }
 0x249   : > { %4226 = vmatprep.subr.mxu1 %v6054_v44  ;;  %7368 = vst [vmem:[#allocation60_spill] sm:$0xff] %v6074_v41  ;;  %v6077_v44 = vld [vmem:[#allocation13] sm:$0xff] }
 0x24a   : > { %4227 = vmatpush3.msra.mxu1 %v6057_v47  ;;  %7369 = vst [vmem:[#allocation61_spill] sm:$0xff] %v6077_v44  ;;  %v595_v47 = vld [vmem:[#allocation17 + $0x8] sm:$0xff] }
 0x24b   : > { %4228 = vmatprep.subr.mxu1 %v6060_v18  ;;  %880 = vmatprep.mubr.f32.mxu1 %v595_v47  ;;  %v7370_v18 = vmov 0.0  }
 0x24c   : > { %4229 = vmatpush3.msra.mxu1 %v6065_v32  ;;  %v6081_v32 = vld [vmem:[#allocation12] ss:$0 sm:$0xff] }
 0x24d   : > { %4230 = vmatprep.subr.mxu1 %v6068_v35  ;;  %7371 = vst [vmem:[#allocation62_spill] sm:$0xff] %v6081_v32 }
 0x24e   : > { %4231 = vmatpush3.msra.mxu1 %v6071_v38 }
 0x24f   : > { %4232 = vmatprep.subr.mxu1 %v6074_v41 }
 0x250   : > { %4233 = vmatpush3.msra.mxu1 %v6077_v44  ;;  %v6091_v44 = vld [vmem:[#allocation15] ss:$0 sm:$0xff] }
 0x251   : > { %4786 = vmatprep.subr.mxu1 %v7370_v18 }
 0x2f1   : > { %v798_v29 = vpop.f32.mrf.mxu1 }
 0x2f2   : > { %v802_v35 = vadd.f32 %v798_v29, %v5966_v63  ;;  %v6094_v29 = vstv %s592_s20 }
 0x2f3   : > { %v4778_v17 = vpop.f32.mrf.mxu1  ;;  %7372 = vst [vmem:[#allocation63_spill] sm:$0xff] %v6094_v29 }
 0x2f4   : > { %v809_v38 = vadd.f32 %v6081_v32, %v802_v35 }
 0x2f6   : > { %881 = vmatmul.mubr.f32.vlgmr.msra.gmra.mxu1 %v809_v38 }
 0x2f7   : > { %4787 = vmatpush3.msra.mxu1 %v5970_v20  ;;  %4790 = vmatprep.mubr.msk.f32.mxu1 %vm5531_vm7, %v7370_v18 }
 0x2f8   : > { %4788 = vmatprep.subr.mxu1 %v7370_v18 }
 0x2f9   : > { %4789 = vmatpush3.msra.mxu1 %v5975_v25 }
 0x2fa   : > { %4278 = vmatprep.subr.mxu1 %v5980_v26 }
 0x3b6   : > { %v4234_v47 = vpop.f32.mrf.mxu1 }
 0x3b8   : > { %v4235_v41 = vpop.f32.mrf.mxu1 }
 0x3b9   : > { %v4236_v63 = vadd.f32 %v4235_v41, %v4234_v47  ;;  %v6103_v41 = vld [vmem:[%s7141_s8 + $0x8] sm:$0xff]  ;;  %v6110_v47 = vld [vmem:[%s7141_s8] sm:$0xff] }
 0x3ba   : > { %7373 = vst [vmem:[#allocation64_spill] sm:$0xff] %v6103_v41  ;;  %4780 = vmatpush3.msra.mxu0 %v6103_v41  ;;  %7374 = vst [vmem:[#allocation65_spill] sm:$0xff] %v6110_v47 }
 0x3bb   : > { %v883_v17 = vadd.f32 %v4236_v63, %v6091_v44  ;;  %4781 = vmatprep.subr.mxu0 %v7370_v18 }
 0x3bc   : > { %4782 = vmatpush3.msra.mxu0 %v6110_v47 }
 0x3bd   : > { %5015 = vtanh.f32 %v883_v17  ;;  %4240 = vmatprep.subr.mxu0 %v5825_v1 }
 0x3ca   : > { %v5016_v35 = vpop.eup %5015 }
 0x3cb   : > { %v6097_v20 = vmul.f32 %v5016_v35, %v6094_v29 }
 0x3cd   : > { %v4088_v32 = vmul.f32 -1.442695, %v6097_v20 }
 0x3cf   : > { %5017 = vpow2.f32 %v4088_v32 }
 0x3dc   : > { %v5018_v25 = vpop.eup %5017 }
 0x3dd   : > { %v892_v26 = vadd.f32 1.0, %v5018_v25 }
 0x3df   : > { %5019 = vrcp.f32 %v892_v26 }
 0x3ec   : > { %v5020_v25 = vpop.eup %5019 }
 0x3ed   : > { %896 = vrot.lane.b32.xlu0 %v5020_v25, %s5532_s30  ;;  %v900_v26 = vmul.f32 2.0, %v5020_v25 }
 0x45f   : > { %v897_v32 = vpop.permute.xlu0 %896 }
 0x460   : > { %v899_v63 = vadd.f32 %v5020_v25, %v897_v32  ;;  %v901_v17 = vmul.f32 %v900_v26, %v897_v32  ;;  %v1051_v25 = vsel %vm616_vm1, %v5873_v21, %v5865_v16 }
 0x462   : > { %v902_v35 = vsub.f32 %v899_v63, %v901_v17 }
 0x464   : > { %v903_v29 = vmul.f32 0.5, %v902_v35  ;;  %v1061_v35 = vrot.slane %v5942_v50, 1 }
 0x466   : > { %4784 = vmatmul.mubr.msk.f32.vlgmr.msra.gmra.mxu0 %vm728_vm8, %v903_v29 }
 0x467   : > { %4241 = vmatpush3.msra.mxu0 %v5827_v2  ;;  %1131 = vmatprep.mubr.f32.mxu0 %v809_v38  ;;  %v1052_v38 = vsel %vm619_vm2, %v5875_v22, %v1051_v25 }
 0x468   : > { %4242 = vmatprep.subr.mxu0 %v5829_v3  ;;  %v1053_v29 = vsel %vm622_vm3, %v5887_v27, %v1052_v38  ;;  %v5533_v38 = vmov 1966171168  }
 0x469   : > { %4243 = vmatpush3.msra.mxu0 %v5832_v4  ;;  %v1054_v26 = vsel %vm625_vm4, %v5901_v33, %v1053_v29  ;;  %v988_v29 = vunpack.c.l.s4 %v5533_v38 }
 0x46a   : > { %4244 = vmatprep.subr.mxu0 %v5835_v5  ;;  %v1055_v32 = vsel %vm628_vm5, %v5915_v39, %v1054_v26  ;;  %v990_v26 = vlaneseq }
 0x46b   : > { %4245 = vmatpush3.msra.mxu0 %v5838_v6  ;;  %v1056_v63 = vsel %vm631_vm6, %v5929_v45, %v1055_v32  ;;  %v989_v32 = vunpack.c.0.s8 %v988_v29 }
 0x46c   : > { %4246 = vmatprep.subr.mxu0 %v5841_v7  ;;  %v1060_v17 = vrot.slane %v1056_v63, 1  ;;  %v991_v63 = vshrl.u32 %v990_v26, 7 }
 0x46d   : > { %4247 = vmatpush3.msra.mxu0 %v5844_v8 }
 0x46e   : > { %4248 = vmatprep.subr.mxu0 %v5847_v9  ;;  %v1062_v25 = vsel %vm1059_vm9, %v1060_v17, %v1061_v35  ;;  %v6171_v17 = vld [vmem:[%s7142_s9] ss:$0 sm:$0xff] }
 0x46f   : > { %4249 = vmatpush3.msra.mxu0 %v5850_v10  ;;  %7375 = vst [vmem:[#allocation66_spill] sm:$0xff] %v6171_v17 }
 0x470   : > { %4250 = vmatprep.subr.mxu0 %v5853_v11 }
 0x471   : > { %4251 = vmatpush3.msra.mxu0 %v5856_v12 }
 0x472   : > { %4252 = vmatprep.subr.mxu0 %v5859_v13 }
 0x473   : > { %4253 = vmatpush3.msra.mxu0 %v5861_v14 }
 0x474   : > { %4254 = vmatprep.subr.mxu0 %v5870_v19 }
 0x475   : > { %4255 = vmatpush3.msra.mxu0 %v5878_v23 }
 0x476   : > { %4256 = vmatprep.subr.mxu0 %v5881_v24 }
 0x477   : > { %4257 = vmatpush3.msra.mxu0 %v5890_v28 }
 0x478   : > { %4258 = vmatprep.subr.mxu0 %v5895_v30 }
 0x479   : > { %4259 = vmatpush3.msra.mxu0 %v5898_v31 }
 0x47a   : > { %4260 = vmatprep.subr.mxu0 %v5904_v34 }
 0x47b   : > { %4261 = vmatpush3.msra.mxu0 %v5909_v36 }
 0x47c   : > { %4262 = vmatprep.subr.mxu0 %v5912_v37 }
 0x47d   : > { %4263 = vmatpush3.msra.mxu0 %v5918_v40 }
 0x47e   : > { %4264 = vmatprep.subr.mxu0 %v5923_v42 }
 0x47f   : > { %4265 = vmatpush3.msra.mxu0 %v5926_v43 }
 0x480   : > { %4266 = vmatprep.subr.mxu0 %v5932_v46 }
 0x481   : > { %4267 = vmatpush3.msra.mxu0 %v5937_v48 }
 0x482   : > { %4268 = vmatprep.subr.mxu0 %v5940_v49 }
 0x483   : > { %4269 = vmatpush3.msra.mxu0 %v5945_v51 }
 0x484   : > { %4270 = vmatprep.subr.mxu0 %v5950_v53 }
 0x485   : > { %4271 = vmatpush3.msra.mxu0 %v5953_v54 }
 0x486   : > { %1132 = vmatmul.mubr.f32.vlgmr.msra.gmra.mxu0 %v1062_v25  ;;  %4793 = vmatprep.subr.mxu0 %v7370_v18 }
 0x487   : > { %4794 = vmatpush3.msra.mxu0 %v6103_v41  ;;  %4797 = vmatprep.mubr.msk.f32.mxu0 %vm5531_vm7, %v7370_v18  ;;  %v6174_v41 = vsub.s32 %v989_v32, %v991_v63 }
 0x488   : > { %4795 = vmatprep.subr.mxu0 %v7370_v18 }
 0x489   : > { %4796 = vmatpush3.msra.mxu0 %v6110_v47 }
 0x48a   : > { %4316 = vmatprep.subr.mxu0 %v5825_v1 }
 0x526   : > { %v973_v35 = vpop.f32.mrf.mxu0 }
 0x527   : > { %v977_v25 = vadd.f32 %v973_v35, %v6097_v20 }
 0x528   : > { %v4785_v47 = vpop.f32.mrf.mxu0 }
 0x529   : > { %v984_v1 = vadd.f32 %v6171_v17, %v977_v25 }
 0x52b   : > { %v986_v38 = vcombine.high %v984_v1, %v984_v1  ;;  %v993_v29 = vrot.slane %v984_v1, %v6174_v41 }
 0x52d   : > { %v1000_v26 = vrot.slane %v986_v38, %v6174_v41  ;;  %v1001_v54 = vcombine.high %v993_v29, %v993_v29  ;;  %v1009_v53 = vrot.slane %v993_v29, %v6174_v41  ;;  %4091 = vst.sshfl [vmem:[%s5821_s1] sm:$0x1 pattern:$0x73625140] %v993_v29 }
 0x52f   : > { %v1002_v20 = vcombine.high %v1000_v26, %v1000_v26  ;;  %v1016_v32 = vrot.slane %v1000_v26, %v6174_v41  ;;  %v1023_v47 = vrot.slane %v1001_v54, %v6174_v41  ;;  %v1031_v63 = vcombine.high %v1009_v53, %v1009_v53  ;;  %4092 = vst.sshfl [vmem:[%s5821_s1 + $0x8] sm:$0x1 pattern:$0x73625140] %v1001_v54 }
 0x530   : > { %4093 = vst.sshfl [vmem:[%s5821_s1 + $0x20] sm:$0x1 pattern:$0x73625140] %v1000_v26 }
 0x531   : > { %v1030_v35 = vrot.slane %v1002_v20, %v6174_v41  ;;  %v1032_v25 = vcombine.high %v1016_v32, %v1016_v32  ;;  %v1033_v17 = vcombine.high %v1023_v47, %v1023_v47  ;;  %1045 = vst [vmem:[%s5821_s1 + $0x10] sm:$0x1] %v1031_v63  ;;  %4094 = vst.sshfl [vmem:[%s5821_s1 + $0x28] sm:$0x1 pattern:$0x73625140] %v1002_v20 }
 0x533   : > { %v1034_v38 = vcombine.high %v1030_v35, %v1030_v35  ;;  %1046 = vst [vmem:[%s5821_s1 + $0x18] sm:$0x1] %v1033_v17  ;;  %1049 = vst [vmem:[%s5821_s1 + $0x30] sm:$0x1] %v1032_v25 }
 0x535   : > { %1050 = vst [vmem:[%s5821_s1 + $0x38] sm:$0x1] %v1034_v38  ;;  %v7380_v38 = vld [vmem:[#allocation44_spill] sm:$0xff] }
 0x546   : > { %v4272_v51 = vpop.f32.mrf.mxu0 }
 0x548   : > { %v4273_v29 = vpop.f32.mrf.mxu0 }
 0x549   : > { %v4274_v49 = vadd.f32 %v4273_v29, %v4272_v51  ;;  %v7381_v29 = vld [vmem:[#allocation45_spill] sm:$0xff] }
 0x54b   : > { %v1134_v48 = vadd.f32 %v4274_v49, %v5960_v57  ;;  %v7379_v49 = vld [vmem:[#allocation43_spill] sm:$0xff] }
 0x54d   : > { %5021 = vtanh.f32 %v1134_v48  ;;  %v7378_v48 = vld [vmem:[#allocation42_spill] sm:$0xff] }
 0x55a   : > { %v5022_v46 = vpop.eup %5021 }
 0x55b   : > { %v1138_v53 = vmul.f32 %v5022_v46, %v5963_v61  ;;  %v7376_v46 = vld [vmem:[#allocation40_spill] sm:$0xff] }
 0x55d   : > { %v4096_v54 = vmul.f32 -1.442695, %v1138_v53 }
 0x55f   : > { %5023 = vpow2.f32 %v4096_v54  ;;  %v7382_v54 = vld [vmem:[#allocation46_spill] sm:$0xff] }
 0x56c   : > { %v5024_v26 = vpop.eup %5023 }
 0x56d   : > { %v1142_v32 = vadd.f32 1.0, %v5024_v26  ;;  %v7383_v26 = vld [vmem:[#allocation47_spill] sm:$0xff] }
 0x56f   : > { %5025 = vrcp.f32 %v1142_v32  ;;  %v7384_v32 = vld [vmem:[#allocation48_spill] sm:$0xff] }
 0x57c   : > { %v5026_v47 = vpop.eup %5025 }
 0x57d   : > { %1146 = vrot.lane.b32.xlu1 %v5026_v47, %s5532_s30  ;;  %v1150_v17 = vmul.f32 2.0, %v5026_v47 }
 0x5ef   : > { %v1147_v20 = vpop.permute.xlu1 %1146 }
 0x5f0   : > { %v1149_v63 = vadd.f32 %v5026_v47, %v1147_v20  ;;  %v1151_v35 = vmul.f32 %v1150_v17, %v1147_v20  ;;  %v7385_v47 = vld [vmem:[#allocation49_spill] sm:$0xff]  ;;  %v7386_v17 = vld [vmem:[#allocation50_spill] sm:$0xff]  ;;  %v7387_v20 = vld [vmem:[#allocation51_spill] sm:$0xff] }
 0x5f2   : > { %v1152_v25 = vsub.f32 %v1149_v63, %v1151_v35  ;;  %v7388_v63 = vld [vmem:[#allocation52_spill] sm:$0xff]  ;;  %v7389_v35 = vld [vmem:[#allocation53_spill] sm:$0xff] }
 0x5f4   : > { %v1153_v51 = vmul.f32 0.5, %v1152_v25  ;;  %v7390_v25 = vld [vmem:[#allocation54_spill] sm:$0xff] }
 0x5f6   : > { %4791 = vmatmul.mubr.msk.f32.vlgmr.msra.gmra.mxu1 %vm728_vm8, %v1153_v51  ;;  %v7391_v51 = vld [vmem:[#allocation55_spill] sm:$0xff] }
 0x5f7   : > { %1293 = vmatprep.mubr.f32.mxu1 %v984_v1  ;;  %4279 = vmatpush3.msra.mxu1 %v5986_v52  ;;  %v7377_v1 = vld [vmem:[#allocation41_spill] sm:$0xff] }
 0x5f8   : > { %4280 = vmatprep.subr.mxu1 %v5988_v55 }
 0x5f9   : > { %4281 = vmatpush3.msra.mxu1 %v5991_v56 }
 0x5fa   : > { %4282 = vmatprep.subr.mxu1 %v5994_v58 }
 0x5fb   : > { %4283 = vmatpush3.msra.mxu1 %v5997_v59 }
 0x5fc   : > { %4284 = vmatprep.subr.mxu1 %v6000_v60 }
 0x5fd   : > { %4285 = vmatpush3.msra.mxu1 %v6003_v62 }
 0x5fe   : > { %4286 = vmatprep.subr.mxu1 %v6006_v0 }
 0x5ff   : > { %4287 = vmatpush3.msra.mxu1 %v6009_v15 }
 0x600   : > { %4288 = vmatprep.subr.mxu1 %v7376_v46 }
 0x601   : > { %4289 = vmatpush3.msra.mxu1 %v7377_v1 }
 0x602   : > { %4290 = vmatprep.subr.mxu1 %v7378_v48 }
 0x603   : > { %4291 = vmatpush3.msra.mxu1 %v7379_v49 }
 0x604   : > { %4292 = vmatprep.subr.mxu1 %v7380_v38 }
 0x605   : > { %4293 = vmatpush3.msra.mxu1 %v7381_v29  ;;  %v7392_v29 = vld [vmem:[#allocation56_spill] sm:$0xff] }
 0x606   : > { %4294 = vmatprep.subr.mxu1 %v7382_v54  ;;  %v7393_v54 = vld [vmem:[#allocation57_spill] sm:$0xff] }
 0x607   : > { %4295 = vmatpush3.msra.mxu1 %v7383_v26  ;;  %v7394_v26 = vld [vmem:[#allocation58_spill] sm:$0xff] }
 0x608   : > { %4296 = vmatprep.subr.mxu1 %v7384_v32  ;;  %v7395_v32 = vld [vmem:[#allocation59_spill] sm:$0xff] }
 0x609   : > { %4297 = vmatpush3.msra.mxu1 %v7385_v47  ;;  %v7396_v47 = vld [vmem:[#allocation60_spill] sm:$0xff] }
 0x60a   : > { %4298 = vmatprep.subr.mxu1 %v7386_v17  ;;  %v7397_v17 = vld [vmem:[#allocation61_spill] sm:$0xff] }
 0x60b   : > { %4299 = vmatpush3.msra.mxu1 %v7387_v20 }
 0x60c   : > { %4300 = vmatprep.subr.mxu1 %v7388_v63 }
 0x60d   : > { %4301 = vmatpush3.msra.mxu1 %v7389_v35 }
 0x60e   : > { %4302 = vmatprep.subr.mxu1 %v7390_v25  ;;  %v7398_v25 = vld [vmem:[#allocation62_spill] sm:$0xff] }
 0x60f   : > { %4303 = vmatpush3.msra.mxu1 %v7391_v51  ;;  %v7399_v51 = vld [vmem:[#allocation37_spill] sm:$0xff] }
 0x610   : > { %4304 = vmatprep.subr.mxu1 %v7392_v29 }
 0x611   : > { %4305 = vmatpush3.msra.mxu1 %v7393_v54 }
 0x612   : > { %4306 = vmatprep.subr.mxu1 %v7394_v26 }
 0x613   : > { %4307 = vmatpush3.msra.mxu1 %v7395_v32  ;;  %v7400_v32 = vld [vmem:[#allocation38_spill] sm:$0xff] }
 0x614   : > { %4308 = vmatprep.subr.mxu1 %v7396_v47  ;;  %v7401_v47 = vld [vmem:[#allocation39_spill] sm:$0xff] }
 0x615   : > { %4309 = vmatpush3.msra.mxu1 %v7397_v17 }
 0x616   : > { %4800 = vmatprep.subr.mxu1 %v7370_v18 }
 0x6b6   : > { %v1223_v63 = vpop.f32.mrf.mxu1 }
 0x6b7   : > { %v1227_v35 = vadd.f32 %v1223_v63, %v1138_v53  ;;  %v7402_v63 = vld [vmem:[#allocation63_spill] sm:$0xff] }
 0x6b8   : > { %v4792_v20 = vpop.f32.mrf.mxu1 }
 0x6b9   : > { %v1228_v38 = vadd.f32 %v7398_v25, %v1227_v35 }
 0x6bb   : > { %1294 = vmatmul.mubr.f32.vlgmr.msra.gmra.mxu1 %v1228_v38 }
 0x6bc   : > { %4801 = vmatpush3.msra.mxu1 %v7399_v51  ;;  %4804 = vmatprep.mubr.msk.f32.mxu1 %vm5531_vm7, %v7370_v18 }
 0x6bd   : > { %4802 = vmatprep.subr.mxu1 %v7370_v18 }
 0x6be   : > { %4803 = vmatpush3.msra.mxu1 %v7400_v32 }
 0x6bf   : > { %4354 = vmatprep.subr.mxu1 %v7401_v47 }
 0x77b   : > { %v4310_v17 = vpop.f32.mrf.mxu1 }
 0x77d   : > { %v4311_v26 = vpop.f32.mrf.mxu1 }
 0x77e   : > { %v4312_v54 = vadd.f32 %v4311_v26, %v4310_v17 }
 0x780   : > { %v1296_v53 = vadd.f32 %v4312_v54, %v6091_v44 }
 0x782   : > { %5027 = vtanh.f32 %v1296_v53 }
 0x78f   : > { %v5028_v20 = vpop.eup %5027 }
 0x790   : > { %v6236_v35 = vmul.f32 %v5028_v20, %v7402_v63 }
 0x792   : > { %v4098_v51 = vmul.f32 -1.442695, %v6236_v35 }
 0x794   : > { %5029 = vpow2.f32 %v4098_v51 }
 0x7a1   : > { %v5030_v25 = vpop.eup %5029 }
 0x7a2   : > { %v1304_v29 = vadd.f32 1.0, %v5030_v25 }
 0x7a4   : > { %5031 = vrcp.f32 %v1304_v29 }
 0x7b1   : > { %v5032_v49 = vpop.eup %5031 }
 0x7b2   : > { %1308 = vrot.lane.b32.xlu1 %v5032_v49, %s5532_s30  ;;  %v1312_v47 = vmul.f32 2.0, %v5032_v49 }
 0x824   : > { %v1309_v32 = vpop.permute.xlu1 %1308 }
 0x825   : > { %v1311_v48 = vadd.f32 %v5032_v49, %v1309_v32  ;;  %v1313_v26 = vmul.f32 %v1312_v47, %v1309_v32 }
 0x827   : > { %v1314_v17 = vsub.f32 %v1311_v48, %v1313_v26 }
 0x829   : > { %v1315_v54 = vmul.f32 0.5, %v1314_v17 }
 0x82b   : > { %4798 = vmatmul.mubr.msk.f32.vlgmr.msra.gmra.mxu0 %vm728_vm8, %v1315_v54 }
 0x82c   : > { %4317 = vmatpush3.msra.mxu0 %v5827_v2  ;;  %1537 = vmatprep.mubr.f32.mxu0 %v1228_v38  ;;  %v1457_v2 = vsel %vm619_vm2, %v5873_v21, %v5865_v16  ;;  %v7407_v16 = vld [vmem:[#allocation35_spill] sm:$0xff] }
 0x82d   : > { %4318 = vmatprep.subr.mxu0 %v5829_v3  ;;  %v1458_v3 = vsel %vm622_vm3, %v5875_v22, %v1457_v2 }
 0x82e   : > { %4319 = vmatpush3.msra.mxu0 %v5832_v4  ;;  %v1459_v4 = vsel %vm625_vm4, %v5887_v27, %v1458_v3 }
 0x82f   : > { %4320 = vmatprep.subr.mxu0 %v5835_v5  ;;  %v1460_v5 = vsel %vm628_vm5, %v5901_v33, %v1459_v4 }
 0x830   : > { %4321 = vmatpush3.msra.mxu0 %v5838_v6  ;;  %v1461_v6 = vsel %vm631_vm6, %v5915_v39, %v1460_v5 }
 0x831   : > { %4322 = vmatprep.subr.mxu0 %v5841_v7  ;;  %v1462_v7 = vsel %vm613_vm0, %v5942_v50, %v5929_v45 }
 0x832   : > { %4323 = vmatpush3.msra.mxu0 %v5844_v8  ;;  %v1466_v8 = vrot.slane %v1461_v6, 2 }
 0x833   : > { %4324 = vmatprep.subr.mxu0 %v5847_v9  ;;  %v1467_v9 = vrot.slane %v1462_v7, 2 }
 0x834   : > { %4325 = vmatpush3.msra.mxu0 %v5850_v10  ;;  %v7403_v10 = vld [vmem:[#allocation30_spill] sm:$0xff] }
 0x835   : > { %4326 = vmatprep.subr.mxu0 %v5853_v11  ;;  %v7404_v11 = vld [vmem:[#allocation31_spill] sm:$0xff] }
 0x836   : > { %4327 = vmatpush3.msra.mxu0 %v5856_v12  ;;  %v7405_v12 = vld [vmem:[#allocation32_spill] sm:$0xff] }
 0x837   : > { %4328 = vmatprep.subr.mxu0 %v5859_v13  ;;  %v7406_v13 = vld [vmem:[#allocation34_spill] sm:$0xff] }
 0x838   : > { %4329 = vmatpush3.msra.mxu0 %v5861_v14  ;;  %v1468_v14 = vsel %vm1465_vm10, %v1466_v8, %v1467_v9 }
 0x839   : > { %4330 = vmatprep.subr.mxu0 %v5870_v19  ;;  %v7408_v19 = vld [vmem:[#allocation36_spill] sm:$0xff] }
 0x83a   : > { %4331 = vmatpush3.msra.mxu0 %v5878_v23  ;;  %v7409_v23 = vld [vmem:[#allocation64_spill] sm:$0xff] }
 0x83b   : > { %4332 = vmatprep.subr.mxu0 %v5881_v24  ;;  %v7410_v24 = vld [vmem:[#allocation65_spill] sm:$0xff] }
 0x83c   : > { %4333 = vmatpush3.msra.mxu0 %v5890_v28  ;;  %v7411_v28 = vld [vmem:[#allocation25_spill] sm:$0xff] }
 0x83d   : > { %4334 = vmatprep.subr.mxu0 %v5895_v30 }
 0x83e   : > { %4335 = vmatpush3.msra.mxu0 %v5898_v31 }
 0x83f   : > { %4336 = vmatprep.subr.mxu0 %v5904_v34 }
 0x840   : > { %4337 = vmatpush3.msra.mxu0 %v5909_v36  ;;  %v7412_v36 = vld [vmem:[#allocation66_spill] sm:$0xff] }
 0x841   : > { %4338 = vmatprep.subr.mxu0 %v5912_v37 }
 0x842   : > { %4339 = vmatpush3.msra.mxu0 %v5918_v40 }
 0x843   : > { %4340 = vmatprep.subr.mxu0 %v5923_v42 }
 0x844   : > { %4341 = vmatpush3.msra.mxu0 %v5926_v43 }
 0x845   : > { %4342 = vmatprep.subr.mxu0 %v7403_v10 }
 0x846   : > { %4343 = vmatpush3.msra.mxu0 %v7404_v11 }
 0x847   : > { %4344 = vmatprep.subr.mxu0 %v7405_v12 }
 0x848   : > { %4345 = vmatpush3.msra.mxu0 %v7406_v13 }
 0x849   : > { %4346 = vmatprep.subr.mxu0 %v7407_v16  ;;  %v7426_v16 = vld [vmem:[#allocation55_spill] sm:$0xff] }
 0x84a   : > { %4347 = vmatpush3.msra.mxu0 %v7408_v19  ;;  %v7427_v19 = vld [vmem:[#allocation56_spill] sm:$0xff] }
 0x84b   : > { %1538 = vmatmul.mubr.f32.vlgmr.msra.gmra.mxu0 %v1468_v14  ;;  %4807 = vmatprep.subr.mxu0 %v7370_v18  ;;  %v7425_v14 = vld [vmem:[#allocation54_spill] sm:$0xff] }
 0x84c   : > { %4808 = vmatpush3.msra.mxu0 %v7409_v23  ;;  %4811 = vmatprep.mubr.msk.f32.mxu0 %vm5531_vm7, %v7370_v18 }
 0x84d   : > { %4809 = vmatprep.subr.mxu0 %v7370_v18 }
 0x84e   : > { %4810 = vmatpush3.msra.mxu0 %v7410_v24 }
 0x84f   : > { %4392 = vmatprep.subr.mxu0 %v7411_v28  ;;  %v7428_v28 = vld [vmem:[#allocation57_spill] sm:$0xff] }
 0x8eb   : > { %v1385_v30 = vpop.f32.mrf.mxu0 }
 0x8ec   : > { %v1389_v31 = vadd.f32 %v1385_v30, %v6236_v35  ;;  %v7429_v30 = vld [vmem:[#allocation58_spill] sm:$0xff] }
 0x8ed   : > { %v4799_v34 = vpop.f32.mrf.mxu0 }
 0x8ee   : > { %v1390_v37 = vadd.f32 %v7412_v36, %v1389_v31  ;;  %v7430_v31 = vld [vmem:[#allocation59_spill] sm:$0xff]  ;;  %v7431_v34 = vld [vmem:[#allocation60_spill] sm:$0xff] }
 0x8f0   : > { %v1392_v40 = vcombine.high %v1390_v37, %v1390_v37  ;;  %v1399_v42 = vrot.slane %v1390_v37, %v6174_v41 }
 0x8f2   : > { %v1406_v43 = vrot.slane %v1392_v40, %v6174_v41  ;;  %v1407_v48 = vcombine.high %v1399_v42, %v1399_v42  ;;  %v1415_v49 = vrot.slane %v1399_v42, %v6174_v41  ;;  %4100 = vst.sshfl [vmem:[%s5821_s1 + $0x1] sm:$0x1 pattern:$0x73625140] %v1399_v42 }
 0x8f4   : > { %v1408_v38 = vcombine.high %v1406_v43, %v1406_v43  ;;  %v1422_v29 = vrot.slane %v1406_v43, %v6174_v41  ;;  %v1429_v32 = vrot.slane %v1407_v48, %v6174_v41  ;;  %v1437_v47 = vcombine.high %v1415_v49, %v1415_v49  ;;  %4101 = vst.sshfl [vmem:[%s5821_s1 + $0x9] sm:$0x1 pattern:$0x73625140] %v1407_v48  ;;  %v7433_v48 = vld [vmem:[#allocation62_spill] sm:$0xff] }
 0x8f5   : > { %4102 = vst.sshfl [vmem:[%s5821_s1 + $0x21] sm:$0x1 pattern:$0x73625140] %v1406_v43 }
 0x8f6   : > { %v1436_v25 = vrot.slane %v1408_v38, %v6174_v41  ;;  %v1438_v51 = vcombine.high %v1422_v29, %v1422_v29  ;;  %v1439_v53 = vcombine.high %v1429_v32, %v1429_v32  ;;  %1451 = vst [vmem:[%s5821_s1 + $0x11] sm:$0x1] %v1437_v47  ;;  %4103 = vst.sshfl [vmem:[%s5821_s1 + $0x29] sm:$0x1 pattern:$0x73625140] %v1408_v38 }
 0x8f7   : > { %v7434_v38 = vld [vmem:[#allocation37_spill] sm:$0xff]  ;;  %v7435_v29 = vld [vmem:[#allocation38_spill] sm:$0xff]  ;;  %v7436_v32 = vld [vmem:[#allocation39_spill] sm:$0xff] }
 0x8f8   : > { %v1440_v20 = vcombine.high %v1436_v25, %v1436_v25  ;;  %1452 = vst [vmem:[%s5821_s1 + $0x19] sm:$0x1] %v1439_v53  ;;  %1455 = vst [vmem:[%s5821_s1 + $0x31] sm:$0x1] %v1438_v51 }
 0x8fa   : > { %1456 = vst [vmem:[%s5821_s1 + $0x39] sm:$0x1] %v1440_v20 }
 0x90b   : > { %v4348_v35 = vpop.f32.mrf.mxu0 }
 0x90d   : > { %v4349_v26 = vpop.f32.mrf.mxu0 }
 0x90e   : > { %v4350_v17 = vadd.f32 %v4349_v26, %v4348_v35 }
 0x910   : > { %v1540_v54 = vadd.f32 %v4350_v17, %v5960_v57  ;;  %v7413_v57 = vld [vmem:[#allocation42_spill] sm:$0xff] }
 0x912   : > { %5033 = vtanh.f32 %v1540_v54 }
 0x91f   : > { %v5034_v2 = vpop.eup %5033 }
 0x920   : > { %v1544_v3 = vmul.f32 %v5034_v2, %v5963_v61 }
 0x922   : > { %v4105_v4 = vmul.f32 -1.442695, %v1544_v3 }
 0x924   : > { %5035 = vpow2.f32 %v4105_v4 }
 0x931   : > { %v5036_v5 = vpop.eup %5035 }
 0x932   : > { %v1548_v6 = vadd.f32 1.0, %v5036_v5 }
 0x934   : > { %5037 = vrcp.f32 %v1548_v6 }
 0x941   : > { %v5038_v7 = vpop.eup %5037 }
 0x942   : > { %1552 = vrot.lane.b32.xlu0 %v5038_v7, %s5532_s30  ;;  %v1556_v8 = vmul.f32 2.0, %v5038_v7 }
 0x9b4   : > { %v1553_v9 = vpop.permute.xlu0 %1552 }
 0x9b5   : > { %v1555_v10 = vadd.f32 %v5038_v7, %v1553_v9  ;;  %v1557_v11 = vmul.f32 %v1556_v8, %v1553_v9  ;;  %v6359_v9 = vld [vmem:[#allocation7 + $0x78] sm:$0xff] }
 0x9b7   : > { %v1558_v12 = vsub.f32 %v1555_v10, %v1557_v11  ;;  %v6362_v10 = vld [vmem:[#allocation7 + $0xf0] sm:$0xff] }
 0x9b8   : > { %v6365_v11 = vld [vmem:[#allocation7 + $0x70] sm:$0xff] }
 0x9b9   : > { %v1559_v13 = vmul.f32 0.5, %v1558_v12  ;;  %v6368_v12 = vld [vmem:[#allocation7 + $0xe8] sm:$0xff] }
 0x9bb   : > { %4805 = vmatmul.mubr.msk.f32.vlgmr.msra.gmra.mxu1 %vm728_vm8, %v1559_v13  ;;  %v6371_v13 = vld [vmem:[#allocation7 + $0x68] sm:$0xff] }
 0x9bc   : > { %1699 = vmatprep.mubr.f32.mxu1 %v1390_v37  ;;  %4355 = vmatpush3.msra.mxu1 %v5986_v52  ;;  %v7414_v52 = vld [vmem:[#allocation43_spill] sm:$0xff]  ;;  %v7432_v37 = vld [vmem:[#allocation61_spill] sm:$0xff] }
 0x9bd   : > { %4356 = vmatprep.subr.mxu1 %v5988_v55  ;;  %v7415_v55 = vld [vmem:[#allocation44_spill] sm:$0xff] }
 0x9be   : > { %4357 = vmatpush3.msra.mxu1 %v5991_v56  ;;  %v7416_v56 = vld [vmem:[#allocation45_spill] sm:$0xff] }
 0x9bf   : > { %4358 = vmatprep.subr.mxu1 %v5994_v58  ;;  %v7417_v58 = vld [vmem:[#allocation46_spill] sm:$0xff] }
 0x9c0   : > { %4359 = vmatpush3.msra.mxu1 %v5997_v59  ;;  %v7418_v59 = vld [vmem:[#allocation47_spill] sm:$0xff] }
 0x9c1   : > { %4360 = vmatprep.subr.mxu1 %v6000_v60  ;;  %v7419_v60 = vld [vmem:[#allocation48_spill] sm:$0xff] }
 0x9c2   : > { %4361 = vmatpush3.msra.mxu1 %v6003_v62  ;;  %v7420_v62 = vld [vmem:[#allocation49_spill] sm:$0xff] }
 0x9c3   : > { %4362 = vmatprep.subr.mxu1 %v6006_v0  ;;  %v7421_v0 = vld [vmem:[#allocation50_spill] sm:$0xff] }
 0x9c4   : > { %4363 = vmatpush3.msra.mxu1 %v6009_v15  ;;  %v7422_v15 = vld [vmem:[#allocation51_spill] sm:$0xff] }
 0x9c5   : > { %4364 = vmatprep.subr.mxu1 %v7376_v46  ;;  %v7423_v46 = vld [vmem:[#allocation52_spill] sm:$0xff] }
 0x9c6   : > { %4365 = vmatpush3.msra.mxu1 %v7377_v1  ;;  %v7424_v1 = vld [vmem:[#allocation53_spill] sm:$0xff] }
 0x9c7   : > { %4366 = vmatprep.subr.mxu1 %v7413_v57  ;;  %v6374_v57 = vld [vmem:[#allocation7 + $0xe0] sm:$0xff] }
 0x9c8   : > { %4367 = vmatpush3.msra.mxu1 %v7414_v52  ;;  %v6377_v52 = vld [vmem:[#allocation7 + $0x60] sm:$0xff] }
 0x9c9   : > { %4368 = vmatprep.subr.mxu1 %v7415_v55  ;;  %v6380_v55 = vld [vmem:[#allocation7 + $0xd8] sm:$0xff] }
 0x9ca   : > { %4369 = vmatpush3.msra.mxu1 %v7416_v56  ;;  %v6383_v56 = vld [vmem:[#allocation7 + $0x58] sm:$0xff] }
 0x9cb   : > { %4370 = vmatprep.subr.mxu1 %v7417_v58  ;;  %v6386_v58 = vld [vmem:[#allocation7 + $0xd0] sm:$0xff] }
 0x9cc   : > { %4371 = vmatpush3.msra.mxu1 %v7418_v59  ;;  %v6389_v59 = vld [vmem:[#allocation7 + $0x50] sm:$0xff] }
 0x9cd   : > { %4372 = vmatprep.subr.mxu1 %v7419_v60  ;;  %v6392_v60 = vld [vmem:[#allocation7 + $0xc8] sm:$0xff] }
 0x9ce   : > { %4373 = vmatpush3.msra.mxu1 %v7420_v62 }
 0x9cf   : > { %4374 = vmatprep.subr.mxu1 %v7421_v0 }
 0x9d0   : > { %4375 = vmatpush3.msra.mxu1 %v7422_v15 }
 0x9d1   : > { %4376 = vmatprep.subr.mxu1 %v7423_v46 }
 0x9d2   : > { %4377 = vmatpush3.msra.mxu1 %v7424_v1 }
 0x9d3   : > { %4378 = vmatprep.subr.mxu1 %v7425_v14 }
 0x9d4   : > { %4379 = vmatpush3.msra.mxu1 %v7426_v16 }
 0x9d5   : > { %4380 = vmatprep.subr.mxu1 %v7427_v19 }
 0x9d6   : > { %4381 = vmatpush3.msra.mxu1 %v7428_v28 }
 0x9d7   : > { %4382 = vmatprep.subr.mxu1 %v7429_v30 }
 0x9d8   : > { %4383 = vmatpush3.msra.mxu1 %v7430_v31 }
 0x9d9   : > { %4384 = vmatprep.subr.mxu1 %v7431_v34 }
 0x9da   : > { %4385 = vmatpush3.msra.mxu1 %v7432_v37 }
 0x9db   : > { %4814 = vmatprep.subr.mxu1 %v7370_v18 }
 0xa7b   : > { %v1629_v40 = vpop.f32.mrf.mxu1 }
 0xa7c   : > { %v1633_v42 = vadd.f32 %v1629_v40, %v1544_v3  ;;  %v6395_v40 = vld [vmem:[#allocation7 + $0x48] sm:$0xff] }
 0xa7d   : > { %v4806_v43 = vpop.f32.mrf.mxu1 }
 0xa7e   : > { %v1634_v49 = vadd.f32 %v7433_v48, %v1633_v42  ;;  %v6399_v42 = vld [vmem:[%s5803_s23] sm:$0xff] }
 0xa7f   : > { %7437 = vst [vmem:[#allocation40_spill] sm:$0xff] %v6399_v42  ;;  %v1863_v43 = vsel %vm622_vm3, %v5873_v21, %v6399_v42 }
 0xa80   : > { %1700 = vmatmul.mubr.f32.vlgmr.msra.gmra.mxu1 %v1634_v49 }
 0xa81   : > { %4815 = vmatpush3.msra.mxu1 %v7434_v38  ;;  %4818 = vmatprep.mubr.msk.f32.mxu1 %vm5531_vm7, %v7370_v18  ;;  %v6407_v38 = vld [vmem:[#allocation7 + $0x40] sm:$0xff] }
 0xa82   : > { %4816 = vmatprep.subr.mxu1 %v7370_v18 }
 0xa83   : > { %4817 = vmatpush3.msra.mxu1 %v7435_v29  ;;  %v6410_v29 = vld [vmem:[#allocation7 + $0xb8] sm:$0xff] }
 0xa84   : > { %4430 = vmatprep.subr.mxu1 %v7436_v32  ;;  %v1864_v32 = vsel %vm625_vm4, %v5875_v22, %v1863_v43  ;;  %v6451_v43 = vld [vmem:[#allocation7 + $0x90] sm:$0xff] }
 0xa85   : > { %7444 = vst [vmem:[#allocation35_spill] sm:$0xff] %v6451_v43 }
 0xb40   : > { %v4386_v47 = vpop.f32.mrf.mxu1 }
 0xb42   : > { %v4387_v25 = vpop.f32.mrf.mxu1 }
 0xb43   : > { %v4388_v51 = vadd.f32 %v4387_v25, %v4386_v47  ;;  %v6415_v47 = vld [vmem:[#allocation7 + $0x38] sm:$0xff]  ;;  %v6418_v25 = vld [vmem:[#allocation7 + $0xb0] sm:$0xff] }
 0xb45   : > { %v1702_v53 = vadd.f32 %v4388_v51, %v6091_v44  ;;  %v6421_v51 = vld [vmem:[#allocation7 + $0x30] sm:$0xff] }
 0xb47   : > { %5039 = vtanh.f32 %v1702_v53  ;;  %v1865_v53 = vsel %vm628_vm5, %v5887_v27, %v1864_v32  ;;  %v6454_v32 = vld [vmem:[#allocation7 + $0x10] sm:$0xff] }
 0xb48   : > { %7445 = vst [vmem:[#allocation36_spill] sm:$0xff] %v6454_v32 }
 0xb54   : > { %v5040_v20 = vpop.eup %5039 }
 0xb55   : > { %v6354_v35 = vmul.f32 %v5040_v20, %v7402_v63  ;;  %v1867_v20 = vsel %vm613_vm0, %v5929_v45, %v5915_v39 }
 0xb57   : > { %v4107_v26 = vmul.f32 -1.442695, %v6354_v35 }
 0xb59   : > { %5041 = vpow2.f32 %v4107_v26  ;;  %v6429_v26 = vld [vmem:[#allocation7 + $0xa8] sm:$0xff] }
 0xb5a   : > { %7438 = vst [vmem:[#allocation41_spill] sm:$0xff] %v6429_v26 }
 0xb66   : > { %v5042_v17 = vpop.eup %5041 }
 0xb67   : > { %v1710_v54 = vadd.f32 1.0, %v5042_v17  ;;  %v6432_v17 = vld [vmem:[#allocation7 + $0x28] sm:$0xff] }
 0xb68   : > { %7439 = vst [vmem:[#allocation63_spill] sm:$0xff] %v6432_v17 }
 0xb69   : > { %5043 = vrcp.f32 %v1710_v54  ;;  %v6435_v54 = vld [vmem:[#allocation7 + $0xa0] sm:$0xff] }
 0xb6a   : > { %7440 = vst [vmem:[#allocation30_spill] sm:$0xff] %v6435_v54 }
 0xb76   : > { %v5044_v2 = vpop.eup %5043 }
 0xb77   : > { %1714 = vrot.lane.b32.xlu1 %v5044_v2, %s5532_s30  ;;  %v1718_v3 = vmul.f32 2.0, %v5044_v2 }
 0xbe9   : > { %v1715_v4 = vpop.permute.xlu1 %1714 }
 0xbea   : > { %v1717_v5 = vadd.f32 %v5044_v2, %v1715_v4  ;;  %v1719_v6 = vmul.f32 %v1718_v3, %v1715_v4  ;;  %v1866_v2 = vsel %vm631_vm6, %v5901_v33, %v1865_v53  ;;  %v1868_v3 = vsel %vm616_vm1, %v5942_v50, %v1867_v20  ;;  %v6442_v4 = vld [vmem:[#allocation7 + $0x20] sm:$0xff]  ;;  %v6457_v53 = vld [vmem:[#allocation7 + $0x88] sm:$0xff] }
 0xbeb   : > { %7441 = vst [vmem:[#allocation31_spill] sm:$0xff] %v6442_v4  ;;  %7446 = vst [vmem:[#allocation64_spill] sm:$0xff] %v6457_v53  ;;  %v6460_v20 = vld [vmem:[#allocation7 + $0x8] sm:$0xff]  ;;  %v6494_v50 = vld [vmem:[#allocation9] ss:$0 sm:$0xff] }
 0xbec   : > { %v1720_v7 = vsub.f32 %v1717_v5, %v1719_v6  ;;  %v6445_v5 = vld [vmem:[#allocation7 + $0x98] sm:$0xff]  ;;  %7447 = vst [vmem:[#allocation65_spill] sm:$0xff] %v6460_v20 }
 0xbed   : > { %7442 = vst [vmem:[#allocation32_spill] sm:$0xff] %v6445_v5  ;;  %v6448_v6 = vld [vmem:[#allocation7 + $0x18] sm:$0xff] }
 0xbee   : > { %v1721_v8 = vmul.f32 0.5, %v1720_v7  ;;  %7443 = vst [vmem:[#allocation34_spill] sm:$0xff] %v6448_v6  ;;  %v1872_v7 = vrot.slane %v1866_v2, 3  ;;  %v6463_v2 = vld [vmem:[#allocation7 + $0x80] sm:$0xff] }
 0xbef   : > { %7448 = vst [vmem:[#allocation25_spill] sm:$0xff] %v6463_v2 }
 0xbf0   : > { %4812 = vmatmul.mubr.msk.f32.vlgmr.msra.gmra.mxu0 %vm728_vm8, %v1721_v8  ;;  %v1873_v8 = vrot.slane %v1868_v3, 3  ;;  %v6466_v3 = vld [vmem:[#allocation7] sm:$0xff] }
 0xbf1   : > { %4393 = vmatpush3.msra.mxu0 %v6359_v9  ;;  %1943 = vmatprep.mubr.f32.mxu0 %v1634_v49  ;;  %v6404_v49 = vld [vmem:[#allocation7 + $0xc0] sm:$0xff]  ;;  %7449 = vst [vmem:[#allocation42_spill] sm:$0xff] %v6466_v3 }
 0xbf2   : > { %4394 = vmatprep.subr.mxu0 %v6362_v10 }
 0xbf3   : > { %4395 = vmatpush3.msra.mxu0 %v6365_v11 }
 0xbf4   : > { %4396 = vmatprep.subr.mxu0 %v6368_v12 }
 0xbf5   : > { %4397 = vmatpush3.msra.mxu0 %v6371_v13 }
 0xbf6   : > { %4398 = vmatprep.subr.mxu0 %v6374_v57 }
 0xbf7   : > { %4399 = vmatpush3.msra.mxu0 %v6377_v52 }
 0xbf8   : > { %4400 = vmatprep.subr.mxu0 %v6380_v55 }
 0xbf9   : > { %4401 = vmatpush3.msra.mxu0 %v6383_v56 }
 0xbfa   : > { %4402 = vmatprep.subr.mxu0 %v6386_v58 }
 0xbfb   : > { %4403 = vmatpush3.msra.mxu0 %v6389_v59 }
 0xbfc   : > { %4404 = vmatprep.subr.mxu0 %v6392_v60 }
 0xbfd   : > { %4405 = vmatpush3.msra.mxu0 %v6395_v40 }
 0xbfe   : > { %4406 = vmatprep.subr.mxu0 %v6404_v49 }
 0xbff   : > { %4407 = vmatpush3.msra.mxu0 %v6407_v38 }
 0xc00   : > { %4408 = vmatprep.subr.mxu0 %v6410_v29 }
 0xc01   : > { %4409 = vmatpush3.msra.mxu0 %v6415_v47 }
 0xc02   : > { %4410 = vmatprep.subr.mxu0 %v6418_v25 }
 0xc03   : > { %4411 = vmatpush3.msra.mxu0 %v6421_v51 }
 0xc04   : > { %4412 = vmatprep.subr.mxu0 %v6429_v26 }
 0xc05   : > { %4413 = vmatpush3.msra.mxu0 %v6432_v17 }
 0xc06   : > { %4414 = vmatprep.subr.mxu0 %v6435_v54 }
 0xc07   : > { %4415 = vmatpush3.msra.mxu0 %v6442_v4 }
 0xc08   : > { %4416 = vmatprep.subr.mxu0 %v6445_v5 }
 0xc09   : > { %4417 = vmatpush3.msra.mxu0 %v6448_v6  ;;  %v1874_v6 = vsel %vm1871_vm11, %v1872_v7, %v1873_v8  ;;  %v6475_v7 = vld [vmem:[#allocation7 + $0xf8] sm:$0xff] }
 0xc0a   : > { %4418 = vmatprep.subr.mxu0 %v6451_v43  ;;  %7450 = vst [vmem:[#allocation43_spill] sm:$0xff] %v6475_v7 }
 0xc0b   : > { %4419 = vmatpush3.msra.mxu0 %v6454_v32 }
 0xc0c   : > { %4420 = vmatprep.subr.mxu0 %v6457_v53 }
 0xc0d   : > { %4421 = vmatpush3.msra.mxu0 %v6460_v20 }
 0xc0e   : > { %4422 = vmatprep.subr.mxu0 %v6463_v2 }
 0xc0f   : > { %4423 = vmatpush3.msra.mxu0 %v6466_v3 }
 0xc10   : > { %1944 = vmatmul.mubr.f32.vlgmr.msra.gmra.mxu0 %v1874_v6  ;;  %4821 = vmatprep.subr.mxu0 %v7370_v18 }
 0xc11   : > { %4822 = vmatpush3.msra.mxu0 %v7409_v23  ;;  %4825 = vmatprep.mubr.msk.f32.mxu0 %vm5531_vm7, %v7370_v18 }
 0xc12   : > { %4823 = vmatprep.subr.mxu0 %v7370_v18 }
 0xc13   : > { %4824 = vmatpush3.msra.mxu0 %v7410_v24 }
 0xc14   : > { %4468 = vmatprep.subr.mxu0 %v6475_v7 }
 0xcb0   : > { %v1791_v8 = vpop.f32.mrf.mxu0 }
 0xcb1   : > { %v1795_v6 = vadd.f32 %v1791_v8, %v6354_v35 }
 0xcb2   : > { %v4813_v3 = vpop.f32.mrf.mxu0 }
 0xcb3   : > { %v1796_v2 = vadd.f32 %v7412_v36, %v1795_v6 }
 0xcb5   : > { %v1798_v23 = vcombine.high %v1796_v2, %v1796_v2  ;;  %v1805_v20 = vrot.slane %v1796_v2, %v6174_v41 }
 0xcb7   : > { %v1812_v53 = vrot.slane %v1798_v23, %v6174_v41  ;;  %v1813_v24 = vcombine.high %v1805_v20, %v1805_v20  ;;  %v1821_v32 = vrot.slane %v1805_v20, %v6174_v41  ;;  %4109 = vst.sshfl [vmem:[%s5821_s1 + $0x2] sm:$0x1 pattern:$0x73625140] %v1805_v20 }
 0xcb9   : > { %v1814_v7 = vcombine.high %v1812_v53, %v1812_v53  ;;  %v1828_v35 = vrot.slane %v1812_v53, %v6174_v41  ;;  %v1835_v3 = vrot.slane %v1813_v24, %v6174_v41  ;;  %v1843_v8 = vcombine.high %v1821_v32, %v1821_v32  ;;  %4110 = vst.sshfl [vmem:[%s5821_s1 + $0xa] sm:$0x1 pattern:$0x73625140] %v1813_v24 }
 0xcba   : > { %4111 = vst.sshfl [vmem:[%s5821_s1 + $0x22] sm:$0x1 pattern:$0x73625140] %v1812_v53 }
 0xcbb   : > { %v1842_v6 = vrot.slane %v1814_v7, %v6174_v41  ;;  %v1844_v36 = vcombine.high %v1828_v35, %v1828_v35  ;;  %v1845_v43 = vcombine.high %v1835_v3, %v1835_v3  ;;  %1857 = vst [vmem:[%s5821_s1 + $0x12] sm:$0x1] %v1843_v8  ;;  %4112 = vst.sshfl [vmem:[%s5821_s1 + $0x2a] sm:$0x1 pattern:$0x73625140] %v1814_v7 }
 0xcbd   : > { %v1846_v23 = vcombine.high %v1842_v6, %v1842_v6  ;;  %1858 = vst [vmem:[%s5821_s1 + $0x1a] sm:$0x1] %v1845_v43  ;;  %1861 = vst [vmem:[%s5821_s1 + $0x32] sm:$0x1] %v1844_v36 }
 0xcbf   : > { %1862 = vst [vmem:[%s5821_s1 + $0x3a] sm:$0x1] %v1846_v23  ;;  %v6506_v23 = vld [vmem:[#allocation13 + $0xf0] sm:$0xff] }
 0xcd0   : > { %v4424_v5 = vpop.f32.mrf.mxu0 }
 0xcd2   : > { %v4425_v20 = vpop.f32.mrf.mxu0 }
 0xcd3   : > { %v4426_v4 = vadd.f32 %v4425_v20, %v4424_v5  ;;  %v6509_v20 = vld [vmem:[#allocation13 + $0x70] sm:$0xff] }
 0xcd5   : > { %v1946_v27 = vadd.f32 %v6494_v50, %v4426_v4 }
 0xcd7   : > { %5045 = vtanh.f32 %v1946_v27  ;;  %v6503_v27 = vld [vmem:[#allocation13 + $0x78] sm:$0xff] }
 0xce4   : > { %v5046_v32 = vpop.eup %5045 }
 0xce5   : > { %v6498_v53 = vmul.f32 %v5046_v32, %v5963_v61  ;;  %v6512_v32 = vld [vmem:[#allocation13 + $0xe8] sm:$0xff] }
 0xce7   : > { %v4114_v24 = vmul.f32 -1.442695, %v6498_v53 }
 0xce9   : > { %5047 = vpow2.f32 %v4114_v24  ;;  %v6515_v24 = vld [vmem:[#allocation13 + $0x68] sm:$0xff] }
 0xcf6   : > { %v5048_v7 = vpop.eup %5047 }
 0xcf7   : > { %v1954_v35 = vadd.f32 1.0, %v5048_v7  ;;  %v6521_v7 = vld [vmem:[#allocation13 + $0x60] sm:$0xff] }
 0xcf9   : > { %5049 = vrcp.f32 %v1954_v35  ;;  %v6524_v35 = vld [vmem:[#allocation13 + $0xd8] sm:$0xff] }
 0xd06   : > { %v5050_v36 = vpop.eup %5049 }
 0xd07   : > { %1958 = vrot.lane.b32.xlu0 %v5050_v36, %s5532_s30  ;;  %v1962_v43 = vmul.f32 2.0, %v5050_v36 }
 0xd79   : > { %v1959_v5 = vpop.permute.xlu0 %1958 }
 0xd7a   : > { %v1961_v3 = vadd.f32 %v5050_v36, %v1959_v5  ;;  %v1963_v8 = vmul.f32 %v1962_v43, %v1959_v5  ;;  %v6527_v36 = vld [vmem:[#allocation13 + $0x58] sm:$0xff]  ;;  %v6530_v43 = vld [vmem:[#allocation13 + $0xd0] sm:$0xff] }
 0xd7b   : > { %7451 = vst [vmem:[#allocation44_spill] sm:$0xff] %v6530_v43  ;;  %v6533_v5 = vld [vmem:[#allocation13 + $0x50] sm:$0xff] }
 0xd7c   : > { %v1964_v6 = vsub.f32 %v1961_v3, %v1963_v8  ;;  %7452 = vst [vmem:[#allocation45_spill] sm:$0xff] %v6533_v5  ;;  %v6536_v3 = vld [vmem:[#allocation13 + $0xc8] sm:$0xff] }
 0xd7d   : > { %7453 = vst [vmem:[#allocation46_spill] sm:$0xff] %v6536_v3  ;;  %v6539_v8 = vld [vmem:[#allocation13 + $0x48] sm:$0xff] }
 0xd7e   : > { %v1965_v4 = vmul.f32 0.5, %v1964_v6  ;;  %v6542_v6 = vld [vmem:[#allocation13 + $0xc0] sm:$0xff] }
 0xd80   : > { %4819 = vmatmul.mubr.msk.f32.vlgmr.msra.gmra.mxu1 %vm728_vm8, %v1965_v4  ;;  %v6545_v4 = vld [vmem:[#allocation13 + $0x40] sm:$0xff] }
 0xd81   : > { %2105 = vmatprep.mubr.f32.mxu1 %v1796_v2  ;;  %4431 = vmatpush3.msra.mxu1 %v6503_v27  ;;  %v6518_v2 = vld [vmem:[#allocation13 + $0xe0] sm:$0xff] }
 0xd82   : > { %4432 = vmatprep.subr.mxu1 %v6506_v23 }
 0xd83   : > { %4433 = vmatpush3.msra.mxu1 %v6509_v20 }
 0xd84   : > { %4434 = vmatprep.subr.mxu1 %v6512_v32 }
 0xd85   : > { %4435 = vmatpush3.msra.mxu1 %v6515_v24 }
 0xd86   : > { %4436 = vmatprep.subr.mxu1 %v6518_v2 }
 0xd87   : > { %4437 = vmatpush3.msra.mxu1 %v6521_v7 }
 0xd88   : > { %4438 = vmatprep.subr.mxu1 %v6524_v35 }
 0xd89   : > { %4439 = vmatpush3.msra.mxu1 %v6527_v36 }
 0xd8a   : > { %4440 = vmatprep.subr.mxu1 %v6530_v43  ;;  %v6548_v43 = vld [vmem:[#allocation13 + $0xb8] sm:$0xff] }
 0xd8b   : > { %4441 = vmatpush3.msra.mxu1 %v6533_v5  ;;  %v6551_v5 = vld [vmem:[#allocation13 + $0x38] sm:$0xff] }
 0xd8c   : > { %4442 = vmatprep.subr.mxu1 %v6536_v3  ;;  %v6554_v3 = vld [vmem:[#allocation13 + $0xb0] sm:$0xff] }
 0xd8d   : > { %4443 = vmatpush3.msra.mxu1 %v6539_v8 }
 0xd8e   : > { %4444 = vmatprep.subr.mxu1 %v6542_v6 }
 0xd8f   : > { %4445 = vmatpush3.msra.mxu1 %v6545_v4 }
 0xd90   : > { %4446 = vmatprep.subr.mxu1 %v6548_v43 }
 0xd91   : > { %4447 = vmatpush3.msra.mxu1 %v6551_v5 }
 0xd92   : > { %4448 = vmatprep.subr.mxu1 %v6554_v3 }
 0xd93   : > { %4449 = vmatpush3.msra.mxu1 %v7420_v62 }
 0xd94   : > { %4450 = vmatprep.subr.mxu1 %v7421_v0 }
 0xd95   : > { %4451 = vmatpush3.msra.mxu1 %v7422_v15 }
 0xd96   : > { %4452 = vmatprep.subr.mxu1 %v7423_v46 }
 0xd97   : > { %4453 = vmatpush3.msra.mxu1 %v7424_v1  ;;  %v6573_v1 = vld [vmem:[#allocation10 + $0x8] sm:$0xff] }
 0xd98   : > { %4454 = vmatprep.subr.mxu1 %v7425_v14  ;;  %7454 = vst [vmem:[#allocation47_spill] sm:$0xff] %v6573_v1  ;;  %v6579_v14 = vld [vmem:[#allocation10] sm:$0xff] }
 0xd99   : > { %4455 = vmatpush3.msra.mxu1 %v7426_v16  ;;  %7455 = vst [vmem:[#allocation48_spill] sm:$0xff] %v6579_v14  ;;  %v6582_v16 = vld [vmem:[#allocation13 + $0xf8] sm:$0xff] }
 0xd9a   : > { %4456 = vmatprep.subr.mxu1 %v7427_v19  ;;  %7456 = vst [vmem:[#allocation49_spill] sm:$0xff] %v6582_v16 }
 0xd9b   : > { %4457 = vmatpush3.msra.mxu1 %v7428_v28 }
 0xd9c   : > { %4458 = vmatprep.subr.mxu1 %v7429_v30 }
 0xd9d   : > { %4459 = vmatpush3.msra.mxu1 %v7430_v31 }
 0xd9e   : > { %4460 = vmatprep.subr.mxu1 %v7431_v34 }
 0xd9f   : > { %4461 = vmatpush3.msra.mxu1 %v7432_v37 }
 0xda0   : > { %4828 = vmatprep.subr.mxu1 %v7370_v18 }
 0xe40   : > { %v2035_v62 = vpop.f32.mrf.mxu1 }
 0xe41   : > { %v2039_v0 = vadd.f32 %v2035_v62, %v6498_v53 }
 0xe42   : > { %v4820_v15 = vpop.f32.mrf.mxu1 }
 0xe43   : > { %v2040_v46 = vadd.f32 %v7433_v48, %v2039_v0 }
 0xe45   : > { %2106 = vmatmul.mubr.f32.vlgmr.msra.gmra.mxu1 %v2040_v46 }
 0xe46   : > { %4829 = vmatpush3.msra.mxu1 %v6573_v1  ;;  %4832 = vmatprep.mubr.msk.f32.mxu1 %vm5531_vm7, %v7370_v18 }
 0xe47   : > { %4830 = vmatprep.subr.mxu1 %v7370_v18 }
 0xe48   : > { %4831 = vmatpush3.msra.mxu1 %v6579_v14 }
 0xe49   : > { %4506 = vmatprep.subr.mxu1 %v6582_v16 }
 0xf05   : > { %v4462_v19 = vpop.f32.mrf.mxu1 }
 0xf07   : > { %v4463_v28 = vpop.f32.mrf.mxu1 }
 0xf08   : > { %v4464_v30 = vadd.f32 %v4463_v28, %v4462_v19 }
 0xf0a   : > { %v2108_v31 = vadd.f32 %v4464_v30, %v6091_v44 }
 0xf0c   : > { %5051 = vtanh.f32 %v2108_v31  ;;  %v7457_v31 = vld [vmem:[#allocation28_spill] sm:$0xff] }
 0xf19   : > { %v5052_v34 = vpop.eup %5051 }
 0xf1a   : > { %v6587_v37 = vmul.f32 %v5052_v34, %v7402_v63 }
 0xf1c   : > { %v4116_v48 = vmul.f32 -1.442695, %v6587_v37 }
 0xf1e   : > { %5053 = vpow2.f32 %v4116_v48  ;;  %v7458_v48 = vld [vmem:[#allocation33_spill] sm:$0xff] }
 0xf2b   : > { %v5054_v53 = vpop.eup %5053 }
 0xf2c   : > { %v2116_v62 = vadd.f32 1.0, %v5054_v53 }
 0xf2e   : > { %5055 = vrcp.f32 %v2116_v62  ;;  %v7459_v62 = vld [vmem:[#allocation31_spill] sm:$0xff] }
 0xf3b   : > { %v5056_v0 = vpop.eup %5055 }
 0xf3c   : > { %2120 = vrot.lane.b32.xlu1 %v5056_v0, %s5532_s30  ;;  %v2124_v15 = vmul.f32 2.0, %v5056_v0 }
 0xfae   : > { %v2121_v16 = vpop.permute.xlu1 %2120 }
 0xfaf   : > { %v2123_v14 = vadd.f32 %v5056_v0, %v2121_v16  ;;  %v2125_v19 = vmul.f32 %v2124_v15, %v2121_v16  ;;  %v7460_v0 = vld [vmem:[#allocation32_spill] sm:$0xff]  ;;  %v7461_v15 = vld [vmem:[#allocation34_spill] sm:$0xff] }
 0xfb1   : > { %v2126_v28 = vsub.f32 %v2123_v14, %v2125_v19  ;;  %v2272_v14 = vsel %vm613_vm0, %v5915_v39, %v5901_v33 }
 0xfb2   : > { %v2273_v30 = vsel %vm616_vm1, %v5929_v45, %v2272_v14  ;;  %v7464_v14 = vld [vmem:[#allocation64_spill] sm:$0xff] }
 0xfb3   : > { %v2127_v44 = vmul.f32 0.5, %v2126_v28  ;;  %v2274_v53 = vsel %vm619_vm2, %v7458_v48, %v2273_v30  ;;  %v7467_v30 = vld [vmem:[#allocation42_spill] sm:$0xff] }
 0xfb4   : > { %v2279_v28 = vrot.slane %v2274_v53, 4  ;;  %v6650_v53 = vld [vmem:[%s7141_s8] sm:$0xff] }
 0xfb5   : > { %4826 = vmatmul.mubr.msk.f32.vlgmr.msra.gmra.mxu0 %vm728_vm8, %v2127_v44  ;;  %v7462_v44 = vld [vmem:[#allocation35_spill] sm:$0xff]  ;;  %7469 = vst [vmem:[#allocation51_spill] sm:$0xff] %v6650_v53 }
 0xfb6   : > { %4469 = vmatpush3.msra.mxu0 %v6359_v9  ;;  %2349 = vmatprep.mubr.f32.mxu0 %v2040_v46  ;;  %v2269_v46 = vsel %vm625_vm4, %v5873_v21, %v6399_v42 }
 0xfb7   : > { %4470 = vmatprep.subr.mxu0 %v6362_v10  ;;  %v2270_v16 = vsel %vm628_vm5, %v5875_v22, %v2269_v46  ;;  %v7463_v46 = vld [vmem:[#allocation36_spill] sm:$0xff]  ;;  %v7465_v22 = vld [vmem:[#allocation65_spill] sm:$0xff] }
 0xfb8   : > { %4471 = vmatpush3.msra.mxu0 %v6365_v11  ;;  %v2271_v34 = vsel %vm631_vm6, %v7457_v31, %v2270_v16 }
 0xfb9   : > { %4472 = vmatprep.subr.mxu0 %v6368_v12  ;;  %v2278_v19 = vrot.slane %v2271_v34, 4  ;;  %v6641_v34 = vld [vmem:[%s7141_s8 + $0x8] sm:$0xff] }
 0xfba   : > { %4473 = vmatpush3.msra.mxu0 %v6371_v13  ;;  %7468 = vst [vmem:[#allocation50_spill] sm:$0xff] %v6641_v34 }
 0xfbb   : > { %4474 = vmatprep.subr.mxu0 %v6374_v57  ;;  %v2280_v16 = vsel %vm2277_vm12, %v2278_v19, %v2279_v28  ;;  %v7470_v19 = vld [vmem:[#allocation43_spill] sm:$0xff] }
 0xfbc   : > { %4475 = vmatpush3.msra.mxu0 %v6377_v52 }
 0xfbd   : > { %4476 = vmatprep.subr.mxu0 %v6380_v55 }
 0xfbe   : > { %4477 = vmatpush3.msra.mxu0 %v6383_v56 }
 0xfbf   : > { %4478 = vmatprep.subr.mxu0 %v6386_v58 }
 0xfc0   : > { %4479 = vmatpush3.msra.mxu0 %v6389_v59 }
 0xfc1   : > { %4480 = vmatprep.subr.mxu0 %v6392_v60 }
 0xfc2   : > { %4481 = vmatpush3.msra.mxu0 %v6395_v40 }
 0xfc3   : > { %4482 = vmatprep.subr.mxu0 %v6404_v49 }
 0xfc4   : > { %4483 = vmatpush3.msra.mxu0 %v6407_v38 }
 0xfc5   : > { %4484 = vmatprep.subr.mxu0 %v6410_v29 }
 0xfc6   : > { %4485 = vmatpush3.msra.mxu0 %v6415_v47 }
 0xfc7   : > { %4486 = vmatprep.subr.mxu0 %v6418_v25 }
 0xfc8   : > { %4487 = vmatpush3.msra.mxu0 %v6421_v51 }
 0xfc9   : > { %4488 = vmatprep.subr.mxu0 %v6429_v26 }
 0xfca   : > { %4489 = vmatpush3.msra.mxu0 %v6432_v17 }
 0xfcb   : > { %4490 = vmatprep.subr.mxu0 %v6435_v54  ;;  %v7466_v54 = vld [vmem:[#allocation25_spill] sm:$0xff] }
 0xfcc   : > { %4491 = vmatpush3.msra.mxu0 %v7459_v62 }
 0xfcd   : > { %4492 = vmatprep.subr.mxu0 %v7460_v0 }
 0xfce   : > { %4493 = vmatpush3.msra.mxu0 %v7461_v15 }
 0xfcf   : > { %4494 = vmatprep.subr.mxu0 %v7462_v44 }
 0xfd0   : > { %4495 = vmatpush3.msra.mxu0 %v7463_v46 }
 0xfd1   : > { %4496 = vmatprep.subr.mxu0 %v7464_v14 }
 0xfd2   : > { %4497 = vmatpush3.msra.mxu0 %v7465_v22 }
 0xfd3   : > { %4498 = vmatprep.subr.mxu0 %v7466_v54 }
 0xfd4   : > { %4499 = vmatpush3.msra.mxu0 %v7467_v30  ;;  %v7471_v30 = vld [vmem:[#allocation66_spill] sm:$0xff] }
 0xfd5   : > { %2350 = vmatmul.mubr.f32.vlgmr.msra.gmra.mxu0 %v2280_v16  ;;  %4835 = vmatprep.subr.mxu0 %v7370_v18 }
 0xfd6   : > { %4836 = vmatpush3.msra.mxu0 %v6641_v34  ;;  %4839 = vmatprep.mubr.msk.f32.mxu0 %vm5531_vm7, %v7370_v18 }
 0xfd7   : > { %4837 = vmatprep.subr.mxu0 %v7370_v18 }
 0xfd8   : > { %4838 = vmatpush3.msra.mxu0 %v6650_v53 }
 0xfd9   : > { %4544 = vmatprep.subr.mxu0 %v7470_v19 }
0x1075   : > { %v2197_v28 = vpop.f32.mrf.mxu0 }
0x1076   : > { %v2201_v16 = vadd.f32 %v2197_v28, %v6587_v37 }
0x1077   : > { %v4827_v34 = vpop.f32.mrf.mxu0 }
0x1078   : > { %v2202_v54 = vadd.f32 %v7471_v30, %v2201_v16 }
0x107a   : > { %v2204_v22 = vcombine.high %v2202_v54, %v2202_v54  ;;  %v2211_v14 = vrot.slane %v2202_v54, %v6174_v41 }
0x107c   : > { %v2218_v46 = vrot.slane %v2204_v22, %v6174_v41  ;;  %v2219_v44 = vcombine.high %v2211_v14, %v2211_v14  ;;  %v2227_v53 = vrot.slane %v2211_v14, %v6174_v41  ;;  %4118 = vst.sshfl [vmem:[%s5821_s1 + $0x3] sm:$0x1 pattern:$0x73625140] %v2211_v14 }
0x107e   : > { %v2220_v19 = vcombine.high %v2218_v46, %v2218_v46  ;;  %v2234_v37 = vrot.slane %v2218_v46, %v6174_v41  ;;  %v2241_v34 = vrot.slane %v2219_v44, %v6174_v41  ;;  %v2249_v30 = vcombine.high %v2227_v53, %v2227_v53  ;;  %4119 = vst.sshfl [vmem:[%s5821_s1 + $0xb] sm:$0x1 pattern:$0x73625140] %v2219_v44 }
0x107f   : > { %4120 = vst.sshfl [vmem:[%s5821_s1 + $0x23] sm:$0x1 pattern:$0x73625140] %v2218_v46 }
0x1080   : > { %v2248_v28 = vrot.slane %v2220_v19, %v6174_v41  ;;  %v2250_v16 = vcombine.high %v2234_v37, %v2234_v37  ;;  %v2251_v15 = vcombine.high %v2241_v34, %v2241_v34  ;;  %2263 = vst [vmem:[%s5821_s1 + $0x13] sm:$0x1] %v2249_v30  ;;  %4121 = vst.sshfl [vmem:[%s5821_s1 + $0x2b] sm:$0x1 pattern:$0x73625140] %v2220_v19 }
0x1082   : > { %v2252_v22 = vcombine.high %v2248_v28, %v2248_v28  ;;  %2264 = vst [vmem:[%s5821_s1 + $0x1b] sm:$0x1] %v2251_v15  ;;  %2267 = vst [vmem:[%s5821_s1 + $0x33] sm:$0x1] %v2250_v16 }
0x1084   : > { %2268 = vst [vmem:[%s5821_s1 + $0x3b] sm:$0x1] %v2252_v22  ;;  %v6695_v22 = vld [vmem:[#allocation13 + $0xa8] sm:$0xff] }
0x1085   : > { %7476 = vst [vmem:[#allocation53_spill] sm:$0xff] %v6695_v22 }
0x1095   : > { %v4500_v0 = vpop.f32.mrf.mxu0 }
0x1097   : > { %v4501_v14 = vpop.f32.mrf.mxu0 }
0x1098   : > { %v4502_v62 = vadd.f32 %v4501_v14, %v4500_v0  ;;  %v6698_v14 = vld [vmem:[#allocation13 + $0x28] sm:$0xff] }
0x1099   : > { %7477 = vst [vmem:[#allocation54_spill] sm:$0xff] %v6698_v14 }
0x109a   : > { %v2352_v48 = vadd.f32 %v6494_v50, %v4502_v62  ;;  %v6692_v62 = vld [vmem:[#allocation13 + $0x30] sm:$0xff] }
0x109b   : > { %7475 = vst [vmem:[#allocation52_spill] sm:$0xff] %v6692_v62 }
0x109c   : > { %5057 = vtanh.f32 %v2352_v48  ;;  %v7474_v48 = vld [vmem:[#allocation46_spill] sm:$0xff] }
0x10a9   : > { %v5058_v17 = vpop.eup %5057 }
0x10aa   : > { %v2356_v44 = vmul.f32 %v5058_v17, %v5963_v61  ;;  %v7472_v17 = vld [vmem:[#allocation44_spill] sm:$0xff] }
0x10ac   : > { %v4123_v46 = vmul.f32 -1.442695, %v2356_v44 }
0x10ae   : > { %5059 = vpow2.f32 %v4123_v46  ;;  %v6701_v46 = vld [vmem:[#allocation13 + $0xa0] sm:$0xff] }
0x10af   : > { %7478 = vst [vmem:[#allocation55_spill] sm:$0xff] %v6701_v46 }
0x10bb   : > { %v5060_v53 = vpop.eup %5059 }
0x10bc   : > { %v2360_v37 = vadd.f32 1.0, %v5060_v53  ;;  %v6704_v53 = vld [vmem:[#allocation13 + $0x20] sm:$0xff] }
0x10bd   : > { %7479 = vst [vmem:[#allocation56_spill] sm:$0xff] %v6704_v53 }
0x10be   : > { %5061 = vrcp.f32 %v2360_v37  ;;  %v6707_v37 = vld [vmem:[#allocation13 + $0x98] sm:$0xff] }
0x10bf   : > { %7480 = vst [vmem:[#allocation57_spill] sm:$0xff] %v6707_v37 }
0x10cb   : > { %v5062_v34 = vpop.eup %5061 }
0x10cc   : > { %2364 = vrot.lane.b32.xlu0 %v5062_v34, %s5532_s30  ;;  %v2368_v15 = vmul.f32 2.0, %v5062_v34 }
0x113e   : > { %v2365_v19 = vpop.permute.xlu0 %2364 }
0x113f   : > { %v2367_v30 = vadd.f32 %v5062_v34, %v2365_v19  ;;  %v2369_v28 = vmul.f32 %v2368_v15, %v2365_v19  ;;  %v6710_v34 = vld [vmem:[#allocation13 + $0x18] sm:$0xff]  ;;  %v6713_v15 = vld [vmem:[#allocation13 + $0x90] sm:$0xff] }
0x1140   : > { %7481 = vst [vmem:[#allocation58_spill] sm:$0xff] %v6710_v34  ;;  %7482 = vst [vmem:[#allocation59_spill] sm:$0xff] %v6713_v15  ;;  %v6716_v19 = vld [vmem:[#allocation13 + $0x10] sm:$0xff] }
0x1141   : > { %v2370_v16 = vsub.f32 %v2367_v30, %v2369_v28  ;;  %7483 = vst [vmem:[#allocation60_spill] sm:$0xff] %v6716_v19  ;;  %v6719_v30 = vld [vmem:[#allocation13 + $0x88] sm:$0xff] }
0x1142   : > { %7484 = vst [vmem:[#allocation61_spill] sm:$0xff] %v6719_v30  ;;  %v6722_v28 = vld [vmem:[#allocation13 + $0x8] sm:$0xff] }
0x1143   : > { %v2371_v0 = vmul.f32 0.5, %v2370_v16  ;;  %7485 = vst [vmem:[#allocation62_spill] sm:$0xff] %v6722_v28  ;;  %v6725_v16 = vld [vmem:[#allocation13 + $0x80] sm:$0xff] }
0x1144   : > { %7486 = vst [vmem:[#allocation37_spill] sm:$0xff] %v6725_v16 }
0x1145   : > { %4833 = vmatmul.mubr.msk.f32.vlgmr.msra.gmra.mxu1 %vm728_vm8, %v2371_v0  ;;  %v6728_v0 = vld [vmem:[#allocation13] sm:$0xff] }
0x1146   : > { %2511 = vmatprep.mubr.f32.mxu1 %v2202_v54  ;;  %4507 = vmatpush3.msra.mxu1 %v6503_v27  ;;  %v7473_v54 = vld [vmem:[#allocation45_spill] sm:$0xff]  ;;  %7487 = vst [vmem:[#allocation38_spill] sm:$0xff] %v6728_v0 }
0x1147   : > { %4508 = vmatprep.subr.mxu1 %v6506_v23 }
0x1148   : > { %4509 = vmatpush3.msra.mxu1 %v6509_v20 }
0x1149   : > { %4510 = vmatprep.subr.mxu1 %v6512_v32 }
0x114a   : > { %4511 = vmatpush3.msra.mxu1 %v6515_v24 }
0x114b   : > { %4512 = vmatprep.subr.mxu1 %v6518_v2 }
0x114c   : > { %4513 = vmatpush3.msra.mxu1 %v6521_v7 }
0x114d   : > { %4514 = vmatprep.subr.mxu1 %v6524_v35 }
0x114e   : > { %4515 = vmatpush3.msra.mxu1 %v6527_v36 }
0x114f   : > { %4516 = vmatprep.subr.mxu1 %v7472_v17 }
0x1150   : > { %4517 = vmatpush3.msra.mxu1 %v7473_v54 }
0x1151   : > { %4518 = vmatprep.subr.mxu1 %v7474_v48 }
0x1152   : > { %4519 = vmatpush3.msra.mxu1 %v6539_v8 }
0x1153   : > { %4520 = vmatprep.subr.mxu1 %v6542_v6 }
0x1154   : > { %4521 = vmatpush3.msra.mxu1 %v6545_v4 }
0x1155   : > { %4522 = vmatprep.subr.mxu1 %v6548_v43 }
0x1156   : > { %4523 = vmatpush3.msra.mxu1 %v6551_v5 }
0x1157   : > { %4524 = vmatprep.subr.mxu1 %v6554_v3 }
0x1158   : > { %4525 = vmatpush3.msra.mxu1 %v6692_v62 }
0x1159   : > { %4526 = vmatprep.subr.mxu1 %v6695_v22 }
0x115a   : > { %4527 = vmatpush3.msra.mxu1 %v6698_v14 }
0x115b   : > { %4528 = vmatprep.subr.mxu1 %v6701_v46 }
0x115c   : > { %4529 = vmatpush3.msra.mxu1 %v6704_v53 }
0x115d   : > { %4530 = vmatprep.subr.mxu1 %v6707_v37  ;;  %v6732_v37 = vld [vmem:[#allocation12] ss:$0 sm:$0xff] }
0x115e   : > { %4531 = vmatpush3.msra.mxu1 %v6710_v34  ;;  %7488 = vst [vmem:[#allocation39_spill] sm:$0xff] %v6732_v37 }
0x115f   : > { %4532 = vmatprep.subr.mxu1 %v6713_v15 }
0x1160   : > { %4533 = vmatpush3.msra.mxu1 %v6716_v19 }
0x1161   : > { %4534 = vmatprep.subr.mxu1 %v6719_v30 }
0x1162   : > { %4535 = vmatpush3.msra.mxu1 %v6722_v28 }
0x1163   : > { %4536 = vmatprep.subr.mxu1 %v6725_v16  ;;  %v7489_v16 = vld [vmem:[#allocation48_spill] sm:$0xff] }
0x1164   : > { %4537 = vmatpush3.msra.mxu1 %v6728_v0  ;;  %v7490_v0 = vld [vmem:[#allocation49_spill] sm:$0xff] }
0x1165   : > { %4842 = vmatprep.subr.mxu1 %v7370_v18 }
0x1205   : > { %v2441_v15 = vpop.f32.mrf.mxu1 }
0x1206   : > { %v2445_v19 = vadd.f32 %v2441_v15, %v2356_v44 }
0x1207   : > { %v4834_v34 = vpop.f32.mrf.mxu1 }
0x1208   : > { %v2446_v30 = vadd.f32 %v6732_v37, %v2445_v19  ;;  %v6741_v34 = vld [vmem:[#allocation15] ss:$0 sm:$0xff] }
0x120a   : > { %2512 = vmatmul.mubr.f32.vlgmr.msra.gmra.mxu1 %v2446_v30 }
0x120b   : > { %4843 = vmatpush3.msra.mxu1 %v6573_v1  ;;  %4846 = vmatprep.mubr.msk.f32.mxu1 %vm5531_vm7, %v7370_v18 }
0x120c   : > { %4844 = vmatprep.subr.mxu1 %v7370_v18 }
0x120d   : > { %4845 = vmatpush3.msra.mxu1 %v7489_v16 }
0x120e   : > { %4582 = vmatprep.subr.mxu1 %v7490_v0 }
0x12ca   : > { %v4538_v28 = vpop.f32.mrf.mxu1 }
0x12cc   : > { %v4539_v53 = vpop.f32.mrf.mxu1 }
0x12cd   : > { %v4540_v44 = vadd.f32 %v4539_v53, %v4538_v28 }
0x12cf   : > { %v2514_v15 = vadd.f32 %v6741_v34, %v4540_v44 }
0x12d1   : > { %5063 = vtanh.f32 %v2514_v15  ;;  %v7494_v15 = vld [vmem:[#allocation33_spill] sm:$0xff] }
0x12de   : > { %v5064_v19 = vpop.eup %5063 }
0x12df   : > { %v6745_v1 = vmul.f32 %v5064_v19, %v7402_v63 }
0x12e1   : > { %v4125_v37 = vmul.f32 -1.442695, %v6745_v1 }
0x12e3   : > { %5065 = vpow2.f32 %v4125_v37  ;;  %v7491_v37 = vld [vmem:[#allocation63_spill] sm:$0xff] }
0x12f0   : > { %v5066_v46 = vpop.eup %5065 }
0x12f1   : > { %v2522_v14 = vadd.f32 1.0, %v5066_v46 }
0x12f3   : > { %5067 = vrcp.f32 %v2522_v14  ;;  %v2675_v14 = vsel %vm628_vm5, %v5873_v21, %v6399_v42  ;;  %v7498_v21 = vld [vmem:[#allocation35_spill] sm:$0xff]  ;;  %v7499_v42 = vld [vmem:[#allocation36_spill] sm:$0xff] }
0x1300   : > { %v5068_v16 = vpop.eup %5067 }
0x1301   : > { %2526 = vrot.lane.b32.xlu1 %v5068_v16, %s5532_s30  ;;  %v2530_v0 = vmul.f32 2.0, %v5068_v16 }
0x1373   : > { %v2527_v53 = vpop.permute.xlu1 %2526 }
0x1374   : > { %v2529_v28 = vadd.f32 %v5068_v16, %v2527_v53  ;;  %v2531_v22 = vmul.f32 %v2530_v0, %v2527_v53  ;;  %v7493_v16 = vld [vmem:[#allocation27_spill] sm:$0xff] }
0x1375   : > { %v2676_v0 = vsel %vm631_vm6, %v7493_v16, %v2675_v14  ;;  %v7495_v53 = vld [vmem:[#allocation31_spill] sm:$0xff] }
0x1376   : > { %v2532_v62 = vsub.f32 %v2529_v28, %v2531_v22  ;;  %v7496_v28 = vld [vmem:[#allocation32_spill] sm:$0xff] }
0x1378   : > { %v2533_v44 = vmul.f32 0.5, %v2532_v62  ;;  %v2677_v62 = vsel %vm613_vm0, %v5901_v33, %v7457_v31 }
0x1379   : > { %v2678_v22 = vsel %vm616_vm1, %v5915_v39, %v2677_v62  ;;  %v2684_v62 = vrot.slane %v2676_v0, 5  ;;  %v7505_v0 = vld [vmem:[#allocation51_spill] sm:$0xff] }
0x137a   : > { %4840 = vmatmul.mubr.msk.f32.vlgmr.msra.gmra.mxu0 %vm728_vm8, %v2533_v44  ;;  %v2679_v46 = vsel %vm619_vm2, %v5929_v45, %v2678_v22  ;;  %v7497_v44 = vld [vmem:[#allocation34_spill] sm:$0xff] }
0x137b   : > { %4545 = vmatpush3.msra.mxu0 %v6359_v9  ;;  %2755 = vmatprep.mubr.f32.mxu0 %v2446_v30  ;;  %v7492_v30 = vld [vmem:[#allocation30_spill] sm:$0xff]  ;;  %v2680_v19 = vsel %vm622_vm3, %v7494_v15, %v2679_v46 }
0x137c   : > { %4546 = vmatprep.subr.mxu0 %v6362_v10  ;;  %v2685_v22 = vrot.slane %v2680_v19, 5  ;;  %v7503_v46 = vld [vmem:[#allocation42_spill] sm:$0xff]  ;;  %v7506_v19 = vld [vmem:[#allocation43_spill] sm:$0xff] }
0x137d   : > { %4547 = vmatpush3.msra.mxu0 %v6365_v11 }
0x137e   : > { %4548 = vmatprep.subr.mxu0 %v6368_v12  ;;  %v2686_v14 = vsel %vm2683_vm13, %v2684_v62, %v2685_v22 }
0x137f   : > { %4549 = vmatpush3.msra.mxu0 %v6371_v13 }
0x1380   : > { %4550 = vmatprep.subr.mxu0 %v6374_v57 }
0x1381   : > { %4551 = vmatpush3.msra.mxu0 %v6377_v52 }
0x1382   : > { %4552 = vmatprep.subr.mxu0 %v6380_v55 }
0x1383   : > { %4553 = vmatpush3.msra.mxu0 %v6383_v56 }
0x1384   : > { %4554 = vmatprep.subr.mxu0 %v6386_v58 }
0x1385   : > { %4555 = vmatpush3.msra.mxu0 %v6389_v59 }
0x1386   : > { %4556 = vmatprep.subr.mxu0 %v6392_v60 }
0x1387   : > { %4557 = vmatpush3.msra.mxu0 %v6395_v40 }
0x1388   : > { %4558 = vmatprep.subr.mxu0 %v6404_v49 }
0x1389   : > { %4559 = vmatpush3.msra.mxu0 %v6407_v38 }
0x138a   : > { %4560 = vmatprep.subr.mxu0 %v6410_v29 }
0x138b   : > { %4561 = vmatpush3.msra.mxu0 %v6415_v47 }
0x138c   : > { %4562 = vmatprep.subr.mxu0 %v6418_v25 }
0x138d   : > { %4563 = vmatpush3.msra.mxu0 %v6421_v51 }
0x138e   : > { %4564 = vmatprep.subr.mxu0 %v6429_v26  ;;  %v7502_v26 = vld [vmem:[#allocation25_spill] sm:$0xff] }
0x138f   : > { %4565 = vmatpush3.msra.mxu0 %v7491_v37  ;;  %v7501_v37 = vld [vmem:[#allocation65_spill] sm:$0xff] }
0x1390   : > { %4566 = vmatprep.subr.mxu0 %v7492_v30  ;;  %v7500_v30 = vld [vmem:[#allocation64_spill] sm:$0xff] }
0x1391   : > { %4567 = vmatpush3.msra.mxu0 %v7495_v53 }
0x1392   : > { %4568 = vmatprep.subr.mxu0 %v7496_v28 }
0x1393   : > { %4569 = vmatpush3.msra.mxu0 %v7497_v44  ;;  %v7504_v44 = vld [vmem:[#allocation50_spill] sm:$0xff] }
0x1394   : > { %4570 = vmatprep.subr.mxu0 %v7498_v21 }
0x1395   : > { %4571 = vmatpush3.msra.mxu0 %v7499_v42 }
0x1396   : > { %4572 = vmatprep.subr.mxu0 %v7500_v30 }
0x1397   : > { %4573 = vmatpush3.msra.mxu0 %v7501_v37 }
0x1398   : > { %4574 = vmatprep.subr.mxu0 %v7502_v26 }
0x1399   : > { %4575 = vmatpush3.msra.mxu0 %v7503_v46  ;;  %v6806_v46 = vld [vmem:[%s7142_s9] ss:$0 sm:$0xff] }
0x139a   : > { %2756 = vmatmul.mubr.f32.vlgmr.msra.gmra.mxu0 %v2686_v14  ;;  %4849 = vmatprep.subr.mxu0 %v7370_v18  ;;  %7507 = vst [vmem:[#allocation28_spill] sm:$0xff] %v6806_v46 }
0x139b   : > { %4850 = vmatpush3.msra.mxu0 %v7504_v44  ;;  %4853 = vmatprep.mubr.msk.f32.mxu0 %vm5531_vm7, %v7370_v18 }
0x139c   : > { %4851 = vmatprep.subr.mxu0 %v7370_v18 }
0x139d   : > { %4852 = vmatpush3.msra.mxu0 %v7505_v0 }
0x139e   : > { %4620 = vmatprep.subr.mxu0 %v7506_v19 }
0x143a   : > { %v2603_v62 = vpop.f32.mrf.mxu0 }
0x143b   : > { %v2607_v22 = vadd.f32 %v2603_v62, %v6745_v1 }
0x143c   : > { %v4841_v14 = vpop.f32.mrf.mxu0 }
0x143d   : > { %v2608_v44 = vadd.f32 %v6806_v46, %v2607_v22 }
0x143f   : > { %v2610_v26 = vcombine.high %v2608_v44, %v2608_v44  ;;  %v2617_v0 = vrot.slane %v2608_v44, %v6174_v41 }
0x1441   : > { %v2624_v19 = vrot.slane %v2610_v26, %v6174_v41  ;;  %v2625_v37 = vcombine.high %v2617_v0, %v2617_v0  ;;  %v2633_v1 = vrot.slane %v2617_v0, %v6174_v41  ;;  %4127 = vst.sshfl [vmem:[%s5821_s1 + $0x4] sm:$0x1 pattern:$0x73625140] %v2617_v0 }
0x1443   : > { %v2626_v62 = vcombine.high %v2624_v19, %v2624_v19  ;;  %v2640_v14 = vrot.slane %v2624_v19, %v6174_v41  ;;  %v2647_v30 = vrot.slane %v2625_v37, %v6174_v41  ;;  %v2655_v22 = vcombine.high %v2633_v1, %v2633_v1  ;;  %4128 = vst.sshfl [vmem:[%s5821_s1 + $0xc] sm:$0x1 pattern:$0x73625140] %v2625_v37 }
0x1444   : > { %4129 = vst.sshfl [vmem:[%s5821_s1 + $0x24] sm:$0x1 pattern:$0x73625140] %v2624_v19 }
0x1445   : > { %v2654_v46 = vrot.slane %v2626_v62, %v6174_v41  ;;  %v2656_v42 = vcombine.high %v2640_v14, %v2640_v14  ;;  %v2657_v21 = vcombine.high %v2647_v30, %v2647_v30  ;;  %2669 = vst [vmem:[%s5821_s1 + $0x14] sm:$0x1] %v2655_v22  ;;  %4130 = vst.sshfl [vmem:[%s5821_s1 + $0x2c] sm:$0x1 pattern:$0x73625140] %v2626_v62 }
0x1447   : > { %v2658_v26 = vcombine.high %v2654_v46, %v2654_v46  ;;  %2670 = vst [vmem:[%s5821_s1 + $0x1c] sm:$0x1] %v2657_v21  ;;  %2673 = vst [vmem:[%s5821_s1 + $0x34] sm:$0x1] %v2656_v42 }
0x1449   : > { %2674 = vst [vmem:[%s5821_s1 + $0x3c] sm:$0x1] %v2658_v26  ;;  %v7512_v26 = vld [vmem:[#allocation56_spill] sm:$0xff] }
0x145a   : > { %v4576_v28 = vpop.f32.mrf.mxu0 }
0x145c   : > { %v4577_v0 = vpop.f32.mrf.mxu0 }
0x145d   : > { %v4578_v53 = vadd.f32 %v4577_v0, %v4576_v28  ;;  %v7513_v0 = vld [vmem:[#allocation57_spill] sm:$0xff] }
0x145f   : > { %v2758_v15 = vadd.f32 %v6494_v50, %v4578_v53  ;;  %v7510_v53 = vld [vmem:[#allocation54_spill] sm:$0xff] }
0x1461   : > { %5069 = vtanh.f32 %v2758_v15  ;;  %v7509_v15 = vld [vmem:[#allocation53_spill] sm:$0xff] }
0x146e   : > { %v5070_v45 = vpop.eup %5069 }
0x146f   : > { %v2762_v37 = vmul.f32 %v5070_v45, %v5963_v61  ;;  %v7508_v45 = vld [vmem:[#allocation52_spill] sm:$0xff] }
0x1471   : > { %v4132_v19 = vmul.f32 -1.442695, %v2762_v37 }
0x1473   : > { %5071 = vpow2.f32 %v4132_v19  ;;  %v7514_v19 = vld [vmem:[#allocation58_spill] sm:$0xff] }
0x1480   : > { %v5072_v1 = vpop.eup %5071 }
0x1481   : > { %v2766_v14 = vadd.f32 1.0, %v5072_v1  ;;  %v7515_v1 = vld [vmem:[#allocation59_spill] sm:$0xff] }
0x1483   : > { %5073 = vrcp.f32 %v2766_v14  ;;  %v7516_v14 = vld [vmem:[#allocation60_spill] sm:$0xff] }
0x1490   : > { %v5074_v30 = vpop.eup %5073 }
0x1491   : > { %2770 = vrot.lane.b32.xlu0 %v5074_v30, %s5532_s30  ;;  %v2774_v21 = vmul.f32 2.0, %v5074_v30 }
0x1503   : > { %v2771_v42 = vpop.permute.xlu0 %2770 }
0x1504   : > { %v2773_v46 = vadd.f32 %v5074_v30, %v2771_v42  ;;  %v2775_v62 = vmul.f32 %v2774_v21, %v2771_v42  ;;  %v7517_v30 = vld [vmem:[#allocation61_spill] sm:$0xff]  ;;  %v7518_v21 = vld [vmem:[#allocation62_spill] sm:$0xff] }
0x1505   : > { %v7519_v42 = vld [vmem:[#allocation37_spill] sm:$0xff] }
0x1506   : > { %v2776_v22 = vsub.f32 %v2773_v46, %v2775_v62  ;;  %v7520_v46 = vld [vmem:[#allocation38_spill] sm:$0xff] }
0x1508   : > { %v2777_v28 = vmul.f32 0.5, %v2776_v22 }
0x150a   : > { %4847 = vmatmul.mubr.msk.f32.vlgmr.msra.gmra.mxu1 %vm728_vm8, %v2777_v28 }
0x150b   : > { %2917 = vmatprep.mubr.f32.mxu1 %v2608_v44  ;;  %4583 = vmatpush3.msra.mxu1 %v6503_v27  ;;  %v7511_v44 = vld [vmem:[#allocation55_spill] sm:$0xff] }
0x150c   : > { %4584 = vmatprep.subr.mxu1 %v6506_v23 }
0x150d   : > { %4585 = vmatpush3.msra.mxu1 %v6509_v20 }
0x150e   : > { %4586 = vmatprep.subr.mxu1 %v6512_v32 }
0x150f   : > { %4587 = vmatpush3.msra.mxu1 %v6515_v24 }
0x1510   : > { %4588 = vmatprep.subr.mxu1 %v6518_v2 }
0x1511   : > { %4589 = vmatpush3.msra.mxu1 %v6521_v7 }
0x1512   : > { %4590 = vmatprep.subr.mxu1 %v6524_v35 }
0x1513   : > { %4591 = vmatpush3.msra.mxu1 %v6527_v36 }
0x1514   : > { %4592 = vmatprep.subr.mxu1 %v7472_v17 }
0x1515   : > { %4593 = vmatpush3.msra.mxu1 %v7473_v54 }
0x1516   : > { %4594 = vmatprep.subr.mxu1 %v7474_v48 }
0x1517   : > { %4595 = vmatpush3.msra.mxu1 %v6539_v8 }
0x1518   : > { %4596 = vmatprep.subr.mxu1 %v6542_v6 }
0x1519   : > { %4597 = vmatpush3.msra.mxu1 %v6545_v4 }
0x151a   : > { %4598 = vmatprep.subr.mxu1 %v6548_v43 }
0x151b   : > { %4599 = vmatpush3.msra.mxu1 %v6551_v5 }
0x151c   : > { %4600 = vmatprep.subr.mxu1 %v6554_v3 }
0x151d   : > { %4601 = vmatpush3.msra.mxu1 %v7508_v45 }
0x151e   : > { %4602 = vmatprep.subr.mxu1 %v7509_v15 }
0x151f   : > { %4603 = vmatpush3.msra.mxu1 %v7510_v53 }
0x1520   : > { %4604 = vmatprep.subr.mxu1 %v7511_v44 }
0x1521   : > { %4605 = vmatpush3.msra.mxu1 %v7512_v26 }
0x1522   : > { %4606 = vmatprep.subr.mxu1 %v7513_v0  ;;  %v7521_v0 = vld [vmem:[#allocation39_spill] sm:$0xff] }
0x1523   : > { %4607 = vmatpush3.msra.mxu1 %v7514_v19  ;;  %v7522_v19 = vld [vmem:[#allocation47_spill] sm:$0xff] }
0x1524   : > { %4608 = vmatprep.subr.mxu1 %v7515_v1 }
0x1525   : > { %4609 = vmatpush3.msra.mxu1 %v7516_v14 }
0x1526   : > { %4610 = vmatprep.subr.mxu1 %v7517_v30 }
0x1527   : > { %4611 = vmatpush3.msra.mxu1 %v7518_v21  ;;  %v7523_v21 = vld [vmem:[#allocation48_spill] sm:$0xff] }
0x1528   : > { %4612 = vmatprep.subr.mxu1 %v7519_v42  ;;  %v7524_v42 = vld [vmem:[#allocation49_spill] sm:$0xff] }
0x1529   : > { %4613 = vmatpush3.msra.mxu1 %v7520_v46 }
0x152a   : > { %4856 = vmatprep.subr.mxu1 %v7370_v18 }
0x15ca   : > { %v2847_v62 = vpop.f32.mrf.mxu1 }
0x15cb   : > { %v2851_v22 = vadd.f32 %v2847_v62, %v2762_v37 }
0x15cc   : > { %v4848_v28 = vpop.f32.mrf.mxu1 }
0x15cd   : > { %v2852_v26 = vadd.f32 %v7521_v0, %v2851_v22 }
0x15cf   : > { %2918 = vmatmul.mubr.f32.vlgmr.msra.gmra.mxu1 %v2852_v26 }
0x15d0   : > { %4857 = vmatpush3.msra.mxu1 %v7522_v19  ;;  %4860 = vmatprep.mubr.msk.f32.mxu1 %vm5531_vm7, %v7370_v18 }
0x15d1   : > { %4858 = vmatprep.subr.mxu1 %v7370_v18 }
0x15d2   : > { %4859 = vmatpush3.msra.mxu1 %v7523_v21 }
0x15d3   : > { %4658 = vmatprep.subr.mxu1 %v7524_v42 }
0x168f   : > { %v4614_v46 = vpop.f32.mrf.mxu1 }
0x1691   : > { %v4615_v30 = vpop.f32.mrf.mxu1 }
0x1692   : > { %v4616_v14 = vadd.f32 %v4615_v30, %v4614_v46 }
0x1694   : > { %v2920_v37 = vadd.f32 %v6741_v34, %v4616_v14 }
0x1696   : > { %5075 = vtanh.f32 %v2920_v37  ;;  %v7542_v37 = vld [vmem:[#allocation51_spill] sm:$0xff] }
0x16a3   : > { %v5076_v62 = vpop.eup %5075 }
0x16a4   : > { %v6868_v22 = vmul.f32 %v5076_v62, %v7402_v63  ;;  %v7543_v62 = vld [vmem:[#allocation43_spill] sm:$0xff] }
0x16a6   : > { %v4134_v28 = vmul.f32 -1.442695, %v6868_v22 }
0x16a8   : > { %5077 = vpow2.f32 %v4134_v28 }
0x16b5   : > { %v5078_v19 = vpop.eup %5077 }
0x16b6   : > { %v2928_v0 = vadd.f32 1.0, %v5078_v19 }
0x16b8   : > { %5079 = vrcp.f32 %v2928_v0  ;;  %v7538_v0 = vld [vmem:[#allocation65_spill] sm:$0xff] }
0x16c5   : > { %v5080_v1 = vpop.eup %5079 }
0x16c6   : > { %2932 = vrot.lane.b32.xlu1 %v5080_v1, %s5532_s30  ;;  %v2936_v42 = vmul.f32 2.0, %v5080_v1 }
0x1738   : > { %v2933_v21 = vpop.permute.xlu1 %2932 }
0x1739   : > { %v2935_v44 = vadd.f32 %v5080_v1, %v2933_v21  ;;  %v2937_v30 = vmul.f32 %v2936_v42, %v2933_v21  ;;  %v7539_v1 = vld [vmem:[#allocation25_spill] sm:$0xff]  ;;  %v7540_v21 = vld [vmem:[#allocation42_spill] sm:$0xff] }
0x173a   : > { %v7541_v42 = vld [vmem:[#allocation50_spill] sm:$0xff] }
0x173b   : > { %v2938_v46 = vsub.f32 %v2935_v44, %v2937_v30  ;;  %v7536_v44 = vld [vmem:[#allocation36_spill] sm:$0xff] }
0x173d   : > { %v2939_v14 = vmul.f32 0.5, %v2938_v46 }
0x173f   : > { %4854 = vmatmul.mubr.msk.f32.vlgmr.msra.gmra.mxu0 %vm728_vm8, %v2939_v14  ;;  %v7544_v14 = vld [vmem:[#allocation28_spill] sm:$0xff] }
0x1740   : > { %4621 = vmatpush3.msra.mxu0 %v6359_v9  ;;  %3161 = vmatprep.mubr.f32.mxu0 %v2852_v26  ;;  %v3082_v9 = vsel %vm613_vm0, %v7457_v31, %v7493_v16  ;;  %v7537_v26 = vld [vmem:[#allocation64_spill] sm:$0xff] }
0x1741   : > { %4622 = vmatprep.subr.mxu0 %v6362_v10  ;;  %v3083_v10 = vsel %vm616_vm1, %v5901_v33, %v3082_v9 }
0x1742   : > { %4623 = vmatpush3.msra.mxu0 %v6365_v11  ;;  %v3084_v11 = vsel %vm619_vm2, %v5915_v39, %v3083_v10 }
0x1743   : > { %4624 = vmatprep.subr.mxu0 %v6368_v12  ;;  %v7525_v12 = vld [vmem:[#allocation29_spill] sm:$0xff] }
0x1744   : > { %4625 = vmatpush3.msra.mxu0 %v6371_v13  ;;  %v3085_v13 = vsel %vm622_vm3, %v7525_v12, %v3084_v11 }
0x1745   : > { %4626 = vmatprep.subr.mxu0 %v6374_v57  ;;  %v7526_v57 = vld [vmem:[#allocation41_spill] sm:$0xff] }
0x1746   : > { %4627 = vmatpush3.msra.mxu0 %v6377_v52  ;;  %v7527_v52 = vld [vmem:[#allocation63_spill] sm:$0xff] }
0x1747   : > { %4628 = vmatprep.subr.mxu0 %v6380_v55  ;;  %v7528_v55 = vld [vmem:[#allocation30_spill] sm:$0xff] }
0x1748   : > { %4629 = vmatpush3.msra.mxu0 %v6383_v56  ;;  %v7529_v56 = vld [vmem:[#allocation40_spill] sm:$0xff] }
0x1749   : > { %4630 = vmatprep.subr.mxu0 %v6386_v58  ;;  %v7530_v58 = vld [vmem:[#allocation26_spill] sm:$0xff] }
0x174a   : > { %4631 = vmatpush3.msra.mxu0 %v6389_v59  ;;  %v3081_v59 = vsel %vm631_vm6, %v7530_v58, %v7529_v56 }
0x174b   : > { %4632 = vmatprep.subr.mxu0 %v6392_v60  ;;  %v7531_v60 = vld [vmem:[#allocation33_spill] sm:$0xff] }
0x174c   : > { %4633 = vmatpush3.msra.mxu0 %v6395_v40  ;;  %v3086_v40 = vsel %vm625_vm4, %v7531_v60, %v3085_v13 }
0x174d   : > { %4634 = vmatprep.subr.mxu0 %v6404_v49  ;;  %v7532_v49 = vld [vmem:[#allocation31_spill] sm:$0xff] }
0x174e   : > { %4635 = vmatpush3.msra.mxu0 %v6407_v38  ;;  %v7533_v38 = vld [vmem:[#allocation32_spill] sm:$0xff] }
0x174f   : > { %4636 = vmatprep.subr.mxu0 %v6410_v29  ;;  %v7534_v29 = vld [vmem:[#allocation34_spill] sm:$0xff] }
0x1750   : > { %4637 = vmatpush3.msra.mxu0 %v6415_v47  ;;  %v3090_v47 = vrot.slane %v3081_v59, 6 }
0x1751   : > { %4638 = vmatprep.subr.mxu0 %v6418_v25  ;;  %v3091_v25 = vrot.slane %v3086_v40, 6 }
0x1752   : > { %4639 = vmatpush3.msra.mxu0 %v6421_v51  ;;  %v7535_v51 = vld [vmem:[#allocation35_spill] sm:$0xff] }
0x1753   : > { %4640 = vmatprep.subr.mxu0 %v7526_v57  ;;  %v3092_v19 = vsel %vm3089_vm14, %v3090_v47, %v3091_v25 }
0x1754   : > { %4641 = vmatpush3.msra.mxu0 %v7527_v52 }
0x1755   : > { %4642 = vmatprep.subr.mxu0 %v7528_v55 }
0x1756   : > { %4643 = vmatpush3.msra.mxu0 %v7532_v49 }
0x1757   : > { %4644 = vmatprep.subr.mxu0 %v7533_v38 }
0x1758   : > { %4645 = vmatpush3.msra.mxu0 %v7534_v29 }
0x1759   : > { %4646 = vmatprep.subr.mxu0 %v7535_v51 }
0x175a   : > { %4647 = vmatpush3.msra.mxu0 %v7536_v44 }
0x175b   : > { %4648 = vmatprep.subr.mxu0 %v7537_v26 }
0x175c   : > { %4649 = vmatpush3.msra.mxu0 %v7538_v0 }
0x175d   : > { %4650 = vmatprep.subr.mxu0 %v7539_v1 }
0x175e   : > { %4651 = vmatpush3.msra.mxu0 %v7540_v21 }
0x175f   : > { %3162 = vmatmul.mubr.f32.vlgmr.msra.gmra.mxu0 %v3092_v19  ;;  %4863 = vmatprep.subr.mxu0 %v7370_v18 }
0x1760   : > { %4864 = vmatpush3.msra.mxu0 %v7541_v42  ;;  %4867 = vmatprep.mubr.msk.f32.mxu0 %vm5531_vm7, %v7370_v18 }
0x1761   : > { %4865 = vmatprep.subr.mxu0 %v7370_v18 }
0x1762   : > { %4866 = vmatpush3.msra.mxu0 %v7542_v37 }
0x1763   : > { %4696 = vmatprep.subr.mxu0 %v7543_v62 }
0x17ff   : > { %v3009_v28 = vpop.f32.mrf.mxu0 }
0x1800   : > { %v3013_v30 = vadd.f32 %v3009_v28, %v6868_v22 }
0x1801   : > { %v4855_v46 = vpop.f32.mrf.mxu0 }
0x1802   : > { %v3014_v9 = vadd.f32 %v7544_v14, %v3013_v30 }
0x1804   : > { %v3016_v10 = vcombine.high %v3014_v9, %v3014_v9  ;;  %v3023_v11 = vrot.slane %v3014_v9, %v6174_v41 }
0x1806   : > { %v3030_v13 = vrot.slane %v3016_v10, %v6174_v41  ;;  %v3031_v57 = vcombine.high %v3023_v11, %v3023_v11  ;;  %v3039_v52 = vrot.slane %v3023_v11, %v6174_v41  ;;  %4136 = vst.sshfl [vmem:[%s5821_s1 + $0x5] sm:$0x1 pattern:$0x73625140] %v3023_v11 }
0x1808   : > { %v3032_v55 = vcombine.high %v3030_v13, %v3030_v13  ;;  %v3046_v22 = vrot.slane %v3030_v13, %v6174_v41  ;;  %v3053_v56 = vrot.slane %v3031_v57, %v6174_v41  ;;  %v3061_v59 = vcombine.high %v3039_v52, %v3039_v52  ;;  %4137 = vst.sshfl [vmem:[%s5821_s1 + $0xd] sm:$0x1 pattern:$0x73625140] %v3031_v57 }
0x1809   : > { %4138 = vst.sshfl [vmem:[%s5821_s1 + $0x25] sm:$0x1 pattern:$0x73625140] %v3030_v13 }
0x180a   : > { %v3060_v40 = vrot.slane %v3032_v55, %v6174_v41  ;;  %v3062_v49 = vcombine.high %v3046_v22, %v3046_v22  ;;  %v3063_v38 = vcombine.high %v3053_v56, %v3053_v56  ;;  %3075 = vst [vmem:[%s5821_s1 + $0x15] sm:$0x1] %v3061_v59  ;;  %4139 = vst.sshfl [vmem:[%s5821_s1 + $0x2d] sm:$0x1 pattern:$0x73625140] %v3032_v55 }
0x180c   : > { %v3064_v29 = vcombine.high %v3060_v40, %v3060_v40  ;;  %3076 = vst [vmem:[%s5821_s1 + $0x1d] sm:$0x1] %v3063_v38  ;;  %3079 = vst [vmem:[%s5821_s1 + $0x35] sm:$0x1] %v3062_v49 }
0x180e   : > { %3080 = vst [vmem:[%s5821_s1 + $0x3d] sm:$0x1] %v3064_v29 }
0x181f   : > { %v4652_v47 = vpop.f32.mrf.mxu0 }
0x1821   : > { %v4653_v25 = vpop.f32.mrf.mxu0 }
0x1822   : > { %v4654_v51 = vadd.f32 %v4653_v25, %v4652_v47 }
0x1824   : > { %v3164_v44 = vadd.f32 %v6494_v50, %v4654_v51  ;;  %v7545_v50 = vld [vmem:[#allocation55_spill] sm:$0xff] }
0x1826   : > { %5081 = vtanh.f32 %v3164_v44 }
0x1833   : > { %v5082_v26 = vpop.eup %5081 }
0x1834   : > { %v3168_v0 = vmul.f32 %v5082_v26, %v5963_v61  ;;  %v5178_v26 = vld [vmem:[#allocation7 + $0x78] sm:$0xff] }
0x1836   : > { %v4141_v19 = vmul.f32 -1.442695, %v3168_v0 }
0x1838   : > { %5083 = vpow2.f32 %v4141_v19  ;;  %v5180_v19 = vld [vmem:[#allocation7 + $0x70] sm:$0xff] }
0x1845   : > { %v5084_v1 = vpop.eup %5083 }
0x1846   : > { %v3172_v21 = vadd.f32 1.0, %v5084_v1  ;;  %v5181_v1 = vld [vmem:[#allocation7 + $0xe8] sm:$0xff] }
0x1848   : > { %5085 = vrcp.f32 %v3172_v21  ;;  %v5182_v21 = vld [vmem:[#allocation7 + $0x68] sm:$0xff] }
0x1855   : > { %v5086_v62 = vpop.eup %5085 }
0x1856   : > { %3176 = vrot.lane.b32.xlu0 %v5086_v62, %s5532_s30  ;;  %v3180_v28 = vmul.f32 2.0, %v5086_v62 }
0x18c8   : > { %v3177_v30 = vpop.permute.xlu0 %3176 }
0x18c9   : > { %v3179_v46 = vadd.f32 %v5086_v62, %v3177_v30  ;;  %v3181_v10 = vmul.f32 %v3180_v28, %v3177_v30  ;;  %v5183_v62 = vld [vmem:[#allocation7 + $0xe0] sm:$0xff]  ;;  %v3487_v30 = vsel %vm613_vm0, %v7493_v16, %v7530_v58  ;;  %v5193_v58 = vld [vmem:[#allocation7 + $0xb8] sm:$0xff] }
0x18ca   : > { %v5184_v28 = vld [vmem:[#allocation7 + $0x60] sm:$0xff] }
0x18cb   : > { %v3182_v11 = vsub.f32 %v3179_v46, %v3181_v10  ;;  %v5185_v46 = vld [vmem:[#allocation7 + $0xd8] sm:$0xff]  ;;  %v5192_v16 = vld [vmem:[#allocation7 + $0x40] sm:$0xff] }
0x18cc   : > { %v5186_v10 = vld [vmem:[#allocation7 + $0x58] sm:$0xff] }
0x18cd   : > { %v3183_v13 = vmul.f32 0.5, %v3182_v11  ;;  %v5187_v11 = vld [vmem:[#allocation7 + $0xd0] sm:$0xff] }
0x18cf   : > { %4861 = vmatmul.mubr.msk.f32.vlgmr.msra.gmra.mxu1 %vm728_vm8, %v3183_v13  ;;  %v3488_v13 = vsel %vm616_vm1, %v7457_v31, %v3487_v30  ;;  %v5195_v31 = vld [vmem:[#allocation7 + $0xb0] sm:$0xff] }
0x18d0   : > { %3323 = vmatprep.mubr.f32.mxu1 %v3014_v9  ;;  %4659 = vmatpush3.msra.mxu1 %v6503_v27  ;;  %v7546_v27 = vld [vmem:[#allocation56_spill] sm:$0xff] }
0x18d1   : > { %4660 = vmatprep.subr.mxu1 %v6506_v23  ;;  %v7547_v23 = vld [vmem:[#allocation57_spill] sm:$0xff] }
0x18d2   : > { %4661 = vmatpush3.msra.mxu1 %v6509_v20  ;;  %v7548_v20 = vld [vmem:[#allocation58_spill] sm:$0xff] }
0x18d3   : > { %4662 = vmatprep.subr.mxu1 %v6512_v32  ;;  %v7549_v32 = vld [vmem:[#allocation59_spill] sm:$0xff] }
0x18d4   : > { %4663 = vmatpush3.msra.mxu1 %v6515_v24  ;;  %v7550_v24 = vld [vmem:[#allocation60_spill] sm:$0xff] }
0x18d5   : > { %4664 = vmatprep.subr.mxu1 %v6518_v2  ;;  %v7551_v2 = vld [vmem:[#allocation61_spill] sm:$0xff] }
0x18d6   : > { %4665 = vmatpush3.msra.mxu1 %v6521_v7  ;;  %v7552_v7 = vld [vmem:[#allocation62_spill] sm:$0xff] }
0x18d7   : > { %4666 = vmatprep.subr.mxu1 %v6524_v35  ;;  %v7553_v35 = vld [vmem:[#allocation37_spill] sm:$0xff] }
0x18d8   : > { %4667 = vmatpush3.msra.mxu1 %v6527_v36  ;;  %v7554_v36 = vld [vmem:[#allocation38_spill] sm:$0xff] }
0x18d9   : > { %4668 = vmatprep.subr.mxu1 %v7472_v17  ;;  %v7557_v17 = vld [vmem:[#allocation48_spill] sm:$0xff] }
0x18da   : > { %4669 = vmatpush3.msra.mxu1 %v7473_v54  ;;  %v7558_v54 = vld [vmem:[#allocation49_spill] sm:$0xff] }
0x18db   : > { %4670 = vmatprep.subr.mxu1 %v7474_v48 }
0x18dc   : > { %4671 = vmatpush3.msra.mxu1 %v6539_v8  ;;  %v7555_v8 = vld [vmem:[#allocation39_spill] sm:$0xff] }
0x18dd   : > { %4672 = vmatprep.subr.mxu1 %v6542_v6 }
0x18de   : > { %4673 = vmatpush3.msra.mxu1 %v6545_v4  ;;  %v7556_v4 = vld [vmem:[#allocation47_spill] sm:$0xff] }
0x18df   : > { %4674 = vmatprep.subr.mxu1 %v6548_v43 }
0x18e0   : > { %4675 = vmatpush3.msra.mxu1 %v6551_v5 }
0x18e1   : > { %4676 = vmatprep.subr.mxu1 %v6554_v3 }
0x18e2   : > { %4677 = vmatpush3.msra.mxu1 %v7508_v45 }
0x18e3   : > { %4678 = vmatprep.subr.mxu1 %v7509_v15 }
0x18e4   : > { %4679 = vmatpush3.msra.mxu1 %v7510_v53 }
0x18e5   : > { %4680 = vmatprep.subr.mxu1 %v7545_v50 }
0x18e6   : > { %4681 = vmatpush3.msra.mxu1 %v7546_v27 }
0x18e7   : > { %4682 = vmatprep.subr.mxu1 %v7547_v23 }
0x18e8   : > { %4683 = vmatpush3.msra.mxu1 %v7548_v20 }
0x18e9   : > { %4684 = vmatprep.subr.mxu1 %v7549_v32 }
0x18ea   : > { %4685 = vmatpush3.msra.mxu1 %v7550_v24 }
0x18eb   : > { %4686 = vmatprep.subr.mxu1 %v7551_v2 }
0x18ec   : > { %4687 = vmatpush3.msra.mxu1 %v7552_v7 }
0x18ed   : > { %4688 = vmatprep.subr.mxu1 %v7553_v35 }
0x18ee   : > { %4689 = vmatpush3.msra.mxu1 %v7554_v36 }
0x18ef   : > { %4870 = vmatprep.subr.mxu1 %v7370_v18 }
0x198f   : > { %v3253_v43 = vpop.f32.mrf.mxu1 }
0x1990   : > { %v3257_v5 = vadd.f32 %v3253_v43, %v3168_v0  ;;  %v5179_v0 = vld [vmem:[#allocation7 + $0xf0] sm:$0xff] }
0x1991   : > { %v4862_v3 = vpop.f32.mrf.mxu1  ;;  %v5188_v43 = vld [vmem:[#allocation7 + $0x50] sm:$0xff] }
0x1992   : > { %v3258_v6 = vadd.f32 %v7555_v8, %v3257_v5  ;;  %v5189_v5 = vld [vmem:[#allocation7 + $0xc8] sm:$0xff] }
0x1993   : > { %v5190_v3 = vld [vmem:[#allocation7 + $0x48] sm:$0xff] }
0x1994   : > { %3324 = vmatmul.mubr.f32.vlgmr.msra.gmra.mxu1 %v3258_v6 }
0x1995   : > { %4871 = vmatpush3.msra.mxu1 %v7556_v4  ;;  %4874 = vmatprep.mubr.msk.f32.mxu1 %vm5531_vm7, %v7370_v18  ;;  %v5191_v4 = vld [vmem:[#allocation7 + $0xc0] sm:$0xff] }
0x1996   : > { %4872 = vmatprep.subr.mxu1 %v7370_v18 }
0x1997   : > { %4873 = vmatpush3.msra.mxu1 %v7557_v17 }
0x1998   : > { %4734 = vmatprep.subr.mxu1 %v7558_v54  ;;  %v5194_v54 = vld [vmem:[#allocation7 + $0x38] sm:$0xff] }
0x1a54   : > { %v4690_v48 = vpop.f32.mrf.mxu1 }
0x1a56   : > { %v4691_v9 = vpop.f32.mrf.mxu1 }
0x1a57   : > { %v4692_v57 = vadd.f32 %v4691_v9, %v4690_v48  ;;  %v5196_v48 = vld [vmem:[#allocation7 + $0x30] sm:$0xff] }
0x1a59   : > { %v3326_v52 = vadd.f32 %v6741_v34, %v4692_v57  ;;  %v5198_v57 = vld [vmem:[#allocation7 + $0x28] sm:$0xff] }
0x1a5b   : > { %5087 = vtanh.f32 %v3326_v52  ;;  %v5199_v52 = vld [vmem:[#allocation7 + $0xa0] sm:$0xff] }
0x1a68   : > { %v5088_v55 = vpop.eup %5087 }
0x1a69   : > { %v6986_v22 = vmul.f32 %v5088_v55, %v7402_v63 }
0x1a6b   : > { %v4143_v56 = vmul.f32 -1.442695, %v6986_v22 }
0x1a6d   : > { %5089 = vpow2.f32 %v4143_v56  ;;  %v5201_v56 = vld [vmem:[#allocation7 + $0x98] sm:$0xff] }
0x1a7a   : > { %v5090_v59 = vpop.eup %5089 }
0x1a7b   : > { %v3334_v40 = vadd.f32 1.0, %v5090_v59  ;;  %v5202_v59 = vld [vmem:[#allocation7 + $0x18] sm:$0xff] }
0x1a7d   : > { %5091 = vrcp.f32 %v3334_v40  ;;  %v5203_v40 = vld [vmem:[%s5803_s23] sm:$0xff]  ;;  %s5534_s23 = smov [#allocation17]  }
0x1a7e   : > { %s3921_s22 = sshll.u32 %s5534_s23, 4  ;;  %s3922_s22 = int_to_ptr.vmem [resolvable:$true] %s3921_s22 }
0x1a7f   : > { %p5420_p0 = scmp.lt.s32.totalorder %s3922_s22, %s3922_s22 }
0x1a8a   : > { %v5092_v49 = vpop.eup %5091 }
0x1a8b   : > { %3338 = vrot.lane.b32.xlu1 %v5092_v49, %s5532_s30  ;;  %v3342_v38 = vmul.f32 2.0, %v5092_v49 }
0x1afd   : > { %v3339_v29 = vpop.permute.xlu1 %3338 }
0x1afe   : > { %v3341_v47 = vadd.f32 %v5092_v49, %v3339_v29  ;;  %v3343_v25 = vmul.f32 %v3342_v38, %v3339_v29  ;;  %v3496_v49 = vrot.slane %v5203_v40, 7  ;;  %v5204_v29 = vld [vmem:[#allocation7 + $0x90] sm:$0xff]  ;;  %v5213_v40 = vld [vmem:[#allocation13 + $0x70] sm:$0xff] }
0x1b00   : > { %v3344_v51 = vsub.f32 %v3341_v47, %v3343_v25  ;;  %v5206_v47 = vld [vmem:[#allocation7 + $0x88] sm:$0xff] }
0x1b01   : > { %v5207_v25 = vld [vmem:[#allocation7 + $0x8] sm:$0xff] }
0x1b02   : > { %v3345_v44 = vmul.f32 0.5, %v3344_v51 }
0x1b04   : > { %4868 = vmatmul.mubr.msk.f32.vlgmr.msra.gmra.mxu0 %vm728_vm8, %v3345_v44  ;;  %v5209_v44 = vld [vmem:[#allocation7] sm:$0xff] }
0x1b05   : > { %4697 = vmatpush3.msra.mxu0 %v5178_v26  ;;  %3567 = vmatprep.mubr.f32.mxu0 %v3258_v6  ;;  %v3489_v6 = vsel %vm619_vm2, %v5901_v33, %v3488_v13  ;;  %v5197_v33 = vld [vmem:[#allocation7 + $0xa8] sm:$0xff] }
0x1b06   : > { %4698 = vmatprep.subr.mxu0 %v5179_v0  ;;  %v3490_v17 = vsel %vm622_vm3, %v5915_v39, %v3489_v6  ;;  %v5200_v39 = vld [vmem:[#allocation7 + $0x20] sm:$0xff] }
0x1b07   : > { %4699 = vmatpush3.msra.mxu0 %v5180_v19  ;;  %v3491_v9 = vsel %vm625_vm4, %v7525_v12, %v3490_v17  ;;  %v5205_v12 = vld [vmem:[#allocation7 + $0x10] sm:$0xff] }
0x1b08   : > { %4700 = vmatprep.subr.mxu0 %v5181_v1  ;;  %v3492_v55 = vsel %vm628_vm5, %v7531_v60, %v3491_v9  ;;  %v5208_v60 = vld [vmem:[#allocation7 + $0x80] sm:$0xff] }
0x1b09   : > { %4701 = vmatpush3.msra.mxu0 %v5182_v21  ;;  %v3497_v38 = vrot.slane %v3492_v55, 7 }
0x1b0a   : > { %4702 = vmatprep.subr.mxu0 %v5183_v62 }
0x1b0b   : > { %4703 = vmatpush3.msra.mxu0 %v5184_v28  ;;  %v3498_v51 = vsel %vm3495_vm15, %v3496_v49, %v3497_v38  ;;  %v5214_v49 = vld [vmem:[#allocation13 + $0xe8] sm:$0xff] }
0x1b0c   : > { %4704 = vmatprep.subr.mxu0 %v5185_v46  ;;  %v5215_v38 = vld [vmem:[#allocation13 + $0x68] sm:$0xff] }
0x1b0d   : > { %4705 = vmatpush3.msra.mxu0 %v5186_v10 }
0x1b0e   : > { %4706 = vmatprep.subr.mxu0 %v5187_v11 }
0x1b0f   : > { %4707 = vmatpush3.msra.mxu0 %v5188_v43 }
0x1b10   : > { %4708 = vmatprep.subr.mxu0 %v5189_v5 }
0x1b11   : > { %4709 = vmatpush3.msra.mxu0 %v5190_v3 }
0x1b12   : > { %4710 = vmatprep.subr.mxu0 %v5191_v4  ;;  %v5210_v4 = vld [vmem:[#allocation9] ss:$0 sm:$0xff] }
0x1b13   : > { %4711 = vmatpush3.msra.mxu0 %v5192_v16 }
0x1b14   : > { %4712 = vmatprep.subr.mxu0 %v5193_v58 }
0x1b15   : > { %4713 = vmatpush3.msra.mxu0 %v5194_v54 }
0x1b16   : > { %4714 = vmatprep.subr.mxu0 %v5195_v31 }
0x1b17   : > { %4715 = vmatpush3.msra.mxu0 %v5196_v48 }
0x1b18   : > { %4716 = vmatprep.subr.mxu0 %v5197_v33 }
0x1b19   : > { %4717 = vmatpush3.msra.mxu0 %v5198_v57 }
0x1b1a   : > { %4718 = vmatprep.subr.mxu0 %v5199_v52 }
0x1b1b   : > { %4719 = vmatpush3.msra.mxu0 %v5200_v39 }
0x1b1c   : > { %4720 = vmatprep.subr.mxu0 %v5201_v56 }
0x1b1d   : > { %4721 = vmatpush3.msra.mxu0 %v5202_v59  ;;  %v5212_v59 = vld [vmem:[#allocation13 + $0xf0] sm:$0xff] }
0x1b1e   : > { %4722 = vmatprep.subr.mxu0 %v5204_v29  ;;  %v5216_v29 = vld [vmem:[#allocation13 + $0xe0] sm:$0xff] }
0x1b1f   : > { %4723 = vmatpush3.msra.mxu0 %v5205_v12  ;;  %v5217_v12 = vld [vmem:[#allocation13 + $0x60] sm:$0xff] }
0x1b20   : > { %4724 = vmatprep.subr.mxu0 %v5206_v47  ;;  %v5218_v47 = vld [vmem:[#allocation13 + $0xd8] sm:$0xff] }
0x1b21   : > { %4725 = vmatpush3.msra.mxu0 %v5207_v25  ;;  %v5219_v25 = vld [vmem:[#allocation13 + $0x58] sm:$0xff] }
0x1b22   : > { %4726 = vmatprep.subr.mxu0 %v5208_v60  ;;  %v5221_v60 = vld [vmem:[#allocation13 + $0x50] sm:$0xff] }
0x1b23   : > { %4727 = vmatpush3.msra.mxu0 %v5209_v44  ;;  %v5222_v44 = vld [vmem:[#allocation13 + $0xc8] sm:$0xff] }
0x1b24   : > { %3568 = vmatmul.mubr.f32.vlgmr.msra.gmra.mxu0 %v3498_v51  ;;  %4877 = vmatprep.subr.mxu0 %v7370_v18  ;;  %v5220_v51 = vld [vmem:[#allocation13 + $0xd0] sm:$0xff] }
0x1b25   : > { %4878 = vmatpush3.msra.mxu0 %v7541_v42  ;;  %4881 = vmatprep.mubr.msk.f32.mxu0 %vm5531_vm7, %v7370_v18 }
0x1b26   : > { %4879 = vmatprep.subr.mxu0 %v7370_v18 }
0x1b27   : > { %4880 = vmatpush3.msra.mxu0 %v7542_v37 }
0x1bc4   : > { %v3415_v26 = vpop.f32.mrf.mxu0 }
0x1bc5   : > { %v3419_v0 = vadd.f32 %v3415_v26, %v6986_v22  ;;  %v5223_v26 = vld [vmem:[#allocation13 + $0x48] sm:$0xff] }
0x1bc6   : > { %v4869_v19 = vpop.f32.mrf.mxu0 }
0x1bc7   : > { %v3420_v1 = vadd.f32 %v7544_v14, %v3419_v0  ;;  %v5224_v0 = vld [vmem:[#allocation13 + $0xc0] sm:$0xff] }
0x1bc8   : > { %v5225_v19 = vld [vmem:[#allocation13 + $0x40] sm:$0xff] }
0x1bc9   : > { %v3422_v21 = vcombine.high %v3420_v1, %v3420_v1  ;;  %v3429_v42 = vrot.slane %v3420_v1, %v6174_v41 }
0x1bcb   : > { %v3436_v62 = vrot.slane %v3422_v21, %v6174_v41  ;;  %v3437_v28 = vcombine.high %v3429_v42, %v3429_v42  ;;  %v3445_v18 = vrot.slane %v3429_v42, %v6174_v41  ;;  %4145 = vst.sshfl [vmem:[%s5821_s1 + $0x6] sm:$0x1 pattern:$0x73625140] %v3429_v42  ;;  %v5227_v21 = vld [vmem:[#allocation13 + $0x38] sm:$0xff]  ;;  %v5228_v42 = vld [vmem:[#allocation13 + $0xb0] sm:$0xff] }
0x1bcd   : > { %v3438_v37 = vcombine.high %v3436_v62, %v3436_v62  ;;  %v3452_v22 = vrot.slane %v3436_v62, %v6174_v41  ;;  %v3459_v30 = vrot.slane %v3437_v28, %v6174_v41  ;;  %v3467_v46 = vcombine.high %v3445_v18, %v3445_v18  ;;  %4146 = vst.sshfl [vmem:[%s5821_s1 + $0xe] sm:$0x1 pattern:$0x73625140] %v3437_v28 }
0x1bce   : > { %4147 = vst.sshfl [vmem:[%s5821_s1 + $0x26] sm:$0x1 pattern:$0x73625140] %v3436_v62 }
0x1bcf   : > { %v3466_v10 = vrot.slane %v3438_v37, %v6174_v41  ;;  %v3468_v11 = vcombine.high %v3452_v22, %v3452_v22  ;;  %v3469_v13 = vcombine.high %v3459_v30, %v3459_v30  ;;  %3481 = vst [vmem:[%s5821_s1 + $0x16] sm:$0x1] %v3467_v46  ;;  %4148 = vst.sshfl [vmem:[%s5821_s1 + $0x2e] sm:$0x1 pattern:$0x73625140] %v3438_v37 }
0x1bd1   : > { %v3470_v43 = vcombine.high %v3466_v10, %v3466_v10  ;;  %3482 = vst [vmem:[%s5821_s1 + $0x1e] sm:$0x1] %v3469_v13  ;;  %3485 = vst [vmem:[%s5821_s1 + $0x36] sm:$0x1] %v3468_v11 }
0x1bd3   : > { %3486 = vst [vmem:[%s5821_s1 + $0x3e] sm:$0x1] %v3470_v43 }
0x1be4   : > { %v4728_v5 = vpop.f32.mrf.mxu0 }
0x1be6   : > { %v4729_v3 = vpop.f32.mrf.mxu0 }
0x1be7   : > { %v4730_v6 = vadd.f32 %v4729_v3, %v4728_v5 }
0x1be9   : > { %v3570_v16 = vadd.f32 %v5210_v4, %v4730_v6 }
0x1beb   : > { %5093 = vtanh.f32 %v3570_v16 }
0x1bf8   : > { %v5094_v58 = vpop.eup %5093 }
0x1bf9   : > { %v7028_v17 = vmul.f32 %v5094_v58, %v5963_v61  ;;  %v5211_v61 = vld [vmem:[#allocation13 + $0x78] sm:$0xff] }
0x1bfb   : > { %v4150_v54 = vmul.f32 -1.442695, %v7028_v17 }
0x1bfd   : > { %5095 = vpow2.f32 %v4150_v54 }
0x1c0a   : > { %v5096_v31 = vpop.eup %5095 }
0x1c0b   : > { %v3578_v48 = vadd.f32 1.0, %v5096_v31 }
0x1c0d   : > { %5097 = vrcp.f32 %v3578_v48 }
0x1c1a   : > { %v5098_v9 = vpop.eup %5097 }
0x1c1b   : > { %3582 = vrot.lane.b32.xlu0 %v5098_v9, %s5532_s30  ;;  %v3586_v33 = vmul.f32 2.0, %v5098_v9 }
0x1c8d   : > { %v3583_v57 = vpop.permute.xlu0 %3582 }
0x1c8e   : > { %v3585_v52 = vadd.f32 %v5098_v9, %v3583_v57  ;;  %v3587_v55 = vmul.f32 %v3586_v33, %v3583_v57 }
0x1c90   : > { %v3588_v39 = vsub.f32 %v3585_v52, %v3587_v55 }
0x1c92   : > { %v3589_v56 = vmul.f32 0.5, %v3588_v39 }
0x1c94   : > { %4875 = vmatmul.mubr.msk.f32.vlgmr.msra.gmra.mxu1 %vm728_vm8, %v3589_v56 }
0x1c95   : > { %3729 = vmatprep.mubr.f32.mxu1 %v3420_v1  ;;  %4735 = vmatpush3.msra.mxu1 %v5211_v61  ;;  %v5226_v1 = vld [vmem:[#allocation13 + $0xb8] sm:$0xff] }
0x1c96   : > { %4736 = vmatprep.subr.mxu1 %v5212_v59 }
0x1c97   : > { %4737 = vmatpush3.msra.mxu1 %v5213_v40 }
0x1c98   : > { %4738 = vmatprep.subr.mxu1 %v5214_v49 }
0x1c99   : > { %4739 = vmatpush3.msra.mxu1 %v5215_v38 }
0x1c9a   : > { %4740 = vmatprep.subr.mxu1 %v5216_v29 }
0x1c9b   : > { %4741 = vmatpush3.msra.mxu1 %v5217_v12 }
0x1c9c   : > { %4742 = vmatprep.subr.mxu1 %v5218_v47 }
0x1c9d   : > { %4743 = vmatpush3.msra.mxu1 %v5219_v25 }
0x1c9e   : > { %4744 = vmatprep.subr.mxu1 %v5220_v51 }
0x1c9f   : > { %4745 = vmatpush3.msra.mxu1 %v5221_v60 }
0x1ca0   : > { %4746 = vmatprep.subr.mxu1 %v5222_v44 }
0x1ca1   : > { %4747 = vmatpush3.msra.mxu1 %v5223_v26 }
0x1ca2   : > { %4748 = vmatprep.subr.mxu1 %v5224_v0 }
0x1ca3   : > { %4749 = vmatpush3.msra.mxu1 %v5225_v19 }
0x1ca4   : > { %4750 = vmatprep.subr.mxu1 %v5226_v1 }
0x1ca5   : > { %4751 = vmatpush3.msra.mxu1 %v5227_v21 }
0x1ca6   : > { %4752 = vmatprep.subr.mxu1 %v5228_v42 }
0x1ca7   : > { %4753 = vmatpush3.msra.mxu1 %v7508_v45 }
0x1ca8   : > { %4754 = vmatprep.subr.mxu1 %v7509_v15 }
0x1ca9   : > { %4755 = vmatpush3.msra.mxu1 %v7510_v53 }
0x1caa   : > { %4756 = vmatprep.subr.mxu1 %v7545_v50 }
0x1cab   : > { %4757 = vmatpush3.msra.mxu1 %v7546_v27 }
0x1cac   : > { %4758 = vmatprep.subr.mxu1 %v7547_v23 }
0x1cad   : > { %4759 = vmatpush3.msra.mxu1 %v7548_v20 }
0x1cae   : > { %4760 = vmatprep.subr.mxu1 %v7549_v32 }
0x1caf   : > { %4761 = vmatpush3.msra.mxu1 %v7550_v24 }
0x1cb0   : > { %4762 = vmatprep.subr.mxu1 %v7551_v2 }
0x1cb1   : > { %4763 = vmatpush3.msra.mxu1 %v7552_v7 }
0x1cb2   : > { %4764 = vmatprep.subr.mxu1 %v7553_v35 }
0x1cb3   : > { %4765 = vmatpush3.msra.mxu1 %v7554_v36 }
0x1d54   : > { %v3659_v45 = vpop.f32.mrf.mxu1 }
0x1d55   : > { %v3663_v15 = vadd.f32 %v3659_v45, %v7028_v17 }
0x1d56   : > { %v4876_v53 = vpop.f32.mrf.mxu1 }
0x1d57   : > { %v3664_v50 = vadd.f32 %v7555_v8, %v3663_v15 }
0x1d59   : > { %3893 = vst [vmem:[#allocation17] sm:$0xff] %v3664_v50  ;;  %3730 = vmatmul.mubr.f32.vlgmr.msra.gmra.mxu1 %v3664_v50 }
0x1e19   : > { %v4766_v27 = vpop.f32.mrf.mxu1 }
0x1e1b   : > { %v4767_v23 = vpop.f32.mrf.mxu1 }
0x1e1c   : > { %v4768_v20 = vadd.f32 %v4767_v23, %v4766_v27 }
0x1e1e   : > { %v3732_v32 = vadd.f32 %v6741_v34, %v4768_v20 }
0x1e20   : > { %5099 = vtanh.f32 %v3732_v32 }
0x1e2d   : > { %v5100_v24 = vpop.eup %5099 }
0x1e2e   : > { %v3736_v2 = vmul.f32 %v5100_v24, %v7402_v63 }
0x1e30   : > { %v4152_v7 = vmul.f32 -1.442695, %v3736_v2 }
0x1e32   : > { %5101 = vpow2.f32 %v4152_v7 }
0x1e3f   : > { %v5102_v35 = vpop.eup %5101 }
0x1e40   : > { %v3740_v36 = vadd.f32 1.0, %v5102_v35 }
0x1e42   : > { %5103 = vrcp.f32 %v3740_v36 }
0x1e4f   : > { %v5104_v62 = vpop.eup %5103 }
0x1e50   : > { %3744 = vrot.lane.b32.xlu1 %v5104_v62, %s5532_s30  ;;  %v3748_v8 = vmul.f32 2.0, %v5104_v62  ;;  %s5413_s30 = scalar_lea.vmem %s3922_s22, 256 }
0x1e51   : > { %p5414_p6 = scmp.ne.s32.totalorder %s3922_s22, %s5413_s30  ;;  %p5421_p5 = scmp.lt.s32.totalorder %s5413_s30, %s5413_s30 }
0x1e53   : > { %p5415_p11 = pnand %p5414_p6, %p7559_p10  ;;  %p5422_p4 = por %p5421_p5, %p5420_p0 }
0x1e55   : > { %p5416_p8 = pneg %p5415_p11 }
0x1e57   : > { %p5423_p7 = pnand %p5422_p4, %p5416_p8 }
0x1ec2   : > { %v3745_v28 = vpop.permute.xlu1 %3744 }
0x1ec3   : > { %v3747_v18 = vadd.f32 %v5104_v62, %v3745_v28  ;;  %v3749_v37 = vmul.f32 %v3748_v8, %v3745_v28 }
0x1ec5   : > { %v3750_v22 = vsub.f32 %v3747_v18, %v3749_v37 }
0x1ec7   : > { %v3751_v30 = vmul.f32 0.5, %v3750_v22 }
0x1ec9   : > { %4882 = vmatmul.mubr.msk.f32.vlgmr.msra.gmra.mxu0 %vm728_vm8, %v3751_v30 }
0x1f89   : > { %v3821_v34 = vpop.f32.mrf.mxu0 }
0x1f8a   : > { %v3825_v63 = vadd.f32 %v3821_v34, %v3736_v2 }
0x1f8b   : > { %v4883_v46 = vpop.f32.mrf.mxu0 }
0x1f8c   : > { %v3826_v10 = vadd.f32 %v7544_v14, %v3825_v63 }
0x1f8e   : > { %v3828_v11 = vcombine.high %v3826_v10, %v3826_v10  ;;  %v3835_v13 = vrot.slane %v3826_v10, %v6174_v41  ;;  %3894 = vst [vmem:[#allocation17 + $0x8] sm:$0xff] %v3826_v10 }
0x1f8f   : > { %5426 = shalt.err (!%p5423_p7)
}
0x1f90   : > { %s5535_s5 = smov 128   ;;  %s5536_s16 = smov 8   ;;  %v3842_v14 = vrot.slane %v3828_v11, %v6174_v41  ;;  %v3843_v43 = vcombine.high %v3835_v13, %v3835_v13  ;;  %v3851_v5 = vrot.slane %v3835_v13, %v6174_v41  ;;  %4154 = vst.sshfl [vmem:[%s5821_s1 + $0x7] sm:$0x1 pattern:$0x73625140] %v3835_v13 }
0x1f91   : > { %p7560_p3 = pmov %p7559_p10  ;;  %s4159_s17 = sshll.u32 %s5631_s29, 7 }
0x1f92   : > { %v3844_v3 = vcombine.high %v3842_v14, %v3842_v14  ;;  %v3858_v6 = vrot.slane %v3842_v14, %v6174_v41  ;;  %v3865_v4 = vrot.slane %v3843_v43, %v6174_v41  ;;  %v3873_v16 = vcombine.high %v3851_v5, %v3851_v5  ;;  %4155 = vst.sshfl [vmem:[%s5821_s1 + $0xf] sm:$0x1 pattern:$0x73625140] %v3843_v43  ;;  %s3908_s4 = sshll.u32 %s5821_s1, 4  ;;  %s7079_s20 = scalar_lea.hbm %s7144_s11, %s4159_s17  ;;  %s7083_s4 = int_to_ptr.vmem [resolvable:$true] %s3908_s4 }
0x1f93   : > { %4912 = dma.vmem_to_hbm [thread:$0]  (%p7560_p3), %s3922_s22, 256, %s7145_s12, [#allocation18], %s5535_s5, %s5535_s5, %s5536_s16  }
0x1f94   : > { %4156 = vst.sshfl [vmem:[%s5821_s1 + $0x27] sm:$0x1 pattern:$0x73625140] %v3842_v14  ;;  %v3872_v58 = vrot.slane %v3844_v3, %v6174_v41  ;;  %v3874_v17 = vcombine.high %v3858_v6, %v3858_v6  ;;  %v3875_v54 = vcombine.high %v3865_v4, %v3865_v4  ;;  %3887 = vst [vmem:[%s5821_s1 + $0x17] sm:$0x1] %v3873_v16 }
0x1f95   : > { %4157 = vst.sshfl [vmem:[%s5821_s1 + $0x2f] sm:$0x1 pattern:$0x73625140] %v3844_v3  ;;  %s3896_s21 = scalar_lea.sflag [#allocation6], %s5799_s19  ;;  %s5437_s23 = scalar_lea.vmem %s7083_s4, 1024 }
0x1f96   : > { %v3876_v31 = vcombine.high %v3872_v58, %v3872_v58  ;;  %3888 = vst [vmem:[%s5821_s1 + $0x1f] sm:$0x1] %v3875_v54  ;;  %3891 = vst [vmem:[%s5821_s1 + $0x37] sm:$0x1] %v3874_v17  ;;  %p5438_p1 = scmp.ne.s32.totalorder %s7083_s4, %s5437_s23  ;;  %p7561_p12 = scmp.ne.s32.totalorder %s7319_s13, 0 }
0x1f97   : > { %s5537_s22 = smov [#allocation16]  }
0x1f98   : > { %3892 = vst [vmem:[%s5821_s1 + $0x3f] sm:$0x1] %v3876_v31  ;;  %p5439_p13 = pnand %p5438_p1, %p7561_p12  ;;  %s5441_s30 = sshll.u32 %s5537_s22, 4  ;;  %s5442_s30 = int_to_ptr.vmem [resolvable:$false] %s5441_s30 }
0x1f99   : > { %s5443_s3 = scalar_lea.vmem %s5442_s30, 2048  ;;  %p5444_p9 = scmp.lt.s32.totalorder %s7083_s4, %s5442_s30 }
0x1f9a   : > { %p5440_p2 = pneg %p5439_p13  ;;  %p5445_p6 = scmp.lt.s32.totalorder %s5443_s3, %s5437_s23 }
0x1f9c   : > { %p5446_p10 = por %p5445_p6, %p5444_p9 }
0x1f9e   : > { %p5447_p11 = pnand %p5446_p10, %p5440_p2 }
0x1fa0   : > { %5450 = shalt.err (!%p5447_p11)
}
0x1fa1   : > { %s5451_s1 = scalar_lea.hbm %s7079_s20, 1024  ;;  %s5455_s15 = scalar_lea.hbm %s7144_s11, 2048 }
0x1fa2   : > { %p5452_p8 = scmp.ne.s32.totalorder %s7079_s20, %s5451_s1  ;;  %p5456_p4 = scmp.lt.s32.totalorder %s7079_s20, %s7144_s11 }
0x1fa3   : > { %p5457_p7 = scmp.lt.s32.totalorder %s5455_s15, %s5451_s1 }
0x1fa4   : > { %p5453_p0 = pnand %p5452_p8, %p7561_p12 }
0x1fa5   : > { %p5458_p3 = por %p5457_p7, %p5456_p4 }
0x1fa6   : > { %p5454_p5 = pneg %p5453_p0 }
0x1fa8   : > { %p5459_p1 = pnand %p5458_p3, %p5454_p5 }
0x1faa   : > { %5462 = shalt.err (!%p5459_p1)
}
0x1fab   : > { %s5538_s23 = smov 256   ;;  %p7562_p13 = scmp.eq.s32.totalorder %s5631_s29, 1 }
0x1fac   : > { %4910 = dma.vmem_to_hbm [thread:$0]  (%p7561_p12), %s7083_s4, 1024, %s7079_s20, %s3896_s21, %s5535_s5, %s5538_s23, %s5536_s16  }
0x1fad   : > { %5496 = dma.done.wait (%p7562_p13), [#allocation18], 256   ;;  %p7563_p2 = pmov %p7562_p13 }
0x1faf   : > { %5498 = vsyncadd (%p7563_p2), [#allocation18], 4294967040 }
0x1fb0 PF: > { %s3940_s30 = sand.u32 1, %s5505_s25   ;;  %p7564_p9 = scmp.ne.s32.totalorder %s7320_s10, 0 }
0x1fb1   : > { %p7565_p6 = scmp.ge.s32.totalorder %s5517_s28, 2  ;;  %s3941_s13 = scalar_lea.sflag [#allocation6], %s3940_s30 }
0x1fb3   : > { %p4940_p10 = pnand %p7565_p6, %p7564_p9 }
0x1fb5   : > { %p4941_p11 = pneg %p4940_p10 }
0x1fb7   : > { %5500 = dma.done.wait (%p4941_p11), %s3941_s13, 1024  }
0x1fb8   : > { %5502 = vsyncadd (%p4941_p11), %s3941_s13, 4294966272  ;;  %p32_p12 = scmp.ge.s32.totalorder %s5723_s18, 4   ;;  %s7566_s25 = smov %s5509_s26 }
0x1fb9   : > { %s7567_s26 = smov %s5513_s27  ;;  %s7568_s27 = smov %s5734_s14 }
0x1fba   : > { %s7569_s28 = smov %s5723_s18  ;;  %34 = sbr.rel (!%p32_p12) target bundleno = 16 (0x10), region = 146 }
0x1fbf   :  { %3946 = vsyncpa [#allocation5], 1 }
0x1fc0   :  { %3948 = vsyncpa [#allocation5 + $0x1], 1 }
0x1fc1   :  { %3949 = vsyncpa [#allocation8], 1 }
0x1fc2   :  { %3950 = vsyncpa [#allocation11], 1 }
0x1fc3   :  { %3951 = vsyncpa [#allocation14], 1 }
0x1fc4   :  { %3952 = vsyncpa [#allocation6], 1 }
0x1fc5   :  { %3954 = vsyncpa [#allocation6 + $0x1], 1 }
0x1fc6   :  { %3955 = vsyncpa [#allocation18], 1 }

</bundles_post_ra>
